<compile_context>
chip_gen: v7x
topology: tpu7x:2x2x1
jax: 0.10.0
libtpu: 0.0.40
codegen_flags: <defaults>
</compile_context>

<pallas_src>
import jax
import jax.numpy as jnp
from jax.experimental import pallas as pl
from jax.experimental.pallas import tpu as pltpu

_PW = 8  # sublane-aligned left pad width inside the VMEM scratch buffers


def _fused_conv_pool_x2_kernel(x_ref, w1_ref, b1_ref, w2_ref, b2_ref, o_ref,
                               pad1_ref, pad2_ref):
    # Per batch-grid step (leading N squeezed away by the BlockSpec):
    #   x_ref   : (H, W, Cin)
    #   w1_ref  : (9*Cin, C1)   row = kh*3*Cin + kw*Cin + ci (matches tap order)
    #   b1_ref  : (1, C1)
    #   w2_ref  : (9*C1, C2)
    #   b2_ref  : (1, C2)
    #   o_ref   : (H//4, W//4, C2)
    #   pad1_ref: (H+2,    W    + 2*_PW, Cin)  VMEM scratch (zero conv border)
    #   pad2_ref: (H//2+2, W//2 + 2*_PW, C1)   VMEM scratch
    H, W, Cin = x_ref.shape
    C1 = w1_ref.shape[-1]
    C2 = w2_ref.shape[-1]
    H2, W2 = H // 2, W // 2
    H4, W4 = H2 // 2, W2 // 2
    PW = _PW

    def zero_border(pad_ref, h, w, c):
        # Only the cells the 3x3 taps read that the interior store does not cover:
        # the padded top/bottom rows plus the single left/right pad columns.
        pad_ref[0:1, :, :] = jnp.zeros((1, w + 2 * PW, c), jnp.float32)
        pad_ref[h + 1:h + 2, :, :] = jnp.zeros((1, w + 2 * PW, c), jnp.float32)
        pad_ref[:, PW - 1:PW, :] = jnp.zeros((h + 2, 1, c), jnp.float32)
        pad_ref[:, PW + w:PW + w + 1, :] = jnp.zeros((h + 2, 1, c), jnp.float32)

    def conv3x3_im2col(pad_ref, h, w, cin, w_ref, b_ref):
        # 9 shifted tap views -> lane-dim concat (im2col) -> single MXU matmul.
        taps = []
        for kh in range(3):
            for kw in range(3):
                taps.append(pad_ref[kh:kh + h, PW - 1 + kw:PW - 1 + kw + w, :])
        col = jnp.concatenate(taps, axis=-1)                 # (h, w, 9*cin)
        col = col.reshape(h * w, 9 * cin)                    # layout-trivial merge
        return jnp.dot(col, w_ref[...],
                       preferred_element_type=jnp.float32) + b_ref[...]

    def maxpool2x2(a, h, w, c):
        # a: (h*w, c) row-major over (h, w); h and w even, so pairs never wrap.
        a = a.reshape(h, w // 2, 2, c)
        a = jnp.max(a, axis=2)                               # pool along W
        a = a.reshape(h // 2, 2, w // 2, c)
        return jnp.max(a, axis=1)                            # pool along H

    # ---------------- Stage 1: Conv2d(3x3, pad=1) + MaxPool2d(2) ----------------
    zero_border(pad1_ref, H, W, Cin)
    pad1_ref[1:1 + H, PW:PW + W, :] = x_ref[...]             # aligned interior store
    y = conv3x3_im2col(pad1_ref, H, W, Cin, w1_ref, b1_ref)  # (H*W, C1)
    y = maxpool2x2(y, H, W, C1)                              # (H2, W2, C1)

    # ---------------- Stage 2 (intermediate never leaves VMEM) ------------------
    zero_border(pad2_ref, H2, W2, C1)
    pad2_ref[1:1 + H2, PW:PW + W2, :] = y
    z = conv3x3_im2col(pad2_ref, H2, W2, C1, w2_ref, b2_ref)  # (H2*W2, C2)
    z = maxpool2x2(z, H2, W2, C2)                             # (H4, W4, C2)

    o_ref[...] = z.astype(o_ref.dtype)


def _tile_padded_f32_bytes(shape):
    """Bytes an f32 buffer of `shape` occupies in VMEM after (8, 128) tile padding."""
    s = list(shape)
    s[-1] = -(-s[-1] // 128) * 128
    if len(s) >= 2:
        s[-2] = -(-s[-2] // 8) * 8
    n = 4
    for d in s:
        n *= d
    return n


def fused_conv_pool_x2(x_nhwc, w1, b1, w2, b2):
    """x_nhwc: (N, H, W, Cin); w1: (3,3,Cin,C1); w2: (3,3,C1,C2) -> (N, H//4, W//4, C2)."""
    N, H, W, Cin = x_nhwc.shape
    C1 = w1.shape[-1]
    C2 = w2.shape[-1]
    assert H % 4 == 0 and W % 4 == 0, "H and W must be divisible by 4 (two 2x2 pools)"
    assert w1.shape == (3, 3, Cin, C1) and w2.shape == (3, 3, C1, C2)
    H2, W2, H4, W4 = H // 2, W // 2, H // 4, W // 4

    # Flatten weights into im2col layout: row index = kh*3*Cin + kw*Cin + ci.
    w1_flat = w1.reshape(9 * Cin, C1)
    w2_flat = w2.reshape(9 * C1, C2)

    # Explicit scoped-VMEM budget: tile-padded sizes of every buffer the kernel
    # touches (double-buffered operands, scratch, im2col temporaries) + headroom.
    buf_bytes = (
        2 * _tile_padded_f32_bytes((1, H, W, Cin))
        + 2 * _tile_padded_f32_bytes((1, H4, W4, C2))
        + 2 * (_tile_padded_f32_bytes((9 * Cin, C1)) + _tile_padded_f32_bytes((1, C1)))
        + 2 * (_tile_padded_f32_bytes((9 * C1, C2)) + _tile_padded_f32_bytes((1, C2)))
        + _tile_padded_f32_bytes((H + 2, W + 2 * _PW, Cin))
        + _tile_padded_f32_bytes((H2 + 2, W2 + 2 * _PW, C1))
        + _tile_padded_f32_bytes((H * W, 9 * Cin))
        + _tile_padded_f32_bytes((H2 * W2, 9 * C1))
    )
    vmem_limit = int(min(64 * 2 ** 20, max(8 * 2 ** 20, 4 * buf_bytes)))

    return pl.pallas_call(
        _fused_conv_pool_x2_kernel,
        out_shape=jax.ShapeDtypeStruct((N, H4, W4, C2), x_nhwc.dtype),
        grid_spec=pltpu.PrefetchScalarGridSpec(
            num_scalar_prefetch=0,
            grid=(N,),   # batch grid: DMA/compute overlap + megacore sharding on v7x
            in_specs=[
                pl.BlockSpec((None, H, W, Cin), lambda n: (n, 0, 0, 0)),   # x per batch
                pl.BlockSpec((9 * Cin, C1), lambda n: (0, 0)),             # w1 resident
                pl.BlockSpec((1, C1), lambda n: (0, 0)),                   # b1
                pl.BlockSpec((9 * C1, C2), lambda n: (0, 0)),              # w2
                pl.BlockSpec((1, C2), lambda n: (0, 0)),                   # b2
            ],
            out_specs=pl.BlockSpec((None, H4, W4, C2), lambda n: (n, 0, 0, 0)),
            scratch_shapes=[
                pltpu.VMEM((H + 2, W + 2 * _PW, Cin), jnp.float32),
                pltpu.VMEM((H2 + 2, W2 + 2 * _PW, C1), jnp.float32),
            ],
        ),
        compiler_params=pltpu.CompilerParams(
            dimension_semantics=("parallel",),
            vmem_limit_bytes=vmem_limit,
        ),
    )(x_nhwc, w1_flat, b1.reshape(1, C1), w2_flat, b2.reshape(1, C2))


def init_params(key):
    """Deterministic parameter init (PyTorch Conv2d-style uniform bounds).
    Weights stored as (KH, KW, Cin, Cout)."""
    k1, k2, k3, k4 = jax.random.split(key, 4)
    bound1 = 1.0 / (3 * 3 * 3) ** 0.5
    bound2 = 1.0 / (8 * 3 * 3) ** 0.5
    w1 = jax.random.uniform(k1, (3, 3, 3, 8), jnp.float32, -bound1, bound1)
    b1 = jax.random.uniform(k2, (8,), jnp.float32, -bound1, bound1)
    w2 = jax.random.uniform(k3, (3, 3, 8, 8), jnp.float32, -bound2, bound2)
    b2 = jax.random.uniform(k4, (8,), jnp.float32, -bound2, bound2)
    return w1, b1, w2, b2


@jax.jit
def net_forward(x_nchw, w1, b1, w2, b2):
    # NCHW -> NHWC, one fused Pallas call for conv1+pool1+conv2+pool2, NHWC -> NCHW.
    x = jnp.transpose(x_nchw, (0, 2, 3, 1))
    y = fused_conv_pool_x2(x, w1, b1, w2, b2)
    return jnp.transpose(y, (0, 3, 1, 2))


def ref_forward(x_nchw, w1, b1, w2, b2):
    """Plain-JAX reference (lax.conv + reduce_window) for verification."""
    def conv(x, w, b):
        wt = jnp.transpose(w, (3, 2, 0, 1))  # (Cout, Cin, KH, KW)
        y = jax.lax.conv_general_dilated(
            x, wt, window_strides=(1, 1), padding=((1, 1), (1, 1)),
            dimension_numbers=("NCHW", "OIHW", "NCHW"))
        return y + b[None, :, None, None]

    def pool(x):
        return jax.lax.reduce_window(
            x, -jnp.inf, jax.lax.max, (1, 1, 2, 2), (1, 1, 2, 2), "VALID")

    y = pool(conv(x_nchw, w1, b1))
    return pool(conv(y, w2, b2))


if __name__ == "__main__":
    key = jax.random.PRNGKey(0)
    kx, kp = jax.random.split(key)

    # Small NCHW input consistent with the module (Cin must be 3).
    x = jax.random.normal(kx, (2, 3, 16, 16), jnp.float32)
    w1, b1, w2, b2 = init_params(kp)

    out = net_forward(x, w1, b1, w2, b2)
    out = jax.block_until_ready(out)

    expected = ref_forward(x, w1, b1, w2, b2)
    assert out.shape == (2, 8, 4, 4), out.shape
    assert jnp.allclose(out, expected, atol=1e-4, rtol=1e-4), "mismatch vs reference"

    print("KERNEL_OK")
</pallas_src>

<mosaic_0001>
module attributes {stable_mosaic.version = 11 : i64} {
  func.func @_fused_conv_pool_x2_kernel(%arg0: i32, %arg1: memref<1x16x16x3xf32, #tpu.memory_space<vmem>>, %arg2: memref<27x8xf32, #tpu.memory_space<vmem>>, %arg3: memref<1x8xf32, #tpu.memory_space<vmem>>, %arg4: memref<72x8xf32, #tpu.memory_space<vmem>>, %arg5: memref<1x8xf32, #tpu.memory_space<vmem>>, %arg6: memref<1x4x4x8xf32, #tpu.memory_space<vmem>>, %arg7: memref<18x32x3xf32, #tpu.memory_space<vmem>>, %arg8: memref<10x24x8xf32, #tpu.memory_space<vmem>>) attributes {dimension_semantics = [#tpu.dimension_semantics<parallel>], iteration_bounds = array<i64: 2>, scalar_prefetch = 0 : i64, scratch_operands = 2 : i64, tpu.core_type = #tpu.core_type<tc>, window_params = [{transform_indices = @transform_0, window_bounds = array<i64: 1, 16, 16, 3>}, {pipeline_mode = #tpu.pipeline_mode<synchronous>, transform_indices = @transform_1, window_bounds = array<i64: 27, 8>}, {pipeline_mode = #tpu.pipeline_mode<synchronous>, transform_indices = @transform_2, window_bounds = array<i64: 1, 8>}, {pipeline_mode = #tpu.pipeline_mode<synchronous>, transform_indices = @transform_3, window_bounds = array<i64: 72, 8>}, {pipeline_mode = #tpu.pipeline_mode<synchronous>, transform_indices = @transform_4, window_bounds = array<i64: 1, 8>}, {transform_indices = @transform_5, window_bounds = array<i64: 1, 4, 4, 8>}]} {
    %cst = arith.constant 0.000000e+00 : f32
    %0 = vector.broadcast %cst : f32 to vector<1x32x3xf32>
    %c0 = arith.constant 0 : index
    %c0_0 = arith.constant 0 : index
    %c0_1 = arith.constant 0 : index
    %1 = vector.load %arg7[%c0, %c0_0, %c0_1] : memref<18x32x3xf32, #tpu.memory_space<vmem>>, vector<1x32x3xf32>
    tpu.vector_store %arg7[%c0, %c0_0, %c0_1], %0 {strides = array<i32>} : memref<18x32x3xf32, #tpu.memory_space<vmem>>, vector<1x32x3xf32>,
    %cst_2 = arith.constant 0.000000e+00 : f32
    %2 = vector.broadcast %cst_2 : f32 to vector<1x32x3xf32>
    %c17 = arith.constant 17 : index
    %c0_3 = arith.constant 0 : index
    %c0_4 = arith.constant 0 : index
    %3 = vector.load %arg7[%c17, %c0_3, %c0_4] : memref<18x32x3xf32, #tpu.memory_space<vmem>>, vector<1x32x3xf32>
    tpu.vector_store %arg7[%c17, %c0_3, %c0_4], %2 {strides = array<i32>} : memref<18x32x3xf32, #tpu.memory_space<vmem>>, vector<1x32x3xf32>,
    %cst_5 = arith.constant 0.000000e+00 : f32
    %4 = vector.broadcast %cst_5 : f32 to vector<18x1x3xf32>
    %c0_6 = arith.constant 0 : index
    %c7 = arith.constant 7 : index
    %c0_7 = arith.constant 0 : index
    %5 = vector.load %arg7[%c0_6, %c7, %c0_7] : memref<18x32x3xf32, #tpu.memory_space<vmem>>, vector<18x1x3xf32>
    tpu.vector_store %arg7[%c0_6, %c7, %c0_7], %4 {strides = array<i32>} : memref<18x32x3xf32, #tpu.memory_space<vmem>>, vector<18x1x3xf32>,
    %cst_8 = arith.constant 0.000000e+00 : f32
    %6 = vector.broadcast %cst_8 : f32 to vector<18x1x3xf32>
    %c0_9 = arith.constant 0 : index
    %c24 = arith.constant 24 : index
    %c0_10 = arith.constant 0 : index
    %7 = vector.load %arg7[%c0_9, %c24, %c0_10] : memref<18x32x3xf32, #tpu.memory_space<vmem>>, vector<18x1x3xf32>
    tpu.vector_store %arg7[%c0_9, %c24, %c0_10], %6 {strides = array<i32>} : memref<18x32x3xf32, #tpu.memory_space<vmem>>, vector<18x1x3xf32>,
    %c0_11 = arith.constant 0 : index
    %c0_12 = arith.constant 0 : index
    %c0_13 = arith.constant 0 : index
    %c0_14 = arith.constant 0 : index
    %8 = vector.load %arg1[%c0_11, %c0_12, %c0_13, %c0_14] : memref<1x16x16x3xf32, #tpu.memory_space<vmem>>, vector<1x16x16x3xf32>
    %9 = vector.shape_cast %8 : vector<1x16x16x3xf32> to vector<16x16x3xf32>
    %c1 = arith.constant 1 : index
    %c8 = arith.constant 8 : index
    %c0_15 = arith.constant 0 : index
    %10 = vector.load %arg7[%c1, %c8, %c0_15] : memref<18x32x3xf32, #tpu.memory_space<vmem>>, vector<16x16x3xf32>
    tpu.vector_store %arg7[%c1, %c8, %c0_15], %9 {strides = array<i32>} : memref<18x32x3xf32, #tpu.memory_space<vmem>>, vector<16x16x3xf32>,
    %c0_16 = arith.constant 0 : index
    %c7_17 = arith.constant 7 : index
    %c0_18 = arith.constant 0 : index
    %11 = vector.load %arg7[%c0_16, %c7_17, %c0_18] : memref<18x32x3xf32, #tpu.memory_space<vmem>>, vector<16x16x3xf32>
    %c0_19 = arith.constant 0 : index
    %c8_20 = arith.constant 8 : index
    %c0_21 = arith.constant 0 : index
    %12 = vector.load %arg7[%c0_19, %c8_20, %c0_21] : memref<18x32x3xf32, #tpu.memory_space<vmem>>, vector<16x16x3xf32>
    %c0_22 = arith.constant 0 : index
    %c9 = arith.constant 9 : index
    %c0_23 = arith.constant 0 : index
    %13 = vector.load %arg7[%c0_22, %c9, %c0_23] : memref<18x32x3xf32, #tpu.memory_space<vmem>>, vector<16x16x3xf32>
    %c1_24 = arith.constant 1 : index
    %c7_25 = arith.constant 7 : index
    %c0_26 = arith.constant 0 : index
    %14 = vector.load %arg7[%c1_24, %c7_25, %c0_26] : memref<18x32x3xf32, #tpu.memory_space<vmem>>, vector<16x16x3xf32>
    %c1_27 = arith.constant 1 : index
    %c8_28 = arith.constant 8 : index
    %c0_29 = arith.constant 0 : index
    %15 = vector.load %arg7[%c1_27, %c8_28, %c0_29] : memref<18x32x3xf32, #tpu.memory_space<vmem>>, vector<16x16x3xf32>
    %c1_30 = arith.constant 1 : index
    %c9_31 = arith.constant 9 : index
    %c0_32 = arith.constant 0 : index
    %16 = vector.load %arg7[%c1_30, %c9_31, %c0_32] : memref<18x32x3xf32, #tpu.memory_space<vmem>>, vector<16x16x3xf32>
    %c2 = arith.constant 2 : index
    %c7_33 = arith.constant 7 : index
    %c0_34 = arith.constant 0 : index
    %17 = vector.load %arg7[%c2, %c7_33, %c0_34] : memref<18x32x3xf32, #tpu.memory_space<vmem>>, vector<16x16x3xf32>
    %c2_35 = arith.constant 2 : index
    %c8_36 = arith.constant 8 : index
    %c0_37 = arith.constant 0 : index
    %18 = vector.load %arg7[%c2_35, %c8_36, %c0_37] : memref<18x32x3xf32, #tpu.memory_space<vmem>>, vector<16x16x3xf32>
    %c2_38 = arith.constant 2 : index
    %c9_39 = arith.constant 9 : index
    %c0_40 = arith.constant 0 : index
    %19 = vector.load %arg7[%c2_38, %c9_39, %c0_40] : memref<18x32x3xf32, #tpu.memory_space<vmem>>, vector<16x16x3xf32>
    %20 = tpu.concatenate %11, %12, %13, %14, %15, %16, %17, %18, %19 in 2 : vector<16x16x3xf32>, vector<16x16x3xf32>, vector<16x16x3xf32>, vector<16x16x3xf32>, vector<16x16x3xf32>, vector<16x16x3xf32>, vector<16x16x3xf32>, vector<16x16x3xf32>, vector<16x16x3xf32> -> vector<16x16x27xf32>
    %21 = vector.shape_cast %20 : vector<16x16x27xf32> to vector<256x27xf32>
    %c0_41 = arith.constant 0 : index
    %c0_42 = arith.constant 0 : index
    %22 = vector.load %arg2[%c0_41, %c0_42] : memref<27x8xf32, #tpu.memory_space<vmem>>, vector<27x8xf32>
    %cst_43 = arith.constant dense<0.000000e+00> : vector<256x8xf32>
    %23 = tpu.matmul %21, %22, %cst_43 {dimension_numbers = #tpu.dot_dimension_numbers<[1], [0], [0], [1], [0, 0, 1, 1], [], []>} : vector<256x27xf32>, vector<27x8xf32>, vector<256x8xf32> -> vector<256x8xf32>
    %c0_44 = arith.constant 0 : index
    %c0_45 = arith.constant 0 : index
    %24 = vector.load %arg3[%c0_44, %c0_45] : memref<1x8xf32, #tpu.memory_space<vmem>>, vector<1x8xf32>
    %25 = vector.broadcast %24 : vector<1x8xf32> to vector<256x8xf32>
    %26 = arith.addf %23, %25 : vector<256x8xf32>
    %27 = vector.shape_cast %26 : vector<256x8xf32> to vector<16x8x2x8xf32>
    %cst_46 = arith.constant dense<0xFF800000> : vector<16x8x8xf32>
    %28 = vector.multi_reduction <maximumf>, %27, %cst_46 [2] : vector<16x8x2x8xf32> to vector<16x8x8xf32>
    %29 = vector.shape_cast %28 : vector<16x8x8xf32> to vector<8x2x8x8xf32>
    %cst_47 = arith.constant dense<0xFF800000> : vector<8x8x8xf32>
    %30 = vector.multi_reduction <maximumf>, %29, %cst_47 [1] : vector<8x2x8x8xf32> to vector<8x8x8xf32>
    %cst_48 = arith.constant 0.000000e+00 : f32
    %31 = vector.broadcast %cst_48 : f32 to vector<1x24x8xf32>
    %c0_49 = arith.constant 0 : index
    %c0_50 = arith.constant 0 : index
    %c0_51 = arith.constant 0 : index
    %32 = vector.load %arg8[%c0_49, %c0_50, %c0_51] : memref<10x24x8xf32, #tpu.memory_space<vmem>>, vector<1x24x8xf32>
    tpu.vector_store %arg8[%c0_49, %c0_50, %c0_51], %31 {strides = array<i32>} : memref<10x24x8xf32, #tpu.memory_space<vmem>>, vector<1x24x8xf32>,
    %cst_52 = arith.constant 0.000000e+00 : f32
    %33 = vector.broadcast %cst_52 : f32 to vector<1x24x8xf32>
    %c9_53 = arith.constant 9 : index
    %c0_54 = arith.constant 0 : index
    %c0_55 = arith.constant 0 : index
    %34 = vector.load %arg8[%c9_53, %c0_54, %c0_55] : memref<10x24x8xf32, #tpu.memory_space<vmem>>, vector<1x24x8xf32>
    tpu.vector_store %arg8[%c9_53, %c0_54, %c0_55], %33 {strides = array<i32>} : memref<10x24x8xf32, #tpu.memory_space<vmem>>, vector<1x24x8xf32>,
    %cst_56 = arith.constant 0.000000e+00 : f32
    %35 = vector.broadcast %cst_56 : f32 to vector<10x1x8xf32>
    %c0_57 = arith.constant 0 : index
    %c7_58 = arith.constant 7 : index
    %c0_59 = arith.constant 0 : index
    %36 = vector.load %arg8[%c0_57, %c7_58, %c0_59] : memref<10x24x8xf32, #tpu.memory_space<vmem>>, vector<10x1x8xf32>
    tpu.vector_store %arg8[%c0_57, %c7_58, %c0_59], %35 {strides = array<i32>} : memref<10x24x8xf32, #tpu.memory_space<vmem>>, vector<10x1x8xf32>,
    %cst_60 = arith.constant 0.000000e+00 : f32
    %37 = vector.broadcast %cst_60 : f32 to vector<10x1x8xf32>
    %c0_61 = arith.constant 0 : index
    %c16 = arith.constant 16 : index
    %c0_62 = arith.constant 0 : index
    %38 = vector.load %arg8[%c0_61, %c16, %c0_62] : memref<10x24x8xf32, #tpu.memory_space<vmem>>, vector<10x1x8xf32>
    tpu.vector_store %arg8[%c0_61, %c16, %c0_62], %37 {strides = array<i32>} : memref<10x24x8xf32, #tpu.memory_space<vmem>>, vector<10x1x8xf32>,
    %c1_63 = arith.constant 1 : index
    %c8_64 = arith.constant 8 : index
    %c0_65 = arith.constant 0 : index
    %39 = vector.load %arg8[%c1_63, %c8_64, %c0_65] : memref<10x24x8xf32, #tpu.memory_space<vmem>>, vector<8x8x8xf32>
    tpu.vector_store %arg8[%c1_63, %c8_64, %c0_65], %30 {strides = array<i32>} : memref<10x24x8xf32, #tpu.memory_space<vmem>>, vector<8x8x8xf32>,
    %c0_66 = arith.constant 0 : index
    %c7_67 = arith.constant 7 : index
    %c0_68 = arith.constant 0 : index
    %40 = vector.load %arg8[%c0_66, %c7_67, %c0_68] : memref<10x24x8xf32, #tpu.memory_space<vmem>>, vector<8x8x8xf32>
    %c0_69 = arith.constant 0 : index
    %c8_70 = arith.constant 8 : index
    %c0_71 = arith.constant 0 : index
    %41 = vector.load %arg8[%c0_69, %c8_70, %c0_71] : memref<10x24x8xf32, #tpu.memory_space<vmem>>, vector<8x8x8xf32>
    %c0_72 = arith.constant 0 : index
    %c9_73 = arith.constant 9 : index
    %c0_74 = arith.constant 0 : index
    %42 = vector.load %arg8[%c0_72, %c9_73, %c0_74] : memref<10x24x8xf32, #tpu.memory_space<vmem>>, vector<8x8x8xf32>
    %c1_75 = arith.constant 1 : index
    %c7_76 = arith.constant 7 : index
    %c0_77 = arith.constant 0 : index
    %43 = vector.load %arg8[%c1_75, %c7_76, %c0_77] : memref<10x24x8xf32, #tpu.memory_space<vmem>>, vector<8x8x8xf32>
    %c1_78 = arith.constant 1 : index
    %c8_79 = arith.constant 8 : index
    %c0_80 = arith.constant 0 : index
    %44 = vector.load %arg8[%c1_78, %c8_79, %c0_80] : memref<10x24x8xf32, #tpu.memory_space<vmem>>, vector<8x8x8xf32>
    %c1_81 = arith.constant 1 : index
    %c9_82 = arith.constant 9 : index
    %c0_83 = arith.constant 0 : index
    %45 = vector.load %arg8[%c1_81, %c9_82, %c0_83] : memref<10x24x8xf32, #tpu.memory_space<vmem>>, vector<8x8x8xf32>
    %c2_84 = arith.constant 2 : index
    %c7_85 = arith.constant 7 : index
    %c0_86 = arith.constant 0 : index
    %46 = vector.load %arg8[%c2_84, %c7_85, %c0_86] : memref<10x24x8xf32, #tpu.memory_space<vmem>>, vector<8x8x8xf32>
    %c2_87 = arith.constant 2 : index
    %c8_88 = arith.constant 8 : index
    %c0_89 = arith.constant 0 : index
    %47 = vector.load %arg8[%c2_87, %c8_88, %c0_89] : memref<10x24x8xf32, #tpu.memory_space<vmem>>, vector<8x8x8xf32>
    %c2_90 = arith.constant 2 : index
    %c9_91 = arith.constant 9 : index
    %c0_92 = arith.constant 0 : index
    %48 = vector.load %arg8[%c2_90, %c9_91, %c0_92] : memref<10x24x8xf32, #tpu.memory_space<vmem>>, vector<8x8x8xf32>
    %49 = tpu.concatenate %40, %41, %42, %43, %44, %45, %46, %47, %48 in 2 : vector<8x8x8xf32>, vector<8x8x8xf32>, vector<8x8x8xf32>, vector<8x8x8xf32>, vector<8x8x8xf32>, vector<8x8x8xf32>, vector<8x8x8xf32>, vector<8x8x8xf32>, vector<8x8x8xf32> -> vector<8x8x72xf32>
    %50 = vector.shape_cast %49 : vector<8x8x72xf32> to vector<64x72xf32>
    %c0_93 = arith.constant 0 : index
    %c0_94 = arith.constant 0 : index
    %51 = vector.load %arg4[%c0_93, %c0_94] : memref<72x8xf32, #tpu.memory_space<vmem>>, vector<72x8xf32>
    %cst_95 = arith.constant dense<0.000000e+00> : vector<64x8xf32>
    %52 = tpu.matmul %50, %51, %cst_95 {dimension_numbers = #tpu.dot_dimension_numbers<[1], [0], [0], [1], [0, 0, 1, 1], [], []>} : vector<64x72xf32>, vector<72x8xf32>, vector<64x8xf32> -> vector<64x8xf32>
    %c0_96 = arith.constant 0 : index
    %c0_97 = arith.constant 0 : index
    %53 = vector.load %arg5[%c0_96, %c0_97] : memref<1x8xf32, #tpu.memory_space<vmem>>, vector<1x8xf32>
    %54 = vector.broadcast %53 : vector<1x8xf32> to vector<64x8xf32>
    %55 = arith.addf %52, %54 : vector<64x8xf32>
    %56 = vector.shape_cast %55 : vector<64x8xf32> to vector<8x4x2x8xf32>
    %cst_98 = arith.constant dense<0xFF800000> : vector<8x4x8xf32>
    %57 = vector.multi_reduction <maximumf>, %56, %cst_98 [2] : vector<8x4x2x8xf32> to vector<8x4x8xf32>
    %58 = vector.shape_cast %57 : vector<8x4x8xf32> to vector<4x2x4x8xf32>
    %cst_99 = arith.constant dense<0xFF800000> : vector<4x4x8xf32>
    %59 = vector.multi_reduction <maximumf>, %58, %cst_99 [1] : vector<4x2x4x8xf32> to vector<4x4x8xf32>
    %c0_100 = arith.constant 0 : index
    %c0_101 = arith.constant 0 : index
    %c0_102 = arith.constant 0 : index
    %c0_103 = arith.constant 0 : index
    %60 = vector.load %arg6[%c0_100, %c0_101, %c0_102, %c0_103] : memref<1x4x4x8xf32, #tpu.memory_space<vmem>>, vector<1x4x4x8xf32>
    %61 = vector.shape_cast %60 : vector<1x4x4x8xf32> to vector<4x4x8xf32>
    %62 = vector.shape_cast %59 : vector<4x4x8xf32> to vector<1x4x4x8xf32>
    tpu.vector_store %arg6[%c0_100, %c0_101, %c0_102, %c0_103], %62 {strides = array<i32>} : memref<1x4x4x8xf32, #tpu.memory_space<vmem>>, vector<1x4x4x8xf32>,
    return
  }
  func.func @transform_0(%arg0: i32) -> (i32, i32, i32, i32) {
    %c0_i32 = arith.constant 0 : i32
    %c0_i32_0 = arith.constant 0 : i32
    %c0_i32_1 = arith.constant 0 : i32
    %c0_i32_2 = arith.constant 0 : i32
    return %arg0, %c0_i32, %c0_i32_0, %c0_i32_1 : i32, i32, i32, i32
  }
  func.func @transform_1(%arg0: i32) -> (i32, i32) {
    %c0_i32 = arith.constant 0 : i32
    %c0_i32_0 = arith.constant 0 : i32
    %c0_i32_1 = arith.constant 0 : i32
    return %c0_i32, %c0_i32_0 : i32, i32
  }
  func.func @transform_2(%arg0: i32) -> (i32, i32) {
    %c0_i32 = arith.constant 0 : i32
    %c0_i32_0 = arith.constant 0 : i32
    %c0_i32_1 = arith.constant 0 : i32
    return %c0_i32, %c0_i32_0 : i32, i32
  }
  func.func @transform_3(%arg0: i32) -> (i32, i32) {
    %c0_i32 = arith.constant 0 : i32
    %c0_i32_0 = arith.constant 0 : i32
    %c0_i32_1 = arith.constant 0 : i32
    return %c0_i32, %c0_i32_0 : i32, i32
  }
  func.func @transform_4(%arg0: i32) -> (i32, i32) {
    %c0_i32 = arith.constant 0 : i32
    %c0_i32_0 = arith.constant 0 : i32
    %c0_i32_1 = arith.constant 0 : i32
    return %c0_i32, %c0_i32_0 : i32, i32
  }
  func.func @transform_5(%arg0: i32) -> (i32, i32, i32, i32) {
    %c0_i32 = arith.constant 0 : i32
    %c0_i32_0 = arith.constant 0 : i32
    %c0_i32_1 = arith.constant 0 : i32
    %c0_i32_2 = arith.constant 0 : i32
    return %arg0, %c0_i32, %c0_i32_0, %c0_i32_1 : i32, i32, i32, i32
  }
}

</mosaic_0001>

<bundles_post_ra>
// kernel: net_forward.1
= control target key start
LH: loop header
LB: loop body
LE: loop exit
PB: predicated region body
PF: predicated region fallthrough
CT: control target
= control target key end

     0   :  { %10 = vsyncpa [#allocation5], 0  ;;  %s8335_s0 = inlined_call_operand.vmem [shape: f32[2,16,16,3], index: 0, kind: input, shape index: {}]   ;;  %s8336_s1 = inlined_call_operand.vmem [shape: f32[27,8], index: 1, kind: input, shape index: {}]   ;;  %s8337_s2 = inlined_call_operand.vmem [shape: f32[1,8], index: 2, kind: input, shape index: {}]   ;;  %s8338_s3 = inlined_call_operand.vmem [shape: f32[72,8], index: 3, kind: input, shape index: {}]   ;;  %s8339_s4 = inlined_call_operand.vmem [shape: f32[1,8], index: 4, kind: input, shape index: {}]   ;;  %s8340_s5 = inlined_call_operand.hbm [shape: f32[2,4,4,8], index: 5, kind: output, shape index: {}]  }
   0x1   :  { %12 = vsyncpa [#allocation5 + $0x1], 0  ;;  %s5730_s18 = smov 0   ;;  %s5732_s19 = smov 0  }
   0x2   :  { %s5734_s20 = smov 0   ;;  %s5736_s21 = smov 0  }
   0x3 LB: > { %s5751_s22 = sadd.s32 4294967295, %s5678_s21   ;;  %s5320_s23 = sadd.s32 4294967294, %s5678_s21   ;;  %s5678_s21 = sphi %s5736_s21, %s8562_s21   ;;  %s5674_s20 = sphi %s5734_s20, %s8561_s20   ;;  %s5670_s19 = sphi %s5732_s19, %s8560_s19   ;;  %s5666_s18 = sphi %s5730_s18, %s8559_s18  }
   0x4   : > { %s5755_s24 = sadd.s32 1, %s5678_s21   ;;  %s135_s25 = sadd.s32 1, %s5674_s20 }
   0x5   : > { %s132_s26 = ssub.s32 %s5678_s21, %s5755_s24  ;;  %p145_p0 = scmp.ne.s32.totalorder %s5674_s20, %s5670_s19 }
   0x6   : > { %p133_p1 = scmp.eq.s32.totalorder %s132_s26, 0  ;;  %p146_p2 = scmp.eq.s32.totalorder %s5751_s22, 1 }
   0x7   : > { %p151_p3 = scmp.ne.s32.totalorder %s5670_s19, %s5666_s18  ;;  %p152_p4 = scmp.eq.s32.totalorder %s5320_s23, 1 }
   0x8   : > { %s5766_s27 = scalar_select %p133_p1, %s5674_s20, %s135_s25  }
   0x9   : > { %p5768_p5 = por %p146_p2, %p145_p0  ;;  %p5772_p6 = por %p152_p4, %p151_p3 }
   0xa   : > { %p5323_p7 = scmp.ge.s32.totalorder %s5678_s21, 1  ;;  %p190_p8 = scmp.lt.s32.totalorder %s5678_s21, 3 }
   0xc   : > { %p191_p9 = pnand %p5323_p7, %p190_p8 }
   0xe   : > { %194 = sbr.rel (%p191_p9) target bundleno = 1355 (0x54b), region = 40 }
  0x15   : > { %vm223_vm0 = vcmask 23552   ;;  %vm233_vm1 = vcmask 16384   ;;  %v5680_v0 = vmov 0.0   ;;  %p218_p10 = scmp.lt.s32.totalorder %s5751_s22, 1  ;;  %s5681_s10 = smov 6   ;;  %v1911_v25 = vld [vmem:[%s8336_s1] sm:$0xff] }
  0x16   : > { %225 = vst.msk [vmem:[#allocation2 + $0x8] sm:$0xff] %vm223_vm0, %v5680_v0  ;;  %226 = vst.msk [vmem:[#allocation2 + $0x10] sm:$0xff] %vm223_vm0, %v5680_v0  ;;  %s5682_s11 = smov 3   ;;  %s5683_s12 = smov 9   ;;  %v1912_v26 = vld [vmem:[%s8336_s1 + $0x8] sm:$0xff]  ;;  %v1913_v31 = vld [vmem:[%s8336_s1 + $0x10] sm:$0xff] }
  0x17   : > { %224 = vst.msk [vmem:[#allocation2] sm:$0xff] %vm223_vm0, %v5680_v0  ;;  %227 = vst.msk [vmem:[#allocation2 + $0x18] sm:$0xff] %vm223_vm0, %v5680_v0  ;;  %s219_s30 = scalar_select %p218_p10, %s5751_s22, 1  ;;  %v5516_v27 = vpack.c.bf16 %v1912_v26, %v1911_v25  ;;  %v1914_v32 = vld [vmem:[%s8336_s1 + $0x18] sm:$0x7]  ;;  %vm2019_vm2 = vcmask 1042432  }
  0x18   : > { %229 = vst.msk [vmem:[#allocation2 + $0x220] sm:$0xff] %vm223_vm0, %v5680_v0  ;;  %230 = vst.msk [vmem:[#allocation2 + $0x228] sm:$0xff] %vm223_vm0, %v5680_v0  ;;  %s5684_s13 = smov 12   ;;  %s5685_s14 = smov 15   ;;  %v5520_v33 = vpack.c.bf16 %v1914_v32, %v1913_v31  ;;  %vm5688_vm3 = vmmov 1   ;;  %vm1680_vm5 = vcmask 48128  }
  0x19   : > { %231 = vst.msk [vmem:[#allocation2 + $0x230] sm:$0xff] %vm223_vm0, %v5680_v0  ;;  %232 = vst.msk [vmem:[#allocation2 + $0x238] sm:$0xff] %vm223_vm0, %v5680_v0  ;;  %s5375_s6 = sshll.u32 %s219_s30, 8  ;;  %s5686_s15 = smov 18   ;;  %5517 = vmatprep.subr.bf16.mxu0 %v5516_v27  ;;  %5542 = vmatprep.subr.bf16.mxu1 %v5516_v27  ;;  %vm8342_vm6 = vcmask 72704   ;;  %vm1746_vm7 = vcmask 97280  }
  0x1a   : > { %235 = vst.msk [vmem:[#allocation2 + $0x27] sm:$0x1] %vm233_vm1, %v5680_v0  ;;  %236 = vst.msk [vmem:[#allocation2 + $0x47] sm:$0x1] %vm233_vm1, %v5680_v0  ;;  %s5871_s9 = scalar_lea.vmem %s8335_s0, %s5375_s6  ;;  %5519 = vmatpush3.bf16.msra.mxu0 %v5516_v27  ;;  %5544 = vmatpush3.bf16.msra.mxu1 %v5516_v27  ;;  %s5687_s8 = smov 21   ;;  %vm1779_vm8 = vcmask 121856  }
  0x1b   : > { %237 = vst.msk [vmem:[#allocation2 + $0x67] sm:$0x1] %vm233_vm1, %v5680_v0  ;;  %238 = vst.msk [vmem:[#allocation2 + $0x87] sm:$0x1] %vm233_vm1, %v5680_v0  ;;  %v270_v1 = vld [vmem:[%s5871_s9] sm:$0xff]  ;;  %v271_v2 = vld [vmem:[%s5871_s9 + $0x8] sm:$0xff] }
  0x1c   : > { %239 = vst.msk [vmem:[#allocation2 + $0xa7] sm:$0x1] %vm233_vm1, %v5680_v0  ;;  %240 = vst.msk [vmem:[#allocation2 + $0xc7] sm:$0x1] %vm233_vm1, %v5680_v0  ;;  %v272_v3 = vld [vmem:[%s5871_s9 + $0x10] sm:$0xff]  ;;  %v273_v8 = vld [vmem:[%s5871_s9 + $0x18] sm:$0xff] }
  0x1d   : > { %241 = vst.msk [vmem:[#allocation2 + $0xe7] sm:$0x1] %vm233_vm1, %v5680_v0  ;;  %242 = vst.msk [vmem:[#allocation2 + $0x107] sm:$0x1] %vm233_vm1, %v5680_v0  ;;  %v399_v4 = vld [vmem:[#allocation2 + $0x9] sm:$0xff]  ;;  %v274_v9 = vld [vmem:[%s5871_s9 + $0x20] sm:$0xff] }
  0x1e   : > { %243 = vst.msk [vmem:[#allocation2 + $0x127] sm:$0x1] %vm233_vm1, %v5680_v0  ;;  %244 = vst.msk [vmem:[#allocation2 + $0x147] sm:$0x1] %vm233_vm1, %v5680_v0  ;;  %v367_v5 = vld [vmem:[#allocation2 + $0x8] sm:$0xff]  ;;  %v368_v6 = vld [vmem:[#allocation2 + $0x10] sm:$0xff]  ;;  %784 = vrot.lane.b32.xlu1 %v399_v4, %s5681_s10 }
  0x1f   : > { %245 = vst.msk [vmem:[#allocation2 + $0x167] sm:$0x1] %vm233_vm1, %v5680_v0  ;;  %246 = vst.msk [vmem:[#allocation2 + $0x187] sm:$0x1] %vm233_vm1, %v5680_v0  ;;  %656 = vrot.lane.b32.xlu0 %v367_v5, %s5682_s11  ;;  %v275_v10 = vld [vmem:[%s5871_s9 + $0x28] sm:$0xff]  ;;  %v276_v11 = vld [vmem:[%s5871_s9 + $0x30] sm:$0xff] }
  0x20   : > { %247 = vst.msk [vmem:[#allocation2 + $0x1a7] sm:$0x1] %vm233_vm1, %v5680_v0  ;;  %248 = vst.msk [vmem:[#allocation2 + $0x1c7] sm:$0x1] %vm233_vm1, %v5680_v0  ;;  %v277_v12 = vld [vmem:[%s5871_s9 + $0x38] sm:$0xff]  ;;  %v278_v13 = vld [vmem:[%s5871_s9 + $0x40] sm:$0xff] }
  0x21   : > { %249 = vst.msk [vmem:[#allocation2 + $0x1e7] sm:$0x1] %vm233_vm1, %v5680_v0  ;;  %250 = vst.msk [vmem:[#allocation2 + $0x207] sm:$0x1] %vm233_vm1, %v5680_v0  ;;  %v279_v14 = vld [vmem:[%s5871_s9 + $0x48] sm:$0xff]  ;;  %v280_v20 = vld [vmem:[%s5871_s9 + $0x50] sm:$0xff] }
  0x22   : > { %253 = vst.msk [vmem:[#allocation2 + $0x38] sm:$0x1] %vm233_vm1, %v5680_v0  ;;  %254 = vst.msk [vmem:[#allocation2 + $0x58] sm:$0x1] %vm233_vm1, %v5680_v0  ;;  %v288_v21 = vld [vmem:[%s5871_s9 + $0x90] sm:$0xff]  ;;  %v281_v24 = vld [vmem:[%s5871_s9 + $0x58] sm:$0xff] }
  0x23   : > { %255 = vst.msk [vmem:[#allocation2 + $0x78] sm:$0x1] %vm233_vm1, %v5680_v0  ;;  %256 = vst.msk [vmem:[#allocation2 + $0x98] sm:$0x1] %vm233_vm1, %v5680_v0  ;;  %658 = vrot.lane.b32.xlu0 %v368_v6, %s5682_s11  ;;  %v289_v28 = vld [vmem:[%s5871_s9 + $0x98] sm:$0xff]  ;;  %s5689_s16 = smov 24  }
  0x24   : > { %257 = vst.msk [vmem:[#allocation2 + $0xb8] sm:$0x1] %vm233_vm1, %v5680_v0  ;;  %258 = vst.msk [vmem:[#allocation2 + $0xd8] sm:$0x1] %vm233_vm1, %v5680_v0  ;;  %v290_v36 = vld [vmem:[%s5871_s9 + $0xa0] sm:$0xff]  ;;  %v291_v39 = vld [vmem:[%s5871_s9 + $0xa8] sm:$0xff] }
  0x25   : > { %259 = vst.msk [vmem:[#allocation2 + $0xf8] sm:$0x1] %vm233_vm1, %v5680_v0  ;;  %260 = vst.msk [vmem:[#allocation2 + $0x118] sm:$0x1] %vm233_vm1, %v5680_v0  ;;  %v282_v42 = vld [vmem:[%s5871_s9 + $0x60] sm:$0xff]  ;;  %v283_v45 = vld [vmem:[%s5871_s9 + $0x68] sm:$0xff] }
  0x26   : > { %261 = vst.msk [vmem:[#allocation2 + $0x138] sm:$0x1] %vm233_vm1, %v5680_v0  ;;  %262 = vst.msk [vmem:[#allocation2 + $0x158] sm:$0x1] %vm233_vm1, %v5680_v0  ;;  %v292_v48 = vld [vmem:[%s5871_s9 + $0xb0] sm:$0xff]  ;;  %v293_v53 = vld [vmem:[%s5871_s9 + $0xb8] sm:$0xff] }
  0x27   : > { %263 = vst.msk [vmem:[#allocation2 + $0x178] sm:$0x1] %vm233_vm1, %v5680_v0  ;;  %264 = vst.msk [vmem:[#allocation2 + $0x198] sm:$0x1] %vm233_vm1, %v5680_v0  ;;  %v284_v60 = vld [vmem:[%s5871_s9 + $0x70] sm:$0xff]  ;;  %vm1812_vm9 = vcmask 146432  }
  0x28   : > { %265 = vst.msk [vmem:[#allocation2 + $0x1b8] sm:$0x1] %vm233_vm1, %v5680_v0  ;;  %266 = vst.msk [vmem:[#allocation2 + $0x1d8] sm:$0x1] %vm233_vm1, %v5680_v0  ;;  %vm1845_vm10 = vcmask 171008   ;;  %vm1878_vm11 = vcmask 195584  }
  0x29   : > { %267 = vst.msk [vmem:[#allocation2 + $0x1f8] sm:$0x1] %vm233_vm1, %v5680_v0  ;;  %268 = vst.msk [vmem:[#allocation2 + $0x218] sm:$0x1] %vm233_vm1, %v5680_v0  ;;  %v294_v32 = vld [vmem:[%s5871_s9 + $0xc0] sm:$0xff]  ;;  %vm1922_vm12 = vcmask 220160  }
  0x2a   : > { %252 = vst.msk [vmem:[#allocation2 + $0x18] sm:$0x1] %vm233_vm1, %v5680_v0  ;;  %234 = vst.msk [vmem:[#allocation2 + $0x7] sm:$0x1] %vm233_vm1, %v5680_v0  ;;  %vm3849_vm13 = vcmask 64512   ;;  %vm4049_vm14 = vcmask 57344  }
  0x2b   : > { %251 = vst.msk [vmem:[#allocation2 + $0x227] sm:$0x1] %vm233_vm1, %v5680_v0  ;;  %269 = vst.msk [vmem:[#allocation2 + $0x238] sm:$0x1] %vm233_vm1, %v5680_v0  ;;  %vm8344_vm15 = vcmask 58368   ;;  %vm8341_vm1 = vcmask 1041409  }
  0x2c   : > { %303 = vst.msk [vmem:[#allocation2 + $0x28] sm:$0xff] %vm223_vm0, %v270_v1  ;;  %304 = vst.msk [vmem:[#allocation2 + $0x30] sm:$0xff] %vm223_vm0, %v271_v2  ;;  %s5695_s23 = smov 48   ;;  %s5696_s25 = smov 56  }
  0x2d   : > { %305 = vst.msk [vmem:[#allocation2 + $0x48] sm:$0xff] %vm223_vm0, %v272_v3  ;;  %306 = vst.msk [vmem:[#allocation2 + $0x50] sm:$0xff] %vm223_vm0, %v273_v8  ;;  %s5697_s26 = smov 64   ;;  %s5698_s7 = smov [#allocation4]  }
  0x2e   : > { %307 = vst.msk [vmem:[#allocation2 + $0x68] sm:$0xff] %vm223_vm0, %v274_v9  ;;  %308 = vst.msk [vmem:[#allocation2 + $0x70] sm:$0xff] %vm223_vm0, %v275_v10  ;;  %v285_v10 = vld [vmem:[%s5871_s9 + $0x78] sm:$0xff] }
  0x2f   : > { %309 = vst.msk [vmem:[#allocation2 + $0x88] sm:$0xff] %vm223_vm0, %v276_v11  ;;  %310 = vst.msk [vmem:[#allocation2 + $0x90] sm:$0xff] %vm223_vm0, %v277_v12 }
  0x30   : > { %311 = vst.msk [vmem:[#allocation2 + $0xa8] sm:$0xff] %vm223_vm0, %v278_v13  ;;  %312 = vst.msk [vmem:[#allocation2 + $0xb0] sm:$0xff] %vm223_vm0, %v279_v14 }
  0x31   : > { %v400_v7 = vld [vmem:[#allocation2 + $0x11] sm:$0xff]  ;;  %313 = vst.msk [vmem:[#allocation2 + $0xc8] sm:$0xff] %vm223_vm0, %v280_v20  ;;  %321 = vst.msk [vmem:[#allocation2 + $0x148] sm:$0xff] %vm223_vm0, %v288_v21 }
  0x32   : > { %786 = vrot.lane.b32.xlu1 %v400_v7, %s5681_s10  ;;  %314 = vst.msk [vmem:[#allocation2 + $0xd0] sm:$0xff] %vm223_vm0, %v281_v24  ;;  %322 = vst.msk [vmem:[#allocation2 + $0x150] sm:$0xff] %vm223_vm0, %v289_v28  ;;  %v336_v28 = vld [vmem:[#allocation2 + $0xf] sm:$0xff] }
  0x33   : > { %v5897_v15 = vld [vmem:[#allocation2 + $0x2f] sm:$0xff]  ;;  %v5899_v16 = vld [vmem:[#allocation2 + $0x27] sm:$0xff]  ;;  %vm5521_vm4 = vmpackc.low %vm2019_vm2, %vm5688_vm3  ;;  %323 = vst.msk [vmem:[#allocation2 + $0x168] sm:$0xff] %vm223_vm0, %v290_v36  ;;  %vm4136_vm2 = vcmask 1042434   ;;  %vm4138_vm3 = vcmask 1043459  }
  0x34   : > { %912 = vrot.lane.b32.xlu0 %v5899_v16, %s5683_s12  ;;  %v463_v17 = vld [vmem:[#allocation2 + $0x28] sm:$0xff]  ;;  %v464_v18 = vld [vmem:[#allocation2 + $0x30] sm:$0xff]  ;;  %5522 = vmatprep.subr.msk.bf16.mxu0 %vm5521_vm4, %v5520_v33  ;;  %324 = vst.msk [vmem:[#allocation2 + $0x170] sm:$0xff] %vm223_vm0, %v291_v39  ;;  %315 = vst.msk [vmem:[#allocation2 + $0xe8] sm:$0xff] %vm223_vm0, %v282_v42 }
  0x35   : > { %v495_v19 = vld [vmem:[#allocation2 + $0x29] sm:$0xff]  ;;  %v496_v22 = vld [vmem:[#allocation2 + $0x31] sm:$0xff]  ;;  %5543 = vmatprep.subr.msk.bf16.mxu1 %vm5521_vm4, %v5520_v33  ;;  %5525 = vmatpush3.bf16.msk.msra.mxu0 %vm5521_vm4, %v5520_v33  ;;  %316 = vst.msk [vmem:[#allocation2 + $0xf0] sm:$0xff] %vm223_vm0, %v283_v45  ;;  %325 = vst.msk [vmem:[#allocation2 + $0x188] sm:$0xff] %vm223_vm0, %v292_v48 }
  0x36   : > { %914 = vrot.lane.b32.xlu1 %v5897_v15, %s5683_s12  ;;  %v5915_v23 = vld [vmem:[#allocation2 + $0x47] sm:$0xff]  ;;  %v5932_v29 = vld [vmem:[#allocation2 + $0x4f] sm:$0xff]  ;;  %5545 = vmatpush3.bf16.msk.msra.mxu1 %vm5521_vm4, %v5520_v33  ;;  %326 = vst.msk [vmem:[#allocation2 + $0x190] sm:$0xff] %vm223_vm0, %v293_v53  ;;  %317 = vst.msk [vmem:[#allocation2 + $0x108] sm:$0xff] %vm223_vm0, %v284_v60  ;;  %vm8347_vm4 = vcmask 1044484  }
  0x37   : > { %v560_v30 = vld [vmem:[#allocation2 + $0x48] sm:$0xff]  ;;  %v561_v34 = vld [vmem:[#allocation2 + $0x50] sm:$0xff]  ;;  %318 = vst.msk [vmem:[#allocation2 + $0x110] sm:$0xff] %vm223_vm0, %v285_v10  ;;  %327 = vst.msk [vmem:[#allocation2 + $0x1a8] sm:$0xff] %vm223_vm0, %v294_v32 }
  0x38   : > { %1040 = vrot.lane.b32.xlu0 %v463_v17, %s5684_s13  ;;  %v592_v35 = vld [vmem:[#allocation2 + $0x49] sm:$0xff]  ;;  %v593_v37 = vld [vmem:[#allocation2 + $0x51] sm:$0xff]  ;;  %4042 = vst.msk [vmem:[#allocation3] sm:$0xff] %vm3849_vm13, %v5680_v0  ;;  %4043 = vst.msk [vmem:[#allocation3 + $0x8] sm:$0xff] %vm3849_vm13, %v5680_v0 }
  0x39   : > { %v5957_v38 = vld [vmem:[#allocation2 + $0x67] sm:$0xff]  ;;  %v5967_v40 = vld [vmem:[#allocation2 + $0x6f] sm:$0xff]  ;;  %4044 = vst.msk [vmem:[#allocation3 + $0x10] sm:$0xff] %vm3849_vm13, %v5680_v0  ;;  %4046 = vst.msk [vmem:[#allocation3 + $0xd8] sm:$0xff] %vm3849_vm13, %v5680_v0 }
  0x3a   : > { %660 = vrot.lane.b32.xlu1 %v463_v17, %s5682_s11  ;;  %v562_v41 = vld [vmem:[#allocation2 + $0x68] sm:$0xff]  ;;  %v563_v43 = vld [vmem:[#allocation2 + $0x70] sm:$0xff]  ;;  %4047 = vst.msk [vmem:[#allocation3 + $0xe0] sm:$0xff] %vm3849_vm13, %v5680_v0  ;;  %4048 = vst.msk [vmem:[#allocation3 + $0xe8] sm:$0xff] %vm3849_vm13, %v5680_v0 }
  0x3b   : > { %v594_v44 = vld [vmem:[#allocation2 + $0x69] sm:$0xff]  ;;  %v595_v46 = vld [vmem:[#allocation2 + $0x71] sm:$0xff]  ;;  %4060 = vst.msk [vmem:[#allocation3 + $0x10] sm:$0x1] %vm4049_vm14, %v5680_v0  ;;  %4050 = vst.msk [vmem:[#allocation3 + $0x7] sm:$0x1] %vm4049_vm14, %v5680_v0 }
  0x3c   : > { %1042 = vrot.lane.b32.xlu0 %v464_v18, %s5684_s13  ;;  %v5987_v47 = vld [vmem:[#allocation2 + $0x87] sm:$0xff]  ;;  %v5997_v49 = vld [vmem:[#allocation2 + $0x8f] sm:$0xff]  ;;  %4051 = vst.msk [vmem:[#allocation3 + $0x1f] sm:$0x1] %vm4049_vm14, %v5680_v0  ;;  %4052 = vst.msk [vmem:[#allocation3 + $0x37] sm:$0x1] %vm4049_vm14, %v5680_v0 }
  0x3d   : > { %v564_v50 = vld [vmem:[#allocation2 + $0x88] sm:$0xff]  ;;  %v565_v51 = vld [vmem:[#allocation2 + $0x90] sm:$0xff]  ;;  %4053 = vst.msk [vmem:[#allocation3 + $0x4f] sm:$0x1] %vm4049_vm14, %v5680_v0  ;;  %4054 = vst.msk [vmem:[#allocation3 + $0x67] sm:$0x1] %vm4049_vm14, %v5680_v0 }
  0x3e   : > { %1168 = vrot.lane.b32.xlu1 %v495_v19, %s5685_s14  ;;  %v596_v52 = vld [vmem:[#allocation2 + $0x89] sm:$0xff]  ;;  %v597_v54 = vld [vmem:[#allocation2 + $0x91] sm:$0xff]  ;;  %4055 = vst.msk [vmem:[#allocation3 + $0x7f] sm:$0x1] %vm4049_vm14, %v5680_v0  ;;  %4056 = vst.msk [vmem:[#allocation3 + $0x97] sm:$0x1] %vm4049_vm14, %v5680_v0 }
  0x3f   : > { %v6015_v57 = vld [vmem:[#allocation2 + $0xa7] sm:$0xff]  ;;  %v6031_v63 = vld [vmem:[#allocation2 + $0xaf] sm:$0xff]  ;;  %4057 = vst.msk [vmem:[#allocation3 + $0xaf] sm:$0x1] %vm4049_vm14, %v5680_v0  ;;  %4058 = vst.msk [vmem:[#allocation3 + $0xc7] sm:$0x1] %vm4049_vm14, %v5680_v0 }
  0x40   : > { %662 = vrot.lane.b32.xlu0 %v464_v18, %s5682_s11  ;;  %v566_v1 = vld [vmem:[#allocation2 + $0xa8] sm:$0xff]  ;;  %v567_v6 = vld [vmem:[#allocation2 + $0xb0] sm:$0xff]  ;;  %4059 = vst.msk [vmem:[#allocation3 + $0xdf] sm:$0x1] %vm4049_vm14, %v5680_v0  ;;  %4061 = vst.msk [vmem:[#allocation3 + $0x28] sm:$0x1] %vm4049_vm14, %v5680_v0 }
  0x41   : > { %v598_v7 = vld [vmem:[#allocation2 + $0xa9] sm:$0xff]  ;;  %v599_v13 = vld [vmem:[#allocation2 + $0xb1] sm:$0xff]  ;;  %4062 = vst.msk [vmem:[#allocation3 + $0x40] sm:$0x1] %vm4049_vm14, %v5680_v0  ;;  %4063 = vst.msk [vmem:[#allocation3 + $0x58] sm:$0x1] %vm4049_vm14, %v5680_v0 }
  0x42   : > { %788 = vrot.lane.b32.xlu1 %v495_v19, %s5681_s10  ;;  %v335_v18 = vld [vmem:[#allocation2 + $0x7] sm:$0xff]  ;;  %v388_v53 = vld [vmem:[#allocation2 + $0x150] sm:$0xff]  ;;  %4064 = vst.msk [vmem:[#allocation3 + $0x70] sm:$0x1] %vm4049_vm14, %v5680_v0  ;;  %4065 = vst.msk [vmem:[#allocation3 + $0x88] sm:$0x1] %vm4049_vm14, %v5680_v0 }
  0x43   : > { %v536_v24 = vld [vmem:[#allocation2 + $0xc7] sm:$0xff]  ;;  %v420_v10 = vld [vmem:[#allocation2 + $0x151] sm:$0xff]  ;;  %4066 = vst.msk [vmem:[#allocation3 + $0xa0] sm:$0x1] %vm4049_vm14, %v5680_v0  ;;  %4067 = vst.msk [vmem:[#allocation3 + $0xb8] sm:$0x1] %vm4049_vm14, %v5680_v0 }
  0x44   : > { %1170 = vrot.lane.b32.xlu0 %v496_v22, %s5685_s14  ;;  %4068 = vst.msk [vmem:[#allocation3 + $0xd0] sm:$0x1] %vm4049_vm14, %v5680_v0  ;;  %4069 = vst.msk [vmem:[#allocation3 + $0xe8] sm:$0x1] %vm4049_vm14, %v5680_v0  ;;  %vm8346_vm14 = vcmask 1045509  }
  0x46   : > { %1296 = vrot.lane.b32.xlu1 %v5915_v23, %s5686_s15 }
  0x48   : > { %790 = vrot.lane.b32.xlu0 %v496_v22, %s5681_s10 }
  0x4a   : > { %916 = vrot.lane.b32.xlu1 %v5915_v23, %s5683_s12 }
  0x4c   : > { %1298 = vrot.lane.b32.xlu0 %v5932_v29, %s5686_s15 }
  0x4e   : > { %1424 = vrot.lane.b32.xlu1 %v560_v30, %s5687_s8 }
  0x50   : > { %918 = vrot.lane.b32.xlu0 %v5932_v29, %s5683_s12 }
  0x52   : > { %1044 = vrot.lane.b32.xlu1 %v560_v30, %s5684_s13 }
  0x54   : > { %1426 = vrot.lane.b32.xlu0 %v561_v34, %s5687_s8 }
  0x56   : > { %1552 = vrot.lane.b32.xlu1 %v592_v35, %s5689_s16 }
  0x58   : > { %664 = vrot.lane.b32.xlu0 %v560_v30, %s5682_s11 }
  0x5a   : > { %1046 = vrot.lane.b32.xlu1 %v561_v34, %s5684_s13 }
  0x5c   : > { %1172 = vrot.lane.b32.xlu0 %v592_v35, %s5685_s14 }
  0x5e   : > { %1554 = vrot.lane.b32.xlu1 %v593_v37, %s5689_s16 }
  0x60   : > { %666 = vrot.lane.b32.xlu0 %v561_v34, %s5682_s11  ;;  %v387_v34 = vld [vmem:[#allocation2 + $0x148] sm:$0xff] }
  0x62   : > { %792 = vrot.lane.b32.xlu1 %v592_v35, %s5681_s10 }
  0x64   : > { %1174 = vrot.lane.b32.xlu0 %v593_v37, %s5685_s14 }
  0x66   : > { %1300 = vrot.lane.b32.xlu1 %v5957_v38, %s5686_s15 }
  0x68   : > { %794 = vrot.lane.b32.xlu0 %v593_v37, %s5681_s10 }
  0x6a   : > { %920 = vrot.lane.b32.xlu1 %v5957_v38, %s5683_s12 }
  0x6c   : > { %1302 = vrot.lane.b32.xlu0 %v5967_v40, %s5686_s15 }
  0x6e   : > { %1428 = vrot.lane.b32.xlu1 %v562_v41, %s5687_s8 }
  0x70   : > { %922 = vrot.lane.b32.xlu0 %v5967_v40, %s5683_s12 }
  0x72   : > { %1048 = vrot.lane.b32.xlu1 %v562_v41, %s5684_s13 }
  0x74   : > { %1430 = vrot.lane.b32.xlu0 %v563_v43, %s5687_s8 }
  0x76   : > { %1556 = vrot.lane.b32.xlu1 %v594_v44, %s5689_s16 }
  0x78   : > { %668 = vrot.lane.b32.xlu0 %v562_v41, %s5682_s11 }
  0x7a   : > { %1050 = vrot.lane.b32.xlu1 %v563_v43, %s5684_s13 }
  0x7c   : > { %1176 = vrot.lane.b32.xlu0 %v594_v44, %s5685_s14 }
  0x7e   : > { %1558 = vrot.lane.b32.xlu1 %v595_v46, %s5689_s16 }
  0x80   : > { %670 = vrot.lane.b32.xlu0 %v563_v43, %s5682_s11  ;;  %v537_v43 = vld [vmem:[#allocation2 + $0xcf] sm:$0xff] }
  0x82   : > { %796 = vrot.lane.b32.xlu1 %v594_v44, %s5681_s10 }
  0x84   : > { %1178 = vrot.lane.b32.xlu0 %v595_v46, %s5685_s14 }
  0x86   : > { %1304 = vrot.lane.b32.xlu1 %v5987_v47, %s5686_s15 }
  0x88   : > { %798 = vrot.lane.b32.xlu0 %v595_v46, %s5681_s10 }
  0x8a   : > { %924 = vrot.lane.b32.xlu1 %v5987_v47, %s5683_s12 }
  0x8c   : > { %1306 = vrot.lane.b32.xlu0 %v5997_v49, %s5686_s15 }
  0x8e   : > { %1432 = vrot.lane.b32.xlu1 %v564_v50, %s5687_s8 }
  0x90   : > { %926 = vrot.lane.b32.xlu0 %v5997_v49, %s5683_s12  ;;  %v785_v55 = vpop.permute.xlu1 %784 }
  0x91   : > { %v657_v56 = vpop.permute.xlu0 %656 }
  0x92   : > { %1052 = vrot.lane.b32.xlu1 %v564_v50, %s5684_s13  ;;  %v1648_v19 = vsel %vm223_vm0, %v335_v18, %v657_v56 }
  0x93   : > { %v1681_v22 = vsel %vm1680_vm5, %v1648_v19, %v785_v55 }
  0x94   : > { %1434 = vrot.lane.b32.xlu0 %v565_v51, %s5687_s8 }
  0x95   : > { %v6019_v59 = vpop.permute.xlu0 %658 }
  0x96   : > { %1560 = vrot.lane.b32.xlu1 %v596_v52, %s5689_s16  ;;  %v1649_v35 = vsel %vm223_vm0, %v336_v28, %v6019_v59  ;;  %v419_v59 = vld [vmem:[#allocation2 + $0x149] sm:$0xff] }
  0x98   : > { %672 = vrot.lane.b32.xlu0 %v564_v50, %s5682_s11 }
  0x9a   : > { %1054 = vrot.lane.b32.xlu1 %v565_v51, %s5684_s13 }
  0x9c   : > { %1180 = vrot.lane.b32.xlu0 %v596_v52, %s5685_s14 }
  0x9e   : > { %1562 = vrot.lane.b32.xlu1 %v597_v54, %s5689_s16 }
  0xa0   : > { %674 = vrot.lane.b32.xlu0 %v565_v51, %s5682_s11 }
  0xa2   : > { %800 = vrot.lane.b32.xlu1 %v596_v52, %s5681_s10  ;;  %v568_v52 = vld [vmem:[#allocation2 + $0xc8] sm:$0xff] }
  0xa4   : > { %v6017_v58 = vpop.permute.xlu1 %786  ;;  %1182 = vrot.lane.b32.xlu0 %v597_v54, %s5685_s14 }
  0xa5   : > { %v1682_v42 = vsel %vm1680_vm5, %v1649_v35, %v6017_v58 }
  0xa6   : > { %1308 = vrot.lane.b32.xlu1 %v6015_v57, %s5686_s15  ;;  %v913_v62 = vpop.permute.xlu0 %912 }
  0xa7   : > { %v1714_v25 = vsel %vm8342_vm6, %v1681_v22, %v913_v62  ;;  %v295_v62 = vld [vmem:[%s5871_s9 + $0xc8] sm:$0xff] }
  0xa8   : > { %v6026_v61 = vpop.permute.xlu1 %914  ;;  %802 = vrot.lane.b32.xlu0 %v597_v54, %s5681_s10  ;;  %328 = vst.msk [vmem:[#allocation2 + $0x1b0] sm:$0xff] %vm223_vm0, %v295_v62 }
  0xa9   : > { %v1715_v44 = vsel %vm8342_vm6, %v1682_v42, %v6026_v61 }
  0xaa   : > { %928 = vrot.lane.b32.xlu1 %v6015_v57, %s5683_s12  ;;  %v1041_v2 = vpop.permute.xlu0 %1040 }
  0xab   : > { %v1747_v30 = vsel %vm1746_vm7, %v1714_v25, %v1041_v2 }
  0xac   : > { %v6033_v3 = vpop.permute.xlu1 %660  ;;  %1310 = vrot.lane.b32.xlu0 %v6031_v63, %s5686_s15 }
  0xad   : > { %v1650_v18 = vsel %vm223_vm0, %v5899_v16, %v6033_v3  ;;  %v286_v16 = vld [vmem:[%s5871_s9 + $0x80] sm:$0xff] }
  0xae   : > { %1436 = vrot.lane.b32.xlu1 %v566_v1, %s5687_s8  ;;  %v6038_v4 = vpop.permute.xlu0 %1042  ;;  %319 = vst.msk [vmem:[#allocation2 + $0x128] sm:$0xff] %vm223_vm0, %v286_v16 }
  0xaf   : > { %v1748_v48 = vsel %vm1746_vm7, %v1715_v44, %v6038_v4 }
  0xb0   : > { %v1169_v5 = vpop.permute.xlu1 %1168  ;;  %930 = vrot.lane.b32.xlu0 %v6031_v63, %s5683_s12 }
  0xb1   : > { %v1780_v31 = vsel %vm1779_vm8, %v1747_v30, %v1169_v5  ;;  %v600_v5 = vld [vmem:[#allocation2 + $0xc9] sm:$0xff] }
  0xb2   : > { %1056 = vrot.lane.b32.xlu1 %v566_v1, %s5684_s13  ;;  %v6043_v8 = vpop.permute.xlu0 %662 }
  0xb4   : > { %v6045_v9 = vpop.permute.xlu1 %788  ;;  %1438 = vrot.lane.b32.xlu0 %v567_v6, %s5687_s8 }
  0xb5   : > { %v1683_v19 = vsel %vm1680_vm5, %v1650_v18, %v6045_v9  ;;  %v601_v9 = vld [vmem:[#allocation2 + $0xd1] sm:$0xff] }
  0xb6   : > { %1564 = vrot.lane.b32.xlu1 %v598_v7, %s5689_s16  ;;  %v1171_v11 = vpop.permute.xlu0 %1170 }
  0xb7   : > { %v1781_v50 = vsel %vm1779_vm8, %v1748_v48, %v1171_v11  ;;  %v451_v11 = vld [vmem:[#allocation2 + $0x167] sm:$0xff] }
  0xb8   : > { %v1297_v12 = vpop.permute.xlu1 %1296  ;;  %676 = vrot.lane.b32.xlu0 %v566_v1, %s5682_s11  ;;  %v569_v1 = vld [vmem:[#allocation2 + $0xd0] sm:$0xff]  ;;  %v287_v48 = vld [vmem:[%s5871_s9 + $0x88] sm:$0xff] }
  0xb9   : > { %v1813_v33 = vsel %vm1812_vm9, %v1780_v31, %v1297_v12  ;;  %320 = vst.msk [vmem:[#allocation2 + $0x130] sm:$0xff] %vm223_vm0, %v287_v48 }
  0xba   : > { %1058 = vrot.lane.b32.xlu1 %v567_v6, %s5684_s13  ;;  %v6053_v14 = vpop.permute.xlu0 %790 }
  0xbc   : > { %v6055_v17 = vpop.permute.xlu1 %916  ;;  %1184 = vrot.lane.b32.xlu0 %v598_v7, %s5685_s14 }
  0xbe   : > { %1566 = vrot.lane.b32.xlu1 %v599_v13, %s5689_s16  ;;  %v1299_v20 = vpop.permute.xlu0 %1298 }
  0xbf   : > { %v1814_v51 = vsel %vm1812_vm9, %v1781_v50, %v1299_v20  ;;  %v1716_v20 = vsel %vm8342_vm6, %v1683_v19, %v6055_v17  ;;  %v1651_v17 = vsel %vm223_vm0, %v5897_v15, %v6043_v8 }
  0xc0   : > { %v1425_v21 = vpop.permute.xlu1 %1424  ;;  %678 = vrot.lane.b32.xlu0 %v567_v6, %s5682_s11  ;;  %v1684_v32 = vsel %vm1680_vm5, %v1651_v17, %v6053_v14  ;;  %v602_v17 = vld [vmem:[#allocation2 + $0xe9] sm:$0xff] }
  0xc1   : > { %v1846_v36 = vsel %vm1845_vm10, %v1813_v33, %v1425_v21  ;;  %v452_v33 = vld [vmem:[#allocation2 + $0x16f] sm:$0xff] }
  0xc2   : > { %804 = vrot.lane.b32.xlu1 %v598_v7, %s5681_s10  ;;  %v6064_v26 = vpop.permute.xlu0 %918 }
  0xc4   : > { %v6066_v27 = vpop.permute.xlu1 %1044  ;;  %1186 = vrot.lane.b32.xlu0 %v599_v13, %s5685_s14 }
  0xc6   : > { %1312 = vrot.lane.b32.xlu1 %v536_v24, %s5686_s15  ;;  %v1427_v37 = vpop.permute.xlu0 %1426 }
  0xc7   : > { %v1847_v54 = vsel %vm1845_vm10, %v1814_v51, %v1427_v37  ;;  %v483_v37 = vld [vmem:[#allocation2 + $0x168] sm:$0xff] }
  0xc8   : > { %v1553_v39 = vpop.permute.xlu1 %1552  ;;  %696 = vrot.lane.b32.xlu0 %v387_v34, %s5682_s11  ;;  %v1717_v34 = vsel %vm8342_vm6, %v1684_v32, %v6064_v26 }
  0xc9   : > { %v1879_v41 = vsel %vm1878_vm11, %v1846_v36, %v1553_v39 }
  0xca   : > { %806 = vrot.lane.b32.xlu1 %v599_v13, %s5681_s10  ;;  %5438 = vmatprep.mubr.msk.f32.mxu0 %vm1922_vm12, %v1879_v41  ;;  %v6086_v45 = vpop.permute.xlu0 %664 }
  0xcc   : > { %v6088_v46 = vpop.permute.xlu1 %1046  ;;  %932 = vrot.lane.b32.xlu0 %v536_v24, %s5683_s12  ;;  %v1749_v24 = vsel %vm1746_vm7, %v1716_v20, %v6066_v27 }
  0xcd   : > { %v1750_v35 = vsel %vm1746_vm7, %v1717_v34, %v6088_v46 }
  0xce   : > { %1314 = vrot.lane.b32.xlu1 %v537_v43, %s5686_s15  ;;  %v1173_v55 = vpop.permute.xlu0 %1172 }
  0xcf   : > { %v1782_v25 = vsel %vm1779_vm8, %v1749_v24, %v1173_v55  ;;  %v548_v24 = vld [vmem:[#allocation2 + $0x187] sm:$0xff] }
  0xd0   : > { %v1555_v56 = vpop.permute.xlu1 %1554  ;;  %1440 = vrot.lane.b32.xlu0 %v568_v52, %s5687_s8 }
  0xd1   : > { %v1880_v58 = vsel %vm1878_vm11, %v1847_v54, %v1555_v56  ;;  %v539_v56 = vld [vmem:[#allocation2 + $0xef] sm:$0xff] }
  0xd2   : > { %698 = vrot.lane.b32.xlu1 %v388_v53, %s5682_s11  ;;  %5439 = vmatmul.mubr.msk.f32.vlgmr.msra.gmra.mrb[0].mxu0 %vm1922_vm12, %v1880_v58  ;;  %v6101_v60 = vpop.permute.xlu0 %666  ;;  %v515_v53 = vld [vmem:[#allocation2 + $0x169] sm:$0xff] }
  0xd3   : > { %v570_v58 = vld [vmem:[#allocation2 + $0xe8] sm:$0xff] }
  0xd4   : > { %v6103_v61 = vpop.permute.xlu1 %792  ;;  %824 = vrot.lane.b32.xlu0 %v419_v59, %s5681_s10  ;;  %v1652_v59 = vsel %vm223_vm0, %v5915_v23, %v6086_v45  ;;  %v296_v45 = vld [vmem:[%s5871_s9 + $0xd0] sm:$0xff] }
  0xd5   : > { %329 = vst.msk [vmem:[#allocation2 + $0x1c8] sm:$0xff] %vm223_vm0, %v296_v45 }
  0xd6   : > { %934 = vrot.lane.b32.xlu1 %v537_v43, %s5683_s12  ;;  %v1175_v2 = vpop.permute.xlu0 %1174  ;;  %v538_v43 = vld [vmem:[#allocation2 + $0xe7] sm:$0xff] }
  0xd7   : > { %v1783_v36 = vsel %vm1779_vm8, %v1750_v35, %v1175_v2  ;;  %v1685_v2 = vsel %vm1680_vm5, %v1652_v59, %v6103_v61  ;;  %v1653_v61 = vsel %vm223_vm0, %v5932_v29, %v6101_v60  ;;  %v549_v35 = vld [vmem:[#allocation2 + $0x18f] sm:$0xff] }
  0xd8   : > { %v1301_v4 = vpop.permute.xlu1 %1300  ;;  %1060 = vrot.lane.b32.xlu0 %v568_v52, %s5684_s13 }
  0xd9   : > { %v1815_v3 = vsel %vm1812_vm9, %v1782_v25, %v1301_v4 }
  0xda   : > { %1442 = vrot.lane.b32.xlu1 %v569_v1, %s5687_s8  ;;  %v6111_v6 = vpop.permute.xlu0 %794 }
  0xdb   : > { %v1686_v20 = vsel %vm1680_vm5, %v1653_v61, %v6111_v6 }
  0xdc   : > { %v6113_v7 = vpop.permute.xlu1 %920  ;;  %1568 = vrot.lane.b32.xlu0 %v600_v5, %s5689_s16 }
  0xdd   : > { %v1718_v4 = vsel %vm8342_vm6, %v1685_v2, %v6113_v7 }
  0xde   : > { %680 = vrot.lane.b32.xlu1 %v568_v52, %s5682_s11  ;;  %v1303_v12 = vpop.permute.xlu0 %1302  ;;  %v484_v52 = vld [vmem:[#allocation2 + $0x170] sm:$0xff] }
  0xdf   : > { %v1816_v14 = vsel %vm1812_vm9, %v1783_v36, %v1303_v12 }
  0xe0   : > { %v1429_v13 = vpop.permute.xlu1 %1428  ;;  %826 = vrot.lane.b32.xlu0 %v420_v10, %s5681_s10 }
  0xe1   : > { %v1848_v28 = vsel %vm1845_vm10, %v1815_v3, %v1429_v13 }
  0xe2   : > { %952 = vrot.lane.b32.xlu1 %v451_v11, %s5683_s12  ;;  %v6126_v21 = vpop.permute.xlu0 %922 }
  0xe3   : > { %v1719_v29 = vsel %vm8342_vm6, %v1686_v20, %v6126_v21 }
  0xe4   : > { %v6128_v22 = vpop.permute.xlu1 %1048  ;;  %1062 = vrot.lane.b32.xlu0 %v569_v1, %s5684_s13 }
  0xe5   : > { %v1751_v11 = vsel %vm1746_vm7, %v1718_v4, %v6128_v22  ;;  %v516_v22 = vld [vmem:[#allocation2 + $0x171] sm:$0xff] }
  0xe6   : > { %1188 = vrot.lane.b32.xlu1 %v600_v5, %s5685_s14  ;;  %v1431_v30 = vpop.permute.xlu0 %1430 }
  0xe7   : > { %v1849_v39 = vsel %vm1845_vm10, %v1816_v14, %v1431_v30 }
  0xe8   : > { %v1557_v27 = vpop.permute.xlu1 %1556  ;;  %1570 = vrot.lane.b32.xlu0 %v601_v9, %s5689_s16 }
  0xe9   : > { %v1881_v31 = vsel %vm1878_vm11, %v1848_v28, %v1557_v27 }
  0xea   : > { %682 = vrot.lane.b32.xlu1 %v569_v1, %s5682_s11  ;;  %5441 = vmatprep.mubr.msk.f32.mxu0 %vm1922_vm12, %v1881_v31  ;;  %v6150_v15 = vpop.permute.xlu0 %668 }
  0xec   : > { %v6152_v8 = vpop.permute.xlu1 %1050  ;;  %808 = vrot.lane.b32.xlu0 %v600_v5, %s5681_s10 }
  0xed   : > { %v1752_v16 = vsel %vm1746_vm7, %v1719_v29, %v6152_v8  ;;  %v613_v29 = vld [vmem:[#allocation2 + $0x191] sm:$0xff] }
  0xee   : > { %954 = vrot.lane.b32.xlu1 %v452_v33, %s5683_s12  ;;  %v1177_v26 = vpop.permute.xlu0 %1176  ;;  %v297_v33 = vld [vmem:[%s5871_s9 + $0xd8] sm:$0xff] }
  0xef   : > { %v1784_v23 = vsel %vm1779_vm8, %v1751_v11, %v1177_v26  ;;  %330 = vst.msk [vmem:[#allocation2 + $0x1d0] sm:$0xff] %vm223_vm0, %v297_v33  ;;  %v1654_v26 = vsel %vm223_vm0, %v5957_v38, %v6150_v15  ;;  %v612_v11 = vld [vmem:[#allocation2 + $0x189] sm:$0xff] }
  0xf0   : > { %v1559_v41 = vpop.permute.xlu1 %1558  ;;  %1080 = vrot.lane.b32.xlu0 %v483_v37, %s5684_s13 }
  0xf1   : > { %v1882_v42 = vsel %vm1878_vm11, %v1849_v39, %v1559_v41  ;;  %v603_v39 = vld [vmem:[#allocation2 + $0xf1] sm:$0xff] }
  0xf2   : > { %1190 = vrot.lane.b32.xlu1 %v601_v9, %s5685_s14  ;;  %5442 = vmatmul.mubr.msk.f32.gmra.mrb[2].mxu0 %vm1922_vm12, %v1882_v42  ;;  %v6165_v44 = vpop.permute.xlu0 %670 }
  0xf4   : > { %v6167_v46 = vpop.permute.xlu1 %796  ;;  %1316 = vrot.lane.b32.xlu0 %v538_v43, %s5686_s15 }
  0xf6   : > { %700 = vrot.lane.b32.xlu1 %v483_v37, %s5682_s11  ;;  %v1179_v50 = vpop.permute.xlu0 %1178  ;;  %v580_v37 = vld [vmem:[#allocation2 + $0x188] sm:$0xff] }
  0xf7   : > { %v1785_v3 = vsel %vm1779_vm8, %v1752_v16, %v1179_v50 }
  0xf8   : > { %v1305_v51 = vpop.permute.xlu1 %1304  ;;  %810 = vrot.lane.b32.xlu0 %v601_v9, %s5681_s10  ;;  %v571_v9 = vld [vmem:[#allocation2 + $0xf0] sm:$0xff] }
  0xf9   : > { %v1817_v12 = vsel %vm1812_vm9, %v1784_v23, %v1305_v51 }
  0xfa   : > { %936 = vrot.lane.b32.xlu1 %v538_v43, %s5683_s12  ;;  %v6175_v54 = vpop.permute.xlu0 %798  ;;  %v1687_v43 = vsel %vm1680_vm5, %v1654_v26, %v6167_v46  ;;  %v1655_v46 = vsel %vm223_vm0, %v5967_v40, %v6165_v44 }
  0xfb   : > { %v1688_v59 = vsel %vm1680_vm5, %v1655_v46, %v6175_v54 }
  0xfc   : > { %v6177_v55 = vpop.permute.xlu1 %924  ;;  %1082 = vrot.lane.b32.xlu0 %v484_v52, %s5684_s13 }
  0xfd   : > { %v1720_v48 = vsel %vm8342_vm6, %v1687_v43, %v6177_v55 }
  0xfe   : > { %1208 = vrot.lane.b32.xlu1 %v515_v53, %s5685_s14  ;;  %v1307_v62 = vpop.permute.xlu0 %1306 }
  0xff   : > { %v1818_v6 = vsel %vm1812_vm9, %v1785_v3, %v1307_v62  ;;  %v540_v62 = vld [vmem:[#allocation2 + $0x107] sm:$0xff] }
 0x100   : > { %v1433_v1 = vpop.permute.xlu1 %1432  ;;  %1318 = vrot.lane.b32.xlu0 %v539_v56, %s5686_s15 }
 0x101   : > { %v1850_v7 = vsel %vm1845_vm10, %v1817_v12, %v1433_v1 }
 0x102   : > { %1444 = vrot.lane.b32.xlu1 %v570_v58, %s5687_s8  ;;  %v6190_v5 = vpop.permute.xlu0 %926 }
 0x103   : > { %v1721_v1 = vsel %vm8342_vm6, %v1688_v59, %v6190_v5  ;;  %v605_v59 = vld [vmem:[#allocation2 + $0x111] sm:$0xff] }
 0x104   : > { %v6192_v10 = vpop.permute.xlu1 %1052  ;;  %702 = vrot.lane.b32.xlu0 %v484_v52, %s5682_s11 }
 0x105   : > { %v1753_v52 = vsel %vm1746_vm7, %v1720_v48, %v6192_v10  ;;  %v581_v10 = vld [vmem:[#allocation2 + $0x190] sm:$0xff]  ;;  %v298_v48 = vld [vmem:[%s5871_s9 + $0xe0] sm:$0xff] }
 0x106   : > { %828 = vrot.lane.b32.xlu1 %v515_v53, %s5681_s10  ;;  %v1435_v13 = vpop.permute.xlu0 %1434  ;;  %331 = vst.msk [vmem:[#allocation2 + $0x1e8] sm:$0xff] %vm223_vm0, %v298_v48 }
 0x107   : > { %v1851_v28 = vsel %vm1845_vm10, %v1818_v6, %v1435_v13 }
 0x108   : > { %v1561_v18 = vpop.permute.xlu1 %1560  ;;  %938 = vrot.lane.b32.xlu0 %v539_v56, %s5683_s12 }
 0x109   : > { %v1883_v19 = vsel %vm1878_vm11, %v1850_v7, %v1561_v18 }
 0x10a   : > { %1064 = vrot.lane.b32.xlu1 %v570_v58, %s5684_s13  ;;  %5444 = vmatprep.mubr.msk.f32.mxu0 %vm1922_vm12, %v1883_v19  ;;  %v6214_v60 = vpop.permute.xlu0 %672  ;;  %v541_v19 = vld [vmem:[#allocation2 + $0x10f] sm:$0xff] }
 0x10c   : > { %v1055_v25 = vpop.permute.xlu1 %1054  ;;  %1210 = vrot.lane.b32.xlu0 %v516_v22, %s5685_s14 }
 0x10d   : > { %v1754_v2 = vsel %vm1746_vm7, %v1721_v1, %v1055_v25 }
 0x10e   : > { %1336 = vrot.lane.b32.xlu1 %v548_v24, %s5686_s15  ;;  %v1181_v21 = vpop.permute.xlu0 %1180 }
 0x10f   : > { %v1786_v38 = vsel %vm1779_vm8, %v1753_v52, %v1181_v21 }
 0x110   : > { %v1563_v30 = vpop.permute.xlu1 %1562  ;;  %1446 = vrot.lane.b32.xlu0 %v571_v9, %s5687_s8 }
 0x111   : > { %v1884_v27 = vsel %vm1878_vm11, %v1851_v28, %v1563_v30  ;;  %v550_v30 = vld [vmem:[#allocation2 + $0x1a7] sm:$0xff] }
 0x112   : > { %1572 = vrot.lane.b32.xlu1 %v602_v17, %s5689_s16  ;;  %5445 = vmatmul.mubr.msk.f32.gmra.mrb[4].mxu0 %vm1922_vm12, %v1884_v27  ;;  %v6227_v31 = vpop.permute.xlu0 %674 }
 0x114   : > { %v6229_v32 = vpop.permute.xlu1 %800  ;;  %684 = vrot.lane.b32.xlu0 %v570_v58, %s5682_s11 }
 0x116   : > { %830 = vrot.lane.b32.xlu1 %v516_v22, %s5681_s10  ;;  %v1183_v34 = vpop.permute.xlu0 %1182 }
 0x117   : > { %v1787_v4 = vsel %vm1779_vm8, %v1754_v2, %v1183_v34 }
 0x118   : > { %v1309_v8 = vpop.permute.xlu1 %1308  ;;  %956 = vrot.lane.b32.xlu0 %v548_v24, %s5683_s12  ;;  %v572_v24 = vld [vmem:[#allocation2 + $0x108] sm:$0xff] }
 0x119   : > { %v1819_v15 = vsel %vm1812_vm9, %v1786_v38, %v1309_v8 }
 0x11a   : > { %1066 = vrot.lane.b32.xlu1 %v571_v9, %s5684_s13  ;;  %v6237_v36 = vpop.permute.xlu0 %802 }
 0x11c   : > { %v6239_v14 = vpop.permute.xlu1 %928  ;;  %1192 = vrot.lane.b32.xlu0 %v602_v17, %s5685_s14 }
 0x11e   : > { %1338 = vrot.lane.b32.xlu1 %v549_v35, %s5686_s15  ;;  %v1311_v41 = vpop.permute.xlu0 %1310 }
 0x11f   : > { %v1820_v54 = vsel %vm1812_vm9, %v1787_v4, %v1311_v41  ;;  %v1657_v41 = vsel %vm223_vm0, %v5997_v49, %v6227_v31  ;;  %v299_v4 = vld [vmem:[%s5871_s9 + $0xe8] sm:$0xff] }
 0x120   : > { %v1437_v42 = vpop.permute.xlu1 %1436  ;;  %1464 = vrot.lane.b32.xlu0 %v580_v37, %s5687_s8  ;;  %332 = vst.msk [vmem:[#allocation2 + $0x1f0] sm:$0xff] %vm223_vm0, %v299_v4  ;;  %v6540_v4 = vld [vmem:[#allocation2 + $0x147] sm:$0xff] }
 0x121   : > { %v1852_v53 = vsel %vm1845_vm10, %v1819_v15, %v1437_v42 }
 0x122   : > { %1574 = vrot.lane.b32.xlu1 %v603_v39, %s5689_s16  ;;  %v6252_v50 = vpop.permute.xlu0 %930 }
 0x124   : > { %v6254_v51 = vpop.permute.xlu1 %1056  ;;  %686 = vrot.lane.b32.xlu0 %v571_v9, %s5682_s11  ;;  %v1656_v9 = vsel %vm223_vm0, %v5987_v47, %v6214_v60 }
 0x125   : > { %v1689_v21 = vsel %vm1680_vm5, %v1656_v9, %v6229_v32  ;;  %v573_v32 = vld [vmem:[#allocation2 + $0x110] sm:$0xff] }
 0x126   : > { %812 = vrot.lane.b32.xlu1 %v602_v17, %s5681_s10  ;;  %v1439_v55 = vpop.permute.xlu0 %1438  ;;  %v1722_v27 = vsel %vm8342_vm6, %v1689_v21, %v6239_v14 }
 0x127   : > { %v1853_v23 = vsel %vm1845_vm10, %v1820_v54, %v1439_v55  ;;  %v1755_v47 = vsel %vm1746_vm7, %v1722_v27, %v6254_v51  ;;  %v1690_v51 = vsel %vm1680_vm5, %v1657_v41, %v6237_v36  ;;  %v574_v27 = vld [vmem:[#allocation2 + $0x128] sm:$0xff] }
 0x128   : > { %v1565_v56 = vpop.permute.xlu1 %1564  ;;  %958 = vrot.lane.b32.xlu0 %v549_v35, %s5683_s12  ;;  %v604_v35 = vld [vmem:[#allocation2 + $0x109] sm:$0xff]  ;;  %v1723_v52 = vsel %vm8342_vm6, %v1690_v51, %v6252_v50 }
 0x129   : > { %v1885_v58 = vsel %vm1878_vm11, %v1852_v53, %v1565_v56  ;;  %v551_v53 = vld [vmem:[#allocation2 + $0x1af] sm:$0xff]  ;;  %v552_v41 = vld [vmem:[#allocation2 + $0x1c7] sm:$0xff] }
 0x12a   : > { %1084 = vrot.lane.b32.xlu1 %v580_v37, %s5684_s13  ;;  %5447 = vmatprep.mubr.msk.f32.mxu0 %vm1922_vm12, %v1885_v58  ;;  %v6274_v40 = vpop.permute.xlu0 %676  ;;  %v582_v58 = vld [vmem:[#allocation2 + $0x1a8] sm:$0xff] }
 0x12b   : > { %v1658_v9 = vsel %vm223_vm0, %v6015_v57, %v6274_v40  ;;  %v300_v40 = vld [vmem:[%s5871_s9 + $0xf0] sm:$0xff] }
 0x12c   : > { %v6276_v44 = vpop.permute.xlu1 %1058  ;;  %1194 = vrot.lane.b32.xlu0 %v603_v39, %s5685_s14  ;;  %333 = vst.msk [vmem:[#allocation2 + $0x208] sm:$0xff] %vm223_vm0, %v300_v40 }
 0x12d   : > { %v1756_v31 = vsel %vm1746_vm7, %v1723_v52, %v6276_v44 }
 0x12e   : > { %1320 = vrot.lane.b32.xlu1 %v540_v62, %s5686_s15  ;;  %v1185_v45 = vpop.permute.xlu0 %1184 }
 0x12f   : > { %v1788_v60 = vsel %vm1779_vm8, %v1755_v47, %v1185_v45 }
 0x130   : > { %v1567_v5 = vpop.permute.xlu1 %1566  ;;  %1466 = vrot.lane.b32.xlu0 %v581_v10, %s5687_s8 }
 0x131   : > { %v1886_v12 = vsel %vm1878_vm11, %v1853_v23, %v1567_v5  ;;  %v583_v5 = vld [vmem:[#allocation2 + $0x1b0] sm:$0xff] }
 0x132   : > { %1592 = vrot.lane.b32.xlu1 %v612_v11, %s5689_s16  ;;  %5448 = vmatmul.mubr.msk.f32.gmra.mrb[6].mxu0 %vm1922_vm12, %v1886_v12  ;;  %v6288_v61 = vpop.permute.xlu0 %678  ;;  %v614_v12 = vld [vmem:[#allocation2 + $0x1a9] sm:$0xff] }
 0x133   : > { %v1659_v48 = vsel %vm223_vm0, %v6031_v63, %v6288_v61  ;;  %v301_v61 = vld [vmem:[%s5871_s9 + $0xf8] sm:$0xff] }
 0x134   : > { %v6290_v7 = vpop.permute.xlu1 %804  ;;  %704 = vrot.lane.b32.xlu0 %v580_v37, %s5682_s11  ;;  %334 = vst.msk [vmem:[#allocation2 + $0x210] sm:$0xff] %vm223_vm0, %v301_v61 }
 0x136   : > { %814 = vrot.lane.b32.xlu1 %v603_v39, %s5681_s10  ;;  %v1187_v13 = vpop.permute.xlu0 %1186 }
 0x137   : > { %v1789_v15 = vsel %vm1779_vm8, %v1756_v31, %v1187_v13  ;;  %v575_v31 = vld [vmem:[#allocation2 + $0x130] sm:$0xff] }
 0x138   : > { %v1313_v18 = vpop.permute.xlu1 %1312  ;;  %940 = vrot.lane.b32.xlu0 %v540_v62, %s5683_s12 }
 0x139   : > { %v1821_v8 = vsel %vm1812_vm9, %v1788_v60, %v1313_v18 }
 0x13a   : > { %1086 = vrot.lane.b32.xlu1 %v581_v10, %s5684_s13  ;;  %v6308_v20 = vpop.permute.xlu0 %696 }
 0x13c   : > { %v6310_v22 = vpop.permute.xlu1 %806  ;;  %1212 = vrot.lane.b32.xlu0 %v612_v11, %s5685_s14 }
 0x13e   : > { %1322 = vrot.lane.b32.xlu1 %v541_v19, %s5686_s15  ;;  %v6314_v25 = vpop.permute.xlu0 %932 }
 0x140   : > { %v1315_v16 = vpop.permute.xlu1 %1314  ;;  %1448 = vrot.lane.b32.xlu0 %v572_v24, %s5687_s8 }
 0x141   : > { %v1822_v46 = vsel %vm1812_vm9, %v1789_v15, %v1315_v16  ;;  %v606_v15 = vld [vmem:[#allocation2 + $0x129] sm:$0xff] }
 0x142   : > { %1594 = vrot.lane.b32.xlu1 %v613_v29, %s5689_s16  ;;  %v1441_v3 = vpop.permute.xlu0 %1440 }
 0x143   : > { %v1854_v37 = vsel %vm1845_vm10, %v1821_v8, %v1441_v3  ;;  %v543_v3 = vld [vmem:[#allocation2 + $0x12f] sm:$0xff] }
 0x144   : > { %v6318_v6 = vpop.permute.xlu1 %698  ;;  %706 = vrot.lane.b32.xlu0 %v581_v10, %s5682_s11 }
 0x146   : > { %832 = vrot.lane.b32.xlu1 %v612_v11, %s5681_s10  ;;  %v6325_v17 = vpop.permute.xlu0 %824  ;;  %v542_v11 = vld [vmem:[#allocation2 + $0x127] sm:$0xff] }
 0x148   : > { %v6327_v28 = vpop.permute.xlu1 %934  ;;  %942 = vrot.lane.b32.xlu0 %v541_v19, %s5683_s12 }
 0x14a   : > { %1068 = vrot.lane.b32.xlu1 %v572_v24, %s5684_s13  ;;  %v6335_v33 = vpop.permute.xlu0 %1060 }
 0x14c   : > { %v1443_v34 = vpop.permute.xlu1 %1442  ;;  %1214 = vrot.lane.b32.xlu0 %v613_v29, %s5685_s14 }
 0x14d   : > { %v1855_v36 = vsel %vm1845_vm10, %v1822_v46, %v1443_v34  ;;  %v615_v34 = vld [vmem:[#allocation2 + $0x1b1] sm:$0xff] }
 0x14e   : > { %1340 = vrot.lane.b32.xlu1 %v550_v30, %s5686_s15  ;;  %v1569_v14 = vpop.permute.xlu0 %1568 }
 0x14f   : > { %v1887_v26 = vsel %vm1878_vm11, %v1854_v37, %v1569_v14 }
 0x150   : > { %v6344_v39 = vpop.permute.xlu1 %680  ;;  %1450 = vrot.lane.b32.xlu0 %v573_v32, %s5687_s8  ;;  %5450 = vmatprep.mubr.msk.f32.mxu0 %vm1922_vm12, %v1887_v26 }
 0x152   : > { %1576 = vrot.lane.b32.xlu1 %v604_v35, %s5689_s16  ;;  %v6353_v42 = vpop.permute.xlu0 %826 }
 0x154   : > { %v6355_v43 = vpop.permute.xlu1 %952  ;;  %688 = vrot.lane.b32.xlu0 %v572_v24, %s5682_s11 }
 0x156   : > { %834 = vrot.lane.b32.xlu1 %v613_v29, %s5681_s10  ;;  %v6365_v38 = vpop.permute.xlu0 %1062 }
 0x158   : > { %v6367_v49 = vpop.permute.xlu1 %1188  ;;  %960 = vrot.lane.b32.xlu0 %v550_v30, %s5683_s12  ;;  %v1691_v30 = vsel %vm1680_vm5, %v1658_v9, %v6290_v7 }
 0x159   : > { %v1724_v47 = vsel %vm8342_vm6, %v1691_v30, %v6314_v25  ;;  %v6553_v30 = vld [vmem:[#allocation2 + $0x1c8] sm:$0xff] }
 0x15a   : > { %1070 = vrot.lane.b32.xlu1 %v573_v32, %s5684_s13  ;;  %v1571_v50 = vpop.permute.xlu0 %1570  ;;  %v1757_v57 = vsel %vm1746_vm7, %v1724_v47, %v6335_v33 }
 0x15b   : > { %v1888_v56 = vsel %vm1878_vm11, %v1855_v36, %v1571_v50 }
 0x15c   : > { %v6376_v55 = vpop.permute.xlu1 %682  ;;  %1196 = vrot.lane.b32.xlu0 %v604_v35, %s5685_s14  ;;  %5451 = vmatmul.mubr.msk.f32.gmra.mrb[8].mxu0 %vm1922_vm12, %v1888_v56 }
 0x15e   : > { %1342 = vrot.lane.b32.xlu1 %v551_v53, %s5686_s15  ;;  %v6382_v62 = vpop.permute.xlu0 %808 }
 0x160   : > { %v6384_v1 = vpop.permute.xlu1 %954  ;;  %1468 = vrot.lane.b32.xlu0 %v582_v58, %s5687_s8 }
 0x162   : > { %1578 = vrot.lane.b32.xlu1 %v605_v59, %s5689_s16  ;;  %v6388_v44 = vpop.permute.xlu0 %1080 }
 0x164   : > { %v6390_v2 = vpop.permute.xlu1 %1190  ;;  %690 = vrot.lane.b32.xlu0 %v573_v32, %s5682_s11  ;;  %v1790_v32 = vsel %vm1779_vm8, %v1757_v57, %v6367_v49  ;;  %v1692_v49 = vsel %vm1680_vm5, %v1659_v48, %v6310_v22 }
 0x165   : > { %v1725_v46 = vsel %vm8342_vm6, %v1692_v49, %v6327_v28 }
 0x166   : > { %816 = vrot.lane.b32.xlu1 %v604_v35, %s5681_s10  ;;  %v6396_v54 = vpop.permute.xlu0 %1316  ;;  %v1758_v63 = vsel %vm1746_vm7, %v1725_v46, %v6365_v38 }
 0x167   : > { %v1823_v7 = vsel %vm1812_vm9, %v1790_v32, %v6396_v54  ;;  %v1791_v50 = vsel %vm1779_vm8, %v1758_v63, %v6390_v2  ;;  %v553_v54 = vld [vmem:[#allocation2 + $0x1cf] sm:$0xff] }
 0x168   : > { %v6398_v10 = vpop.permute.xlu1 %700  ;;  %962 = vrot.lane.b32.xlu0 %v551_v53, %s5683_s12 }
 0x16a   : > { %1088 = vrot.lane.b32.xlu1 %v582_v58, %s5684_s13  ;;  %v6402_v23 = vpop.permute.xlu0 %810 }
 0x16c   : > { %v6404_v45 = vpop.permute.xlu1 %936  ;;  %1198 = vrot.lane.b32.xlu0 %v605_v59, %s5685_s14 }
 0x16e   : > { %1324 = vrot.lane.b32.xlu1 %v542_v11, %s5686_s15  ;;  %v6408_v13 = vpop.permute.xlu0 %1082 }
 0x170   : > { %v6410_v18 = vpop.permute.xlu1 %1208  ;;  %1470 = vrot.lane.b32.xlu0 %v583_v5, %s5687_s8 }
 0x172   : > { %1596 = vrot.lane.b32.xlu1 %v614_v12, %s5689_s16  ;;  %v6414_v19 = vpop.permute.xlu0 %1318 }
 0x173   : > { %v1824_v22 = vsel %vm1812_vm9, %v1791_v50, %v6414_v19 }
 0x174   : > { %v1445_v24 = vpop.permute.xlu1 %1444  ;;  %708 = vrot.lane.b32.xlu0 %v582_v58, %s5682_s11 }
 0x175   : > { %v1856_v25 = vsel %vm1845_vm10, %v1823_v7, %v1445_v24  ;;  %v2284_v24 = vlaneseq }
 0x176   : > { %818 = vrot.lane.b32.xlu1 %v605_v59, %s5681_s10  ;;  %v6458_v29 = vpop.permute.xlu0 %702 }
 0x177   : > { %v2285_v32 = vshrl.u32 %v2284_v24, 7 }
 0x178   : > { %v6460_v16 = vpop.permute.xlu1 %828  ;;  %944 = vrot.lane.b32.xlu0 %v542_v11, %s5683_s12 }
 0x17a   : > { %1090 = vrot.lane.b32.xlu1 %v583_v5, %s5684_s13  ;;  %v6467_v21 = vpop.permute.xlu0 %938 }
 0x17c   : > { %v6469_v0 = vpop.permute.xlu1 %1064  ;;  %1216 = vrot.lane.b32.xlu0 %v614_v12, %s5685_s14 }
 0x17e   : > { %1326 = vrot.lane.b32.xlu1 %v543_v3, %s5686_s15  ;;  %v6477_v60 = vpop.permute.xlu0 %1210 }
 0x180   : > { %v6479_v8 = vpop.permute.xlu1 %1336  ;;  %1452 = vrot.lane.b32.xlu0 %v574_v27, %s5687_s8 }
 0x182   : > { %1598 = vrot.lane.b32.xlu1 %v615_v34, %s5689_s16  ;;  %v1447_v35 = vpop.permute.xlu0 %1446 }
 0x183   : > { %v1857_v28 = vsel %vm1845_vm10, %v1824_v22, %v1447_v35 }
 0x184   : > { %v1573_v37 = vpop.permute.xlu1 %1572  ;;  %710 = vrot.lane.b32.xlu0 %v583_v5, %s5682_s11 }
 0x185   : > { %v1889_v14 = vsel %vm1878_vm11, %v1856_v25, %v1573_v37 }
 0x186   : > { %836 = vrot.lane.b32.xlu1 %v614_v12, %s5681_s10  ;;  %5453 = vmatprep.mubr.msk.f32.mxu0 %vm1922_vm12, %v1889_v14  ;;  %v6496_v33 = vpop.permute.xlu0 %684  ;;  %v5690_v12 = vmov 1983009808  }
 0x187   : > { %v2282_v19 = vunpack.c.l.s4 %v5690_v12 }
 0x188   : > { %v6498_v26 = vpop.permute.xlu1 %830  ;;  %946 = vrot.lane.b32.xlu0 %v543_v3, %s5683_s12  ;;  %v1668_v3 = vsel %vm223_vm0, %v6540_v4, %v6308_v20 }
 0x189   : > { %v1701_v9 = vsel %vm1680_vm5, %v1668_v3, %v6325_v17  ;;  %v2283_v40 = vunpack.c.0.s8 %v2282_v19 }
 0x18a   : > { %1072 = vrot.lane.b32.xlu1 %v574_v27, %s5684_s13  ;;  %v6505_v51 = vpop.permute.xlu0 %956 }
 0x18c   : > { %v6507_v52 = vpop.permute.xlu1 %1066  ;;  %1218 = vrot.lane.b32.xlu0 %v615_v34, %s5685_s14 }
 0x18e   : > { %1344 = vrot.lane.b32.xlu1 %v552_v41, %s5686_s15  ;;  %v6515_v53 = vpop.permute.xlu0 %1192 }
 0x190   : > { %v6517_v36 = vpop.permute.xlu1 %1338  ;;  %1454 = vrot.lane.b32.xlu0 %v575_v31, %s5687_s8 }
 0x192   : > { %1580 = vrot.lane.b32.xlu1 %v606_v15, %s5689_s16  ;;  %v1465_v56 = vpop.permute.xlu0 %1464 }
 0x194   : > { %v1575_v58 = vpop.permute.xlu1 %1574  ;;  %692 = vrot.lane.b32.xlu0 %v574_v27, %s5682_s11  ;;  %v6555_v27 = vld [vmem:[#allocation2 + $0x131] sm:$0xff] }
 0x195   : > { %v1890_v59 = vsel %vm1878_vm11, %v1857_v28, %v1575_v58 }
 0x196   : > { %838 = vrot.lane.b32.xlu1 %v615_v34, %s5681_s10  ;;  %5454 = vmatmul.mubr.msk.f32.gmra.mrb[10].mxu0 %vm1922_vm12, %v1890_v59  ;;  %v6534_v38 = vpop.permute.xlu0 %686  ;;  %v1734_v34 = vsel %vm8342_vm6, %v1701_v9, %v6355_v43 }
 0x197   : > { %v1767_v20 = vsel %vm1746_vm7, %v1734_v34, %v6388_v44  ;;  %v6579_v44 = vld [vmem:[%s8337_s2] ss:$0 sm:$0xff] }
 0x198   : > { %v6536_v2 = vpop.permute.xlu1 %812  ;;  %964 = vrot.lane.b32.xlu0 %v552_v41, %s5683_s12  ;;  %v1800_v7 = vsel %vm1779_vm8, %v1767_v20, %v6410_v18  ;;  %v6581_v18 = vsub.s32 %v2283_v40, %v2285_v32  ;;  %v6613_v20 = vld [vmem:[#allocation2 + $0x1d0] sm:$0xff] }
 0x199   : > { %v1833_v17 = vsel %vm1812_vm9, %v1800_v7, %v6479_v8  ;;  %v6615_v40 = vld [vmem:[#allocation2 + $0x1c9] sm:$0xff] }
 0x19a   : > { %1074 = vrot.lane.b32.xlu1 %v575_v31, %s5684_s13  ;;  %v6542_v11 = vpop.permute.xlu0 %958  ;;  %v1866_v43 = vsel %vm1845_vm10, %v1833_v17, %v1465_v56  ;;  %8357 = vst [vmem:[#allocation7_spill] sm:$0xff] %v6581_v18 }
 0x19c   : > { %v6544_v5 = vpop.permute.xlu1 %1084  ;;  %1200 = vrot.lane.b32.xlu0 %v606_v15, %s5685_s14 }
 0x19e   : > { %1346 = vrot.lane.b32.xlu1 %v553_v54, %s5686_s15  ;;  %v6559_v47 = vpop.permute.xlu0 %1194 }
 0x1a0   : > { %v6561_v57 = vpop.permute.xlu1 %1320  ;;  %1472 = vrot.lane.b32.xlu0 %v6553_v30, %s5687_s8 }
 0x1a2   : > { %1582 = vrot.lane.b32.xlu1 %v6555_v27, %s5689_s16  ;;  %v6574_v25 = vpop.permute.xlu0 %1466 }
 0x1a4   : > { %v1593_v35 = vpop.permute.xlu1 %1592  ;;  %694 = vrot.lane.b32.xlu0 %v575_v31, %s5682_s11 }
 0x1a5   : > { %v1899_v37 = vsel %vm1878_vm11, %v1866_v43, %v1593_v35  ;;  %v5440_v14 = vpop.f32.mrb[0].mxu0 }
 0x1a6   : > { %820 = vrot.lane.b32.xlu1 %v606_v15, %s5681_s10  ;;  %v2095_v8 = vadd.f32 %v5440_v14, %v6579_v44  ;;  %v2089_v41 = vpop.f32.mrb[1].mxu0  ;;  %5468 = vmatprep.mubr.msk.f32.mxu1 %vm1922_vm12, %v1899_v37  ;;  %v6589_v49 = vpop.permute.xlu0 %704 }
 0x1a7   : > { %v2090_v48 = vadd.f32 %v6579_v44, %v2089_v41  ;;  %8358 = vst [vmem:[#allocation8_spill] sm:$0xff] %v6589_v49 }
 0x1a8   : > { %v6591_v46 = vpop.permute.xlu1 %814  ;;  %v2297_v63 = vcombine.high %v2095_v8, %v2095_v8  ;;  %v2304_v61 = vrot.slane %v2095_v8, %v6581_v18  ;;  %966 = vrot.lane.b32.xlu0 %v553_v54, %s5683_s12 }
 0x1a9   : > { %8359 = vst [vmem:[#allocation9_spill] sm:$0xff] %v6591_v46  ;;  %v2280_v50 = vcombine.high %v2090_v48, %v2090_v48  ;;  %v2287_v31 = vrot.slane %v2090_v48, %v6581_v18  ;;  %v6627_v48 = vld [vmem:[#allocation2 + $0x14f] sm:$0xff] }
 0x1aa   : > { %1092 = vrot.lane.b32.xlu1 %v6553_v30, %s5684_s13  ;;  %v2311_v15 = vrot.slane %v2297_v63, %v6581_v18  ;;  %v2312_v22 = vcombine.high %v2304_v61, %v2304_v61  ;;  %v2981_v28 = vsel %vm8344_vm15, %v2304_v61, -inf  ;;  %v6601_v58 = vpop.permute.xlu0 %940 }
 0x1ab   : > { %v2294_v56 = vrot.slane %v2280_v50, %v6581_v18  ;;  %v2953_v54 = vsel %vm8344_vm15, %v2287_v31, -inf  ;;  %v2295_v3 = vcombine.high %v2287_v31, %v2287_v31  ;;  %v2982_v9 = vrot.slane %v2981_v28, 4 }
 0x1ac   : > { %v6603_v59 = vpop.permute.xlu1 %1086  ;;  %v2313_v12 = vcombine.high %v2311_v15, %v2311_v15  ;;  %v2988_v19 = vsel %vm8344_vm15, %v2312_v22, -inf  ;;  %v2995_v24 = vsel %vm8344_vm15, %v2311_v15, -inf  ;;  %1202 = vrot.lane.b32.xlu0 %v6555_v27, %s5685_s14  ;;  %v2954_v43 = vrot.slane %v2953_v54, 4 }
 0x1ad   : > { %v2989_v32 = vrot.slane %v2988_v19, 4  ;;  %v2996_v7 = vrot.slane %v2995_v24, 4  ;;  %v2296_v17 = vcombine.high %v2294_v56, %v2294_v56  ;;  %v2960_v8 = vsel %vm8344_vm15, %v2295_v3, -inf }
 0x1ae   : > { %1328 = vrot.lane.b32.xlu1 %v6540_v4, %s5686_s15  ;;  %v3002_v34 = vsel %vm8344_vm15, %v2313_v12, -inf  ;;  %v6617_v35 = vpop.permute.xlu0 %1212  ;;  %v2967_v41 = vsel %vm8344_vm15, %v2294_v56, -inf  ;;  %v2983_v63 = vmax.f32 %v2981_v28, %v2982_v9  ;;  %v2955_v31 = vmax.f32 %v2953_v54, %v2954_v43 }
 0x1af   : > { %v3003_v14 = vrot.slane %v3002_v34, 4  ;;  %v2990_v61 = vmax.f32 %v2988_v19, %v2989_v32  ;;  %v2997_v50 = vmax.f32 %v2995_v24, %v2996_v7  ;;  %v2974_v15 = vsel %vm8344_vm15, %v2296_v17, -inf }
 0x1b0   : > { %v6619_v37 = vpop.permute.xlu1 %1322  ;;  %1474 = vrot.lane.b32.xlu0 %v6613_v20, %s5687_s8  ;;  %v2961_v3 = vrot.slane %v2960_v8, 4  ;;  %v2968_v49 = vrot.slane %v2967_v41, 4  ;;  %v1669_v56 = vsel %vm223_vm0, %v6627_v48, %v6318_v6  ;;  %v2984_v19 = vrot.slane %v2983_v63, 2 }
 0x1b1   : > { %v3004_v46 = vmax.f32 %v3002_v34, %v3003_v14  ;;  %v1702_v28 = vsel %vm1680_vm5, %v1669_v56, %v6353_v42  ;;  %v2975_v24 = vrot.slane %v2974_v15, 4  ;;  %v2991_v9 = vrot.slane %v2990_v61, 2 }
 0x1b2   : > { %1600 = vrot.lane.b32.xlu1 %v6615_v40, %s5689_s16  ;;  %v6630_v22 = vpop.permute.xlu0 %1448  ;;  %v1735_v54 = vsel %vm8342_vm6, %v1702_v28, %v6384_v1  ;;  %v2998_v32 = vrot.slane %v2997_v50, 2  ;;  %v2956_v7 = vrot.slane %v2955_v31, 2  ;;  %v2962_v34 = vmax.f32 %v2960_v8, %v2961_v3 }
 0x1b3   : > { %v3005_v43 = vrot.slane %v3004_v46, 2  ;;  %v2985_v14 = vmax.f32 %v2983_v63, %v2984_v19  ;;  %v2976_v56 = vmax.f32 %v2974_v15, %v2975_v24  ;;  %v2992_v8 = vmax.f32 %v2990_v61, %v2991_v9  ;;  %v576_v24 = vld [vmem:[#allocation2 + $0x148] sm:$0xff] }
 0x1b4   : > { %v1595_v12 = vpop.permute.xlu1 %1594  ;;  %712 = vrot.lane.b32.xlu0 %v6553_v30, %s5682_s11  ;;  %v1768_v30 = vsel %vm1746_vm7, %v1735_v54, %v6408_v13  ;;  %v2963_v28 = vrot.slane %v2962_v34, 2  ;;  %v5605_v9 = vld [vmem:[#allocation2 + $0xcf] sm:$0xff] }
 0x1b5   : > { %v1801_v42 = vsel %vm1779_vm8, %v1768_v30, %v6477_v60  ;;  %v5604_v30 = vld [vmem:[#allocation2 + $0xc7] sm:$0xff]  ;;  %v3006_v63 = vmax.f32 %v3004_v46, %v3005_v43  ;;  %v2986_v61 = vrot.slane %v2985_v14, 1  ;;  %v2993_v15 = vrot.slane %v2992_v8, 1 }
 0x1b6   : > { %822 = vrot.lane.b32.xlu1 %v6555_v27, %s5681_s10  ;;  %v6643_v17 = vpop.permute.xlu0 %706  ;;  %v2969_v27 = vmax.f32 %v2967_v41, %v2968_v49  ;;  %v1834_v1 = vsel %vm1812_vm9, %v1801_v42, %v6517_v36  ;;  %v2999_v49 = vmax.f32 %v2997_v50, %v2998_v32  ;;  %v2957_v41 = vmax.f32 %v2955_v31, %v2956_v7 }
 0x1b7   : > { %8360 = vst [vmem:[#allocation10_spill] sm:$0xff] %v6643_v17  ;;  %v1867_v13 = vsel %vm1845_vm10, %v1834_v1, %v6574_v25  ;;  %v1660_v36 = vsel %vm223_vm0, %v5604_v30, %v6344_v39  ;;  %v2977_v50 = vrot.slane %v2976_v56, 2  ;;  %v1661_v32 = vsel %vm223_vm0, %v5605_v9, %v6376_v55 }
 0x1b8   : > { %v6645_v6 = vpop.permute.xlu1 %832  ;;  %948 = vrot.lane.b32.xlu0 %v6540_v4, %s5683_s12  ;;  %v2970_v4 = vrot.slane %v2969_v27, 2  ;;  %v1900_v54 = vsel %vm1878_vm11, %v1867_v13, %v1595_v12  ;;  %v1693_v25 = vsel %vm1680_vm5, %v1660_v36, %v6382_v62  ;;  %v3000_v12 = vrot.slane %v2999_v49, 1  ;;  %v6679_v62 = vld [vmem:[#allocation2 + $0x1d1] sm:$0xff] }
 0x1b9   : > { %8361 = vst [vmem:[#allocation11_spill] sm:$0xff] %v6645_v6  ;;  %5469 = vmatmul.mubr.msk.f32.vlgmr.msra.gmra.mrb[0].mxu1 %vm1922_vm12, %v1900_v54  ;;  %v1726_v31 = vsel %vm8342_vm6, %v1693_v25, %v6404_v45  ;;  %v2958_v39 = vrot.slane %v2957_v41, 1  ;;  %v2964_v42 = vmax.f32 %v2962_v34, %v2963_v28  ;;  %v1694_v45 = vsel %vm1680_vm5, %v1661_v32, %v6402_v23 }
 0x1ba   : > { %1094 = vrot.lane.b32.xlu1 %v6613_v20, %s5684_s13  ;;  %v6659_v3 = vpop.permute.xlu0 %942  ;;  %v1759_v7 = vsel %vm1746_vm7, %v1726_v31, %v6469_v0  ;;  %v2971_v43 = vmax.f32 %v2969_v27, %v2970_v4  ;;  %v3007_v13 = vrot.slane %v3006_v63, 1  ;;  %v2987_v30 = vmax.f32 %v2985_v14, %v2986_v61  ;;  %v5606_v4 = vld [vmem:[#allocation2 + $0x167] sm:$0xff] }
 0x1bb   : > { %v1792_v1 = vsel %vm1779_vm8, %v1759_v7, %v6515_v53  ;;  %v2978_v36 = vmax.f32 %v2976_v56, %v2977_v50  ;;  %v2994_v55 = vmax.f32 %v2992_v8, %v2993_v15  ;;  %v3001_v0 = vmax.f32 %v2999_v49, %v3000_v12 }
 0x1bc   : > { %v6661_v60 = vpop.permute.xlu1 %1068  ;;  %1220 = vrot.lane.b32.xlu0 %v6615_v40, %s5685_s14  ;;  %v1825_v54 = vsel %vm1812_vm9, %v1792_v1, %v6561_v57  ;;  %v2959_v34 = vmax.f32 %v2957_v41, %v2958_v39  ;;  %v1727_v28 = vsel %vm8342_vm6, %v1694_v45, %v6467_v21  ;;  %v2965_v57 = vrot.slane %v2964_v42, 1 }
 0x1bd   : > { %v1858_v23 = vsel %vm1845_vm10, %v1825_v54, %v6630_v22  ;;  %v2972_v14 = vrot.slane %v2971_v43, 1  ;;  %v6703_v25 = vsel %vm223_vm0, %v5606_v4, %v6398_v10  ;;  %v1760_v8 = vsel %vm1746_vm7, %v1727_v28, %v6507_v52 }
 0x1be   : > { %1330 = vrot.lane.b32.xlu1 %v6627_v48, %s5686_s15  ;;  %v6675_v46 = vpop.permute.xlu0 %1214  ;;  %v3008_v49 = vmax.f32 %v3006_v63, %v3007_v13  ;;  %v1793_v41 = vsel %vm1779_vm8, %v1760_v8, %v6559_v47  ;;  %v6711_v21 = vsel %vm3849_vm13, %v2987_v30, -inf  ;;  %v2979_v61 = vrot.slane %v2978_v36, 1 }
 0x1bf   : > { %v6719_v52 = vsel %vm3849_vm13, %v2994_v55, -inf  ;;  %v6722_v63 = vsel %vm3849_vm13, %v3001_v0, -inf  ;;  %v6725_v47 = vsel %vm3849_vm13, %v2959_v34, -inf  ;;  %v6734_v39 = vmax.f32 %v2971_v43, %v2972_v14 }
 0x1c0   : > { %v6677_v19 = vpop.permute.xlu1 %1340  ;;  %1456 = vrot.lane.b32.xlu0 %v576_v24, %s5687_s8  ;;  %v6738_v32 = vsel %vm3849_vm13, %v3008_v49, -inf  ;;  %v6742_v7 = vsel %vm1812_vm9, %v1793_v41, %v6619_v37  ;;  %v6745_v13 = vmax.f32 %v2978_v36, %v2979_v61 }
 0x1c2   : > { %1602 = vrot.lane.b32.xlu1 %v6679_v62, %s5689_s16  ;;  %v6696_v27 = vpop.permute.xlu0 %1450 }
 0x1c4   : > { %v1577_v53 = vpop.permute.xlu1 %1576  ;;  %714 = vrot.lane.b32.xlu0 %v6613_v20, %s5682_s11  ;;  %v6732_v20 = vmax.f32 %v2964_v42, %v2965_v57 }
 0x1c5   : > { %v1891_v56 = vsel %vm1878_vm11, %v1858_v23, %v1577_v53  ;;  %v5443_v22 = vpop.f32.mrb[2].mxu0  ;;  %v554_v23 = vld [vmem:[#allocation2 + $0x1e7] sm:$0xff] }
 0x1c6   : > { %5456 = vmatprep.mubr.msk.f32.mxu0 %vm1922_vm12, %v1891_v56  ;;  %v2105_v50 = vadd.f32 %v5443_v22, %v6579_v44  ;;  %840 = vrot.lane.b32.xlu1 %v6615_v40, %s5681_s10  ;;  %v2099_v10 = vpop.f32.mrb[3].mxu0  ;;  %v6728_v15 = vpop.permute.xlu0 %688 }
 0x1c7   : > { %v2100_v31 = vadd.f32 %v6579_v44, %v2099_v10  ;;  %8362 = vst [vmem:[#allocation12_spill] sm:$0xff] %v6728_v15 }
 0x1c8   : > { %v6730_v12 = vpop.permute.xlu1 %834  ;;  %v2331_v40 = vcombine.high %v2105_v50, %v2105_v50  ;;  %v2338_v9 = vrot.slane %v2105_v50, %v6581_v18  ;;  %950 = vrot.lane.b32.xlu0 %v6627_v48, %s5683_s12 }
 0x1c9   : > { %8363 = vst [vmem:[#allocation13_spill] sm:$0xff] %v6730_v12  ;;  %v2314_v45 = vcombine.high %v2100_v31, %v2100_v31  ;;  %v2321_v1 = vrot.slane %v2100_v31, %v6581_v18 }
 0x1ca   : > { %v2345_v42 = vrot.slane %v2331_v40, %v6581_v18  ;;  %v2346_v54 = vcombine.high %v2338_v9, %v2338_v9  ;;  %v3037_v43 = vsel %vm8344_vm15, %v2338_v9, -inf  ;;  %1076 = vrot.lane.b32.xlu1 %v576_v24, %s5684_s13  ;;  %v6754_v34 = vpop.permute.xlu0 %960 }
 0x1cb   : > { %v3038_v30 = vrot.slane %v3037_v43, 4  ;;  %v2328_v55 = vrot.slane %v2314_v45, %v6581_v18  ;;  %v2329_v37 = vcombine.high %v2321_v1, %v2321_v1  ;;  %v3009_v0 = vsel %vm8344_vm15, %v2321_v1, -inf  ;;  %8364 = vst [vmem:[#allocation14_spill] sm:$0xff] %v6754_v34  ;;  %v577_v45 = vld [vmem:[#allocation2 + $0x150] sm:$0xff] }
 0x1cc   : > { %v6756_v36 = vpop.permute.xlu1 %1070  ;;  %v2347_v53 = vcombine.high %v2345_v42, %v2345_v42  ;;  %v3044_v28 = vsel %vm8344_vm15, %v2346_v54, -inf  ;;  %v3051_v57 = vsel %vm8344_vm15, %v2345_v42, -inf  ;;  %v3010_v14 = vrot.slane %v3009_v0, 4  ;;  %1222 = vrot.lane.b32.xlu0 %v6679_v62, %s5685_s14  ;;  %v608_v1 = vld [vmem:[#allocation2 + $0x149] sm:$0xff] }
 0x1cd   : > { %8365 = vst [vmem:[#allocation15_spill] sm:$0xff] %v6756_v36  ;;  %v3039_v48 = vmax.f32 %v3037_v43, %v3038_v30  ;;  %v3045_v56 = vrot.slane %v3044_v28, 4  ;;  %v3052_v24 = vrot.slane %v3051_v57, 4  ;;  %v2330_v4 = vcombine.high %v2328_v55, %v2328_v55 }
 0x1ce   : > { %v3058_v8 = vsel %vm8344_vm15, %v2347_v53, -inf  ;;  %v3011_v49 = vmax.f32 %v3009_v0, %v3010_v14  ;;  %v3016_v22 = vsel %vm8344_vm15, %v2329_v37, -inf  ;;  %v3023_v41 = vsel %vm8344_vm15, %v2328_v55, -inf  ;;  %1348 = vrot.lane.b32.xlu1 %v554_v23, %s5686_s15  ;;  %v6766_v40 = vpop.permute.xlu0 %1196 }
 0x1cf   : > { %v3040_v61 = vrot.slane %v3039_v48, 2  ;;  %v3046_v50 = vmax.f32 %v3044_v28, %v3045_v56  ;;  %v3053_v10 = vmax.f32 %v3051_v57, %v3052_v24  ;;  %v3059_v31 = vrot.slane %v3058_v8, 4 }
 0x1d0   : > { %v6768_v9 = vpop.permute.xlu1 %1342  ;;  %v3012_v42 = vrot.slane %v3011_v49, 2  ;;  %v3017_v54 = vrot.slane %v3016_v22, 4  ;;  %v3024_v43 = vrot.slane %v3023_v41, 4  ;;  %v3030_v30 = vsel %vm8344_vm15, %v2330_v4, -inf  ;;  %1458 = vrot.lane.b32.xlu0 %v577_v45, %s5687_s8 }
 0x1d1   : > { %v3041_v55 = vmax.f32 %v3039_v48, %v3040_v61  ;;  %v3047_v37 = vrot.slane %v3046_v50, 2  ;;  %v3054_v0 = vrot.slane %v3053_v10, 2  ;;  %v3060_v53 = vmax.f32 %v3058_v8, %v3059_v31 }
 0x1d2   : > { %v3013_v14 = vmax.f32 %v3011_v49, %v3012_v42  ;;  %v3018_v15 = vmax.f32 %v3016_v22, %v3017_v54  ;;  %v3025_v28 = vmax.f32 %v3023_v41, %v3024_v43  ;;  %v3031_v57 = vrot.slane %v3030_v30, 4  ;;  %1584 = vrot.lane.b32.xlu1 %v608_v1, %s5689_s16  ;;  %v6773_v34 = vpop.permute.xlu0 %1468 }
 0x1d3   : > { %v3042_v56 = vrot.slane %v3041_v55, 1  ;;  %v3048_v24 = vmax.f32 %v3046_v50, %v3047_v37  ;;  %v3055_v12 = vmax.f32 %v3053_v10, %v3054_v0  ;;  %v3061_v17 = vrot.slane %v3060_v53, 2 }
 0x1d4   : > { %v1579_v6 = vpop.permute.xlu1 %1578  ;;  %v3014_v4 = vrot.slane %v3013_v14, 1  ;;  %v3019_v48 = vrot.slane %v3018_v15, 2  ;;  %v3026_v61 = vrot.slane %v3025_v28, 2  ;;  %v3032_v36 = vmax.f32 %v3030_v30, %v3031_v57  ;;  %842 = vrot.lane.b32.xlu0 %v6679_v62, %s5681_s10 }
 0x1d5   : > { %v3043_v8 = vmax.f32 %v3041_v55, %v3042_v56  ;;  %v3049_v49 = vrot.slane %v3048_v24, 1  ;;  %v3056_v22 = vrot.slane %v3055_v12, 1  ;;  %v3062_v41 = vmax.f32 %v3060_v53, %v3061_v17 }
 0x1d6   : > { %v3015_v31 = vmax.f32 %v3013_v14, %v3014_v4  ;;  %v3020_v42 = vmax.f32 %v3018_v15, %v3019_v48  ;;  %v3027_v54 = vmax.f32 %v3025_v28, %v3026_v61  ;;  %v3033_v43 = vrot.slane %v3032_v36, 2  ;;  %968 = vrot.lane.b32.xlu1 %v554_v23, %s5683_s12  ;;  %v6779_v0 = vpop.permute.xlu0 %690 }
 0x1d7   : > { %v3050_v50 = vmax.f32 %v3048_v24, %v3049_v49  ;;  %v3057_v10 = vmax.f32 %v3055_v12, %v3056_v22  ;;  %v3063_v37 = vrot.slane %v3062_v41, 1  ;;  %v3863_v30 = vsel %vm3849_vm13, %v3043_v8, -inf }
 0x1d8   : > { %v6781_v55 = vpop.permute.xlu1 %816  ;;  %v3864_v17 = vmax.f32 %v6711_v21, %v3863_v30  ;;  %v3021_v53 = vrot.slane %v3020_v42, 1  ;;  %v3028_v15 = vrot.slane %v3027_v54, 1  ;;  %v3034_v14 = vmax.f32 %v3032_v36, %v3033_v43  ;;  %1078 = vrot.lane.b32.xlu0 %v577_v45, %s5684_s13 }
 0x1d9   : > { %v3064_v28 = vmax.f32 %v3062_v41, %v3063_v37  ;;  %v3866_v57 = vsel %vm3849_vm13, %v3050_v50, -inf  ;;  %v3869_v62 = vsel %vm3849_vm13, %v3057_v10, -inf  ;;  %v3851_v23 = vsel %vm3849_vm13, %v3015_v31, -inf  ;;  %v6804_v41 = vld [vmem:[#allocation2 + $0x1e8] sm:$0xff] }
 0x1da   : > { %v3867_v12 = vmax.f32 %v6719_v52, %v3866_v57  ;;  %v3870_v56 = vmax.f32 %v6722_v63, %v3869_v62  ;;  %v3022_v24 = vmax.f32 %v3020_v42, %v3021_v53  ;;  %v3029_v4 = vmax.f32 %v3027_v54, %v3028_v15  ;;  %1204 = vrot.lane.b32.xlu1 %v608_v1, %s5685_s14  ;;  %v6795_v8 = vpop.permute.xlu0 %962  ;;  %v555_v52 = vld [vmem:[#allocation2 + $0x1ef] sm:$0xff] }
 0x1db   : > { %v3853_v21 = vsel %vm3849_vm13, %v6732_v20, -inf  ;;  %v3872_v36 = vsel %vm3849_vm13, %v3064_v28, -inf  ;;  %v3035_v48 = vrot.slane %v3034_v14, 1  ;;  %v3852_v61 = vmax.f32 %v6725_v47, %v3851_v23 }
 0x1dc   : > { %v6797_v49 = vpop.permute.xlu1 %1088  ;;  %v3856_v63 = vsel %vm3849_vm13, %v6734_v39, -inf  ;;  %v3873_v45 = vmax.f32 %v6738_v32, %v3872_v36  ;;  %v3854_v22 = vsel %vm3849_vm13, %v3022_v24, -inf  ;;  %v3857_v20 = vsel %vm3849_vm13, %v3029_v4, -inf  ;;  %1350 = vrot.lane.b32.xlu0 %v555_v52, %s5686_s15  ;;  %v546_v24 = vld [vmem:[#allocation2 + $0x167] sm:$0xff]  ;;  %v6858_v36 = vld [vmem:[#allocation2 + $0x1f0] sm:$0xff] }
 0x1dd   : > { %v1859_v47 = vsel %vm1845_vm10, %v6742_v7, %v6696_v27  ;;  %v3036_v1 = vmax.f32 %v3034_v14, %v3035_v48  ;;  %v3855_v31 = vmax.f32 %v3853_v21, %v3854_v22  ;;  %v3858_v42 = vmax.f32 %v3856_v63, %v3857_v20 }
 0x1de   : > { %v1703_v54 = vsel %vm1680_vm5, %v6703_v25, %v6460_v16  ;;  %v1892_v39 = vsel %vm1878_vm11, %v1859_v47, %v1579_v6  ;;  %v3859_v43 = vsel %vm3849_vm13, %v6745_v13, -inf  ;;  %1476 = vrot.lane.b32.xlu1 %v6804_v41, %s5687_s8  ;;  %v6823_v16 = vpop.permute.xlu0 %1198  ;;  %v609_v25 = vld [vmem:[#allocation2 + $0x151] sm:$0xff] }
 0x1df   : > { %v1736_v32 = vsel %vm8342_vm6, %v1703_v54, %v6505_v51  ;;  %v3860_v27 = vsel %vm3849_vm13, %v3036_v1, -inf  ;;  %v4135_v7 = vsel %vm8341_vm1, %v3855_v31, %v3852_v61  ;;  %5457 = vmatmul.mubr.msk.f32.gmra.mrb[12].mxu0 %vm1922_vm12, %v1892_v39  ;;  %vm8345_vm1 = vcmask 1046534   ;;  %v6871_v1 = vld [vmem:[#allocation2 + $0x1e9] sm:$0xff] }
 0x1e0   : > { %v6825_v6 = vpop.permute.xlu1 %1324  ;;  %v1769_v51 = vsel %vm1746_vm7, %v1736_v32, %v6544_v5  ;;  %v3861_v50 = vmax.f32 %v3859_v43, %v3860_v27  ;;  %v4137_v13 = vsel %vm4136_vm2, %v3858_v42, %v4135_v7  ;;  %1586 = vrot.lane.b32.xlu0 %v609_v25, %s5689_s16  ;;  %vm8343_vm6 = vcmask 1047559  }
 0x1e1   : > { %v1802_v10 = vsel %vm1779_vm8, %v1769_v51, %v6617_v35 }
 0x1e2   : > { %v1835_v37 = vsel %vm1812_vm9, %v1802_v10, %v6677_v19  ;;  %v4139_v30 = vsel %vm4138_vm3, %v3861_v50, %v4137_v13  ;;  %970 = vrot.lane.b32.xlu1 %v555_v52, %s5683_s12  ;;  %v6840_v15 = vpop.permute.xlu0 %1470 }
 0x1e3   : > { %v4141_v53 = vsel %vm8347_vm4, %v3864_v17, %v4139_v30  ;;  %v1868_v5 = vsel %vm1845_vm10, %v1835_v37, %v6773_v34 }
 0x1e4   : > { %v1597_v35 = vpop.permute.xlu1 %1596  ;;  %v4143_v14 = vsel %vm8346_vm14, %v3867_v12, %v4141_v53  ;;  %1096 = vrot.lane.b32.xlu0 %v6804_v41, %s5684_s13 }
 0x1e5   : > { %v1901_v19 = vsel %vm1878_vm11, %v1868_v5, %v1597_v35  ;;  %v4145_v28 = vsel %vm8345_vm1, %v3870_v56, %v4143_v14  ;;  %v5446_v57 = vpop.f32.mrb[4].mxu0 }
 0x1e6   : > { %5471 = vmatprep.mubr.msk.f32.mxu1 %vm1922_vm12, %v1901_v19  ;;  %v4147_v17 = vsel %vm8343_vm6, %v3873_v45, %v4145_v28  ;;  %v2115_v62 = vadd.f32 %v5446_v57, %v6579_v44  ;;  %v2109_v34 = vpop.f32.mrb[5].mxu0  ;;  %1206 = vrot.lane.b32.xlu1 %v609_v25, %s5685_s14  ;;  %v6853_v12 = vpop.permute.xlu0 %708  ;;  %vm8366_vm6 = vcmask 72704  }
 0x1e7   : > { %4206 = vst.msk [vmem:[#allocation3 + $0x20] sm:$0xff] %vm3849_vm13, %v4147_v17  ;;  %v2110_v23 = vadd.f32 %v6579_v44, %v2109_v34  ;;  %v547_v17 = vld [vmem:[#allocation2 + $0x16f] sm:$0xff] }
 0x1e8   : > { %v6855_v56 = vpop.permute.xlu1 %818  ;;  %v2365_v4 = vcombine.high %v2115_v62, %v2115_v62  ;;  %v2372_v21 = vrot.slane %v2115_v62, %v6581_v18  ;;  %1332 = vrot.lane.b32.xlu0 %v546_v24, %s5686_s15  ;;  %v5607_v24 = vld [vmem:[#allocation2 + $0x16f] sm:$0xff] }
 0x1e9   : > { %v2348_v48 = vcombine.high %v2110_v23, %v2110_v23  ;;  %v2355_v61 = vrot.slane %v2110_v23, %v6581_v18  ;;  %v578_v23 = vld [vmem:[#allocation2 + $0x168] sm:$0xff] }
 0x1ea   : > { %v2379_v52 = vrot.slane %v2365_v4, %v6581_v18  ;;  %v2380_v63 = vcombine.high %v2372_v21, %v2372_v21  ;;  %v3093_v45 = vsel %vm8344_vm15, %v2372_v21, -inf  ;;  %1478 = vrot.lane.b32.xlu1 %v6858_v36, %s5687_s8  ;;  %v6867_v20 = vpop.permute.xlu0 %944  ;;  %v1671_v4 = vsel %vm223_vm0, %v5607_v24, %v6458_v29  ;;  %v6906_v29 = vld [vmem:[#allocation2 + $0x1f1] sm:$0xff]  ;;  %v556_v24 = vld [vmem:[#allocation2 + $0x207] sm:$0xff] }
 0x1eb   : > { %v2362_v22 = vrot.slane %v2348_v48, %v6581_v18  ;;  %v3065_v39 = vsel %vm8344_vm15, %v2355_v61, -inf  ;;  %v2363_v32 = vcombine.high %v2355_v61, %v2355_v61  ;;  %v3094_v43 = vrot.slane %v3093_v45, 4 }
 0x1ec   : > { %v6869_v47 = vpop.permute.xlu1 %1090  ;;  %v2381_v31 = vcombine.high %v2379_v52, %v2379_v52  ;;  %v3100_v42 = vsel %vm8344_vm15, %v2380_v63, -inf  ;;  %v3107_v54 = vsel %vm8344_vm15, %v2379_v52, -inf  ;;  %1604 = vrot.lane.b32.xlu0 %v6871_v1, %s5689_s16  ;;  %v3066_v50 = vrot.slane %v3065_v39, 4 }
 0x1ed   : > { %v3101_v7 = vrot.slane %v3100_v42, 4  ;;  %v3108_v25 = vrot.slane %v3107_v54, 4  ;;  %v2364_v51 = vcombine.high %v2362_v22, %v2362_v22  ;;  %v3072_v30 = vsel %vm8344_vm15, %v2363_v32, -inf }
 0x1ee   : > { %v3114_v27 = vsel %vm8344_vm15, %v2381_v31, -inf  ;;  %716 = vrot.lane.b32.xlu1 %v6804_v41, %s5682_s11  ;;  %v6881_v13 = vpop.permute.xlu0 %1216  ;;  %v3079_v53 = vsel %vm8344_vm15, %v2362_v22, -inf  ;;  %v3095_v5 = vmax.f32 %v3093_v45, %v3094_v43  ;;  %v3067_v19 = vmax.f32 %v3065_v39, %v3066_v50 }
 0x1ef   : > { %v3115_v37 = vrot.slane %v3114_v27, 4  ;;  %v3102_v35 = vmax.f32 %v3100_v42, %v3101_v7  ;;  %v3109_v14 = vmax.f32 %v3107_v54, %v3108_v25  ;;  %v3086_v28 = vsel %vm8344_vm15, %v2364_v51, -inf }
 0x1f0   : > { %v6883_v10 = vpop.permute.xlu1 %1326  ;;  %1098 = vrot.lane.b32.xlu0 %v6858_v36, %s5684_s13  ;;  %v3073_v62 = vrot.slane %v3072_v30, 4  ;;  %v3080_v34 = vrot.slane %v3079_v53, 4  ;;  %v1704_v48 = vsel %vm1680_vm5, %v1671_v4, %v6498_v26  ;;  %v3096_v61 = vrot.slane %v3095_v5, 2 }
 0x1f1   : > { %v3116_v21 = vmax.f32 %v3114_v27, %v3115_v37  ;;  %v3087_v52 = vrot.slane %v3086_v28, 4  ;;  %v1737_v63 = vsel %vm8366_vm6, %v1704_v48, %v6542_v11  ;;  %v3103_v45 = vrot.slane %v3102_v35, 2  ;;  %v5609_v48 = vld [vmem:[#allocation2 + $0xef] sm:$0xff] }
 0x1f2   : > { %1224 = vrot.lane.b32.xlu1 %v6871_v1, %s5685_s14  ;;  %v6892_v41 = vpop.permute.xlu0 %1452  ;;  %v3110_v22 = vrot.slane %v3109_v14, 2  ;;  %v3068_v31 = vrot.slane %v3067_v19, 2  ;;  %v1770_v26 = vsel %vm1746_vm7, %v1737_v63, %v6603_v59  ;;  %v3074_v39 = vmax.f32 %v3072_v30, %v3073_v62  ;;  %v8367_v63 = vld [vmem:[#allocation9_spill] sm:$0xff] }
 0x1f3   : > { %v3081_v32 = vmax.f32 %v3079_v53, %v3080_v34  ;;  %v1803_v43 = vsel %vm1779_vm8, %v1770_v26, %v6675_v46  ;;  %v3117_v11 = vrot.slane %v3116_v21, 2  ;;  %v3097_v7 = vmax.f32 %v3095_v5, %v3096_v61 }
 0x1f4   : > { %v1599_v57 = vpop.permute.xlu1 %1598  ;;  %1334 = vrot.lane.b32.xlu0 %v547_v17, %s5686_s15  ;;  %v1836_v27 = vsel %vm1812_vm9, %v1803_v43, %v6768_v9  ;;  %v3088_v25 = vmax.f32 %v3086_v28, %v3087_v52  ;;  %v3104_v50 = vmax.f32 %v3102_v35, %v3103_v45  ;;  %v3111_v37 = vmax.f32 %v3109_v14, %v3110_v22  ;;  %v5608_v28 = vld [vmem:[#allocation2 + $0xe7] sm:$0xff] }
 0x1f5   : > { %v1869_v51 = vsel %vm1845_vm10, %v1836_v27, %v6840_v15  ;;  %v3069_v59 = vmax.f32 %v3067_v19, %v3068_v31  ;;  %v3075_v53 = vrot.slane %v3074_v39, 2  ;;  %v3082_v9 = vrot.slane %v3081_v32, 2 }
 0x1f6   : > { %1460 = vrot.lane.b32.xlu1 %v578_v23, %s5687_s8  ;;  %v6902_v42 = vpop.permute.xlu0 %710  ;;  %v1902_v5 = vsel %vm1878_vm11, %v1869_v51, %v1599_v57  ;;  %v1662_v17 = vsel %vm223_vm0, %v5608_v28, %v6496_v33  ;;  %v3118_v62 = vmax.f32 %v3116_v21, %v3117_v11  ;;  %v3098_v35 = vrot.slane %v3097_v7, 1  ;;  %v610_v11 = vld [vmem:[#allocation2 + $0x169] sm:$0xff] }
 0x1f7   : > { %5472 = vmatmul.mubr.msk.f32.gmra.mrb[2].mxu1 %vm1922_vm12, %v1902_v5  ;;  %v1695_v15 = vsel %vm1680_vm5, %v1662_v17, %v6536_v2  ;;  %v3105_v19 = vrot.slane %v3104_v50, 1  ;;  %v3112_v57 = vrot.slane %v3111_v37, 1  ;;  %v3070_v34 = vrot.slane %v3069_v59, 1  ;;  %v5610_v51 = vld [vmem:[#allocation2 + $0x187] sm:$0xff] }
 0x1f8   : > { %v6904_v54 = vpop.permute.xlu1 %836  ;;  %1606 = vrot.lane.b32.xlu0 %v6906_v29, %s5689_s16  ;;  %v1728_v14 = vsel %vm8366_vm6, %v1695_v15, %v6601_v58  ;;  %v3076_v4 = vmax.f32 %v3074_v39, %v3075_v53  ;;  %v3083_v21 = vmax.f32 %v3081_v32, %v3082_v9  ;;  %v1663_v58 = vsel %vm223_vm0, %v5609_v48, %v6534_v38  ;;  %v557_v48 = vld [vmem:[#allocation2 + $0x20f] sm:$0xff] }
 0x1f9   : > { %v1761_v2 = vsel %vm1746_vm7, %v1728_v14, %v6661_v60  ;;  %v3119_v52 = vrot.slane %v3118_v62, 1  ;;  %v1696_v45 = vsel %vm1680_vm5, %v1663_v58, %v8367_v63  ;;  %v3099_v31 = vmax.f32 %v3097_v7, %v3098_v35 }
 0x1fa   : > { %718 = vrot.lane.b32.xlu1 %v6858_v36, %s5682_s11  ;;  %v6920_v30 = vpop.permute.xlu0 %946  ;;  %v3089_v36 = vrot.slane %v3088_v25, 2  ;;  %v1794_v61 = vsel %vm1779_vm8, %v1761_v2, %v6766_v40  ;;  %v3106_v60 = vmax.f32 %v3104_v50, %v3105_v19  ;;  %v3113_v39 = vmax.f32 %v3111_v37, %v3112_v57  ;;  %v8368_v50 = vld [vmem:[#allocation8_spill] sm:$0xff]  ;;  %s5692_s11 = smov 16  }
 0x1fb   : > { %v1827_v22 = vsel %vm1812_vm9, %v1794_v61, %v6825_v6  ;;  %v3071_v32 = vmax.f32 %v3069_v59, %v3070_v34  ;;  %v1729_v27 = vsel %vm8366_vm6, %v1696_v45, %v6659_v3  ;;  %v3077_v6 = vrot.slane %v3076_v4, 1  ;;  %v8369_v59 = vld [vmem:[#allocation15_spill] sm:$0xff] }
 0x1fc   : > { %v6922_v46 = vpop.permute.xlu1 %1072  ;;  %844 = vrot.lane.b32.xlu0 %v6871_v1, %s5681_s10  ;;  %v579_v1 = vld [vmem:[#allocation2 + $0x170] sm:$0xff]  ;;  %v3090_v26 = vmax.f32 %v3088_v25, %v3089_v36  ;;  %v1860_v38 = vsel %vm1845_vm10, %v1827_v22, %v6892_v41  ;;  %v3084_v7 = vrot.slane %v3083_v21, 1  ;;  %v6961_v37 = vsel %vm223_vm0, %v5610_v51, %v8368_v50 }
 0x1fd   : > { %v1762_v41 = vsel %vm1746_vm7, %v1729_v27, %v8369_v59  ;;  %v3120_v53 = vmax.f32 %v3118_v62, %v3119_v52  ;;  %v6969_v3 = vsel %vm3849_vm13, %v3099_v31, -inf  ;;  %v6974_v35 = vsel %vm3849_vm13, %v3106_v60, -inf }
 0x1fe   : > { %1226 = vrot.lane.b32.xlu1 %v6906_v29, %s5685_s14  ;;  %v6936_v33 = vpop.permute.xlu0 %1218  ;;  %v1795_v5 = vsel %vm1779_vm8, %v1762_v41, %v6823_v16  ;;  %v3091_v28 = vrot.slane %v3090_v26, 1  ;;  %v6977_v62 = vsel %vm3849_vm13, %v3113_v39, -inf  ;;  %v6980_v36 = vsel %vm3849_vm13, %v3071_v32, -inf }
 0x1ff   : > { %v6989_v57 = vmax.f32 %v3076_v4, %v3077_v6  ;;  %v6991_v34 = vmax.f32 %v3083_v21, %v3084_v7  ;;  %v6995_v58 = vsel %vm3849_vm13, %v3120_v53, -inf }
 0x200   : > { %v6938_v23 = vpop.permute.xlu1 %1344  ;;  %1352 = vrot.lane.b32.xlu0 %v556_v24, %s5686_s15  ;;  %v7002_v52 = vmax.f32 %v3090_v26, %v3091_v28  ;;  %v588_v26 = vld [vmem:[#allocation2 + $0x208] sm:$0xff] }
 0x202   : > { %1462 = vrot.lane.b32.xlu1 %v579_v1, %s5687_s8  ;;  %v6954_v40 = vpop.permute.xlu0 %1454 }
 0x204   : > { %v1581_v43 = vpop.permute.xlu1 %1580  ;;  %1588 = vrot.lane.b32.xlu0 %v610_v11, %s5689_s16 }
 0x205   : > { %v1893_v25 = vsel %vm1878_vm11, %v1860_v38, %v1581_v43  ;;  %v5449_v9 = vpop.f32.mrb[6].mxu0 }
 0x206   : > { %5459 = vmatprep.mubr.msk.f32.mxu0 %vm1922_vm12, %v1893_v25  ;;  %v2125_v17 = vadd.f32 %v5449_v9, %v6579_v44  ;;  %v2119_v15 = vpop.f32.mrb[7].mxu0  ;;  %846 = vrot.lane.b32.xlu1 %v6906_v29, %s5681_s10  ;;  %v6985_v14 = vpop.permute.xlu0 %692  ;;  %v6999_v29 = vsel %vm1812_vm9, %v1795_v5, %v6883_v10  ;;  %s5691_s10 = smov 8  }
 0x207   : > { %v2120_v16 = vadd.f32 %v6579_v44, %v2119_v15 }
 0x208   : > { %v6987_v19 = vpop.permute.xlu1 %838  ;;  %v2399_v2 = vcombine.high %v2125_v17, %v2125_v17  ;;  %v2406_v1 = vrot.slane %v2125_v17, %v6581_v18  ;;  %972 = vrot.lane.b32.xlu0 %v556_v24, %s5683_s12  ;;  %v611_v24 = vld [vmem:[#allocation2 + $0x171] sm:$0xff] }
 0x209   : > { %8370 = vst [vmem:[#allocation9_spill] sm:$0xff] %v6987_v19  ;;  %v2382_v44 = vcombine.high %v2120_v16, %v2120_v16  ;;  %v2389_v61 = vrot.slane %v2120_v16, %v6581_v18 }
 0x20a   : > { %v2413_v4 = vrot.slane %v2399_v2, %v6581_v18  ;;  %v2414_v21 = vcombine.high %v2406_v1, %v2406_v1  ;;  %v3149_v63 = vsel %vm8344_vm15, %v2406_v1, -inf  ;;  %1354 = vrot.lane.b32.xlu1 %v557_v48, %s5686_s15  ;;  %v7010_v10 = vpop.permute.xlu0 %964 }
 0x20b   : > { %v3150_v45 = vrot.slane %v3149_v63, 4  ;;  %v2396_v22 = vrot.slane %v2382_v44, %v6581_v18  ;;  %v2397_v31 = vcombine.high %v2389_v61, %v2389_v61  ;;  %v3121_v60 = vsel %vm8344_vm15, %v2389_v61, -inf }
 0x20c   : > { %v7012_v39 = vpop.permute.xlu1 %1074  ;;  %v2415_v32 = vcombine.high %v2413_v4, %v2413_v4  ;;  %v3156_v38 = vsel %vm8344_vm15, %v2414_v21, -inf  ;;  %v3163_v43 = vsel %vm8344_vm15, %v2413_v4, -inf  ;;  %v3122_v11 = vrot.slane %v3121_v60, 4  ;;  %1480 = vrot.lane.b32.xlu0 %v588_v26, %s5687_s8 }
 0x20d   : > { %v3151_v27 = vmax.f32 %v3149_v63, %v3150_v45  ;;  %v3157_v6 = vrot.slane %v3156_v38, 4  ;;  %v3164_v7 = vrot.slane %v3163_v43, 4  ;;  %v2398_v25 = vcombine.high %v2396_v22, %v2396_v22 }
 0x20e   : > { %v3170_v51 = vsel %vm8344_vm15, %v2415_v32, -inf  ;;  %v3123_v50 = vmax.f32 %v3121_v60, %v3122_v11  ;;  %v3128_v59 = vsel %vm8344_vm15, %v2397_v31, -inf  ;;  %v3135_v41 = vsel %vm8344_vm15, %v2396_v22, -inf  ;;  %1590 = vrot.lane.b32.xlu1 %v611_v24, %s5689_s16  ;;  %v7021_v17 = vpop.permute.xlu0 %1200 }
 0x20f   : > { %v3152_v53 = vrot.slane %v3151_v27, 2  ;;  %v3158_v9 = vmax.f32 %v3156_v38, %v3157_v6  ;;  %v3165_v5 = vmax.f32 %v3163_v43, %v3164_v7  ;;  %v3171_v28 = vrot.slane %v3170_v51, 4  ;;  %v589_v7 = vld [vmem:[#allocation2 + $0x210] sm:$0xff] }
 0x210   : > { %v7023_v15 = vpop.permute.xlu1 %1346  ;;  %v3124_v16 = vrot.slane %v3123_v50, 2  ;;  %v3129_v2 = vrot.slane %v3128_v59, 4  ;;  %v3136_v1 = vrot.slane %v3135_v41, 4  ;;  %v3142_v44 = vsel %vm8344_vm15, %v2398_v25, -inf  ;;  %974 = vrot.lane.b32.xlu0 %v557_v48, %s5683_s12  ;;  %s5693_s12 = smov 32  }
 0x211   : > { %v3153_v61 = vmax.f32 %v3151_v27, %v3152_v53  ;;  %v3159_v4 = vrot.slane %v3158_v9, 2  ;;  %v3166_v21 = vrot.slane %v3165_v5, 2  ;;  %v3172_v63 = vmax.f32 %v3170_v51, %v3171_v28 }
 0x212   : > { %v3125_v45 = vmax.f32 %v3123_v50, %v3124_v16  ;;  %v3130_v22 = vmax.f32 %v3128_v59, %v3129_v2  ;;  %v3137_v31 = vmax.f32 %v3135_v41, %v3136_v1  ;;  %v3143_v60 = vrot.slane %v3142_v44, 4  ;;  %1100 = vrot.lane.b32.xlu1 %v588_v26, %s5684_s13  ;;  %v7028_v24 = vpop.permute.xlu0 %1472  ;;  %v620_v50 = vld [vmem:[#allocation2 + $0x209] sm:$0xff] }
 0x213   : > { %v3154_v32 = vrot.slane %v3153_v61, 1  ;;  %v3160_v38 = vmax.f32 %v3158_v9, %v3159_v4  ;;  %v3167_v43 = vmax.f32 %v3165_v5, %v3166_v21  ;;  %v3173_v11 = vrot.slane %v3172_v63, 2 }
 0x214   : > { %v1583_v6 = vpop.permute.xlu1 %1582  ;;  %v3126_v27 = vrot.slane %v3125_v45, 1  ;;  %v3131_v25 = vrot.slane %v3130_v22, 2  ;;  %v3138_v53 = vrot.slane %v3137_v31, 2  ;;  %v3144_v51 = vmax.f32 %v3142_v44, %v3143_v60  ;;  %1482 = vrot.lane.b32.xlu0 %v589_v7, %s5687_s8 }
 0x215   : > { %v3155_v59 = vmax.f32 %v3153_v61, %v3154_v32  ;;  %v3161_v41 = vrot.slane %v3160_v38, 1  ;;  %v3168_v28 = vrot.slane %v3167_v43, 1  ;;  %v3174_v16 = vmax.f32 %v3172_v63, %v3173_v11 }
 0x216   : > { %v3127_v48 = vmax.f32 %v3125_v45, %v3126_v27  ;;  %v3132_v2 = vmax.f32 %v3130_v22, %v3131_v25  ;;  %v3139_v9 = vmax.f32 %v3137_v31, %v3138_v53  ;;  %v3145_v5 = vrot.slane %v3144_v51, 2  ;;  %1608 = vrot.lane.b32.xlu1 %v620_v50, %s5689_s16  ;;  %v7033_v19 = vpop.permute.xlu0 %694 }
 0x217   : > { %v3162_v26 = vmax.f32 %v3160_v38, %v3161_v41  ;;  %v3169_v1 = vmax.f32 %v3167_v43, %v3168_v28  ;;  %v3175_v4 = vrot.slane %v3174_v16, 1  ;;  %v3887_v21 = vsel %vm3849_vm13, %v3155_v59, -inf }
 0x218   : > { %v7035_v44 = vpop.permute.xlu1 %820  ;;  %v3888_v61 = vmax.f32 %v6969_v3, %v3887_v21  ;;  %v3133_v63 = vrot.slane %v3132_v2, 1  ;;  %v3140_v45 = vrot.slane %v3139_v9, 1  ;;  %v3146_v22 = vmax.f32 %v3144_v51, %v3145_v5  ;;  %1102 = vrot.lane.b32.xlu0 %v589_v7, %s5684_s13 }
 0x219   : > { %v3176_v31 = vmax.f32 %v3174_v16, %v3175_v4  ;;  %v3890_v60 = vsel %vm3849_vm13, %v3162_v26, -inf  ;;  %v3893_v32 = vsel %vm3849_vm13, %v3169_v1, -inf  ;;  %v3875_v38 = vsel %vm3849_vm13, %v3127_v48, -inf }
 0x21a   : > { %v3891_v43 = vmax.f32 %v6974_v35, %v3890_v60  ;;  %v3894_v11 = vmax.f32 %v6977_v62, %v3893_v32  ;;  %v3134_v27 = vmax.f32 %v3132_v2, %v3133_v63  ;;  %v3141_v25 = vmax.f32 %v3139_v9, %v3140_v45  ;;  %1228 = vrot.lane.b32.xlu1 %v620_v50, %s5685_s14  ;;  %v7049_v41 = vpop.permute.xlu0 %966  ;;  %v621_v35 = vld [vmem:[#allocation2 + $0x211] sm:$0xff] }
 0x21b   : > { %v3877_v3 = vsel %vm3849_vm13, %v6989_v57, -inf  ;;  %v3896_v53 = vsel %vm3849_vm13, %v3176_v31, -inf  ;;  %v3147_v51 = vrot.slane %v3146_v22, 1  ;;  %v3876_v59 = vmax.f32 %v6980_v36, %v3875_v38  ;;  %v8371_v9 = vld [vmem:[#allocation11_spill] sm:$0xff] }
 0x21c   : > { %v7051_v28 = vpop.permute.xlu1 %1092  ;;  %v3880_v62 = vsel %vm3849_vm13, %v6991_v34, -inf  ;;  %v3897_v7 = vmax.f32 %v6995_v58, %v3896_v53  ;;  %v3878_v16 = vsel %vm3849_vm13, %v3134_v27, -inf  ;;  %v3881_v57 = vsel %vm3849_vm13, %v3141_v25, -inf  ;;  %1610 = vrot.lane.b32.xlu0 %v621_v35, %s5689_s16  ;;  %v8372_v34 = vld [vmem:[#allocation14_spill] sm:$0xff]  ;;  %v591_v53 = vld [vmem:[#allocation2 + $0x230] sm:$0xff] }
 0x21d   : > { %v1861_v36 = vsel %vm1845_vm10, %v6999_v29, %v6954_v40  ;;  %v3148_v48 = vmax.f32 %v3146_v22, %v3147_v51  ;;  %v3879_v50 = vmax.f32 %v3877_v3, %v3878_v16  ;;  %v3882_v2 = vmax.f32 %v3880_v62, %v3881_v57  ;;  %v590_v25 = vld [vmem:[#allocation2 + $0x228] sm:$0xff] }
 0x21e   : > { %v1705_v5 = vsel %vm1680_vm5, %v6961_v37, %v8371_v9  ;;  %v1894_v26 = vsel %vm1878_vm11, %v1861_v36, %v1583_v6  ;;  %v3883_v1 = vsel %vm3849_vm13, %v7002_v52, -inf  ;;  %vm8373_vm15 = vcmask 1041409   ;;  %1230 = vrot.lane.b32.xlu1 %v621_v35, %s5685_s14  ;;  %v7074_v29 = vpop.permute.xlu0 %1202  ;;  %v558_v6 = vld [vmem:[#allocation2 + $0x227] sm:$0xff]  ;;  %v559_v52 = vld [vmem:[#allocation2 + $0x22f] sm:$0xff] }
 0x21f   : > { %v1738_v58 = vsel %vm8366_vm6, %v1705_v5, %v8372_v34  ;;  %v3884_v4 = vsel %vm3849_vm13, %v3148_v48, -inf  ;;  %v4148_v40 = vsel %vm8373_vm15, %v3879_v50, %v3876_v59  ;;  %5460 = vmatmul.mubr.msk.f32.gmra.mrb[14].mxu0 %vm1922_vm12, %v1894_v26  ;;  %vm8374_vm15 = vcmask 1047559   ;;  %v623_v59 = vld [vmem:[#allocation2 + $0x231] sm:$0xff]  ;;  %v4222_v62 = vld [vmem:[#allocation3 + $0x8] sm:$0xff]  ;;  %v4223_v36 = vld [vmem:[#allocation3 + $0x20] sm:$0xff] }
 0x220   : > { %v7076_v37 = vpop.permute.xlu1 %1328  ;;  %v1771_v21 = vsel %vm1746_vm7, %v1738_v58, %v6797_v49  ;;  %v3885_v63 = vmax.f32 %v3883_v1, %v3884_v4  ;;  %v4149_v45 = vsel %vm4136_vm2, %v3882_v2, %v4148_v40  ;;  %1356 = vrot.lane.b32.xlu0 %v558_v6, %s5686_s15  ;;  %v8375_v16 = vld [vmem:[#allocation10_spill] sm:$0xff]  ;;  %v8376_v48 = vld [vmem:[#allocation13_spill] sm:$0xff] }
 0x221   : > { %v1804_v22 = vsel %vm1779_vm8, %v1771_v21, %v6881_v13  ;;  %v4230_v2 = vld [vmem:[#allocation3 + $0x9] sm:$0xff]  ;;  %v4231_v40 = vld [vmem:[#allocation3 + $0x21] sm:$0xff] }
 0x222   : > { %v1837_v31 = vsel %vm1812_vm9, %v1804_v22, %v6938_v23  ;;  %v4150_v60 = vsel %vm4138_vm3, %v3885_v63, %v4149_v45  ;;  %1358 = vrot.lane.b32.xlu1 %v559_v52, %s5686_s15  ;;  %v1475_v49 = vpop.permute.xlu0 %1474  ;;  %v7131_v45 = vld [vmem:[#allocation3 + $0x1f] sm:$0xff]  ;;  %s5694_s15 = smov 40  }
 0x223   : > { %v4151_v32 = vsel %vm8347_vm4, %v3888_v61, %v4150_v60  ;;  %v1870_v38 = vsel %vm1845_vm10, %v1837_v31, %v7028_v24  ;;  %8377 = vst [vmem:[#allocation8_spill] sm:$0xff] %v7131_v45  ;;  %vm8386_vm4 = vcmask 72704  }
 0x224   : > { %v1601_v27 = vpop.permute.xlu1 %1600  ;;  %v4152_v3 = vsel %vm8346_vm14, %v3891_v43, %v4151_v32  ;;  %1484 = vrot.lane.b32.xlu0 %v590_v25, %s5687_s8  ;;  %v622_v43 = vld [vmem:[#allocation2 + $0x229] sm:$0xff]  ;;  %v7156_v32 = vld [vmem:[%s8337_s2] ss:$0 sm:$0xff] }
 0x225   : > { %v1903_v13 = vsel %vm1878_vm11, %v1870_v38, %v1601_v27  ;;  %v4153_v23 = vsel %vm8345_vm1, %v3894_v11, %v4152_v3  ;;  %v8379_v3 = vld [vmem:[#allocation12_spill] sm:$0xff] }
 0x226   : > { %5474 = vmatprep.mubr.msk.f32.mxu1 %vm1922_vm12, %v1903_v13  ;;  %v4154_v51 = vsel %vm8374_vm15, %v3897_v7, %v4153_v23  ;;  %1486 = vrot.lane.b32.xlu1 %v591_v53, %s5687_s8  ;;  %v7099_v24 = vpop.permute.xlu0 %712  ;;  %v5611_v7 = vld [vmem:[#allocation2 + $0x18f] sm:$0xff]  ;;  %vm8380_vm15 = vmmov %vm8366_vm6  ;;  %s5620_s8 = sshll.u32 %s5698_s7, 4  ;;  %s5621_s8 = int_to_ptr.vmem [resolvable:$false] %s5620_s8 }
 0x227   : > { %4207 = vst.msk [vmem:[#allocation3 + $0x38] sm:$0xff] %vm3849_vm13, %v4154_v51  ;;  %v1673_v57 = vsel %vm223_vm0, %v5611_v7, %v8375_v16  ;;  %s5622_s9 = scalar_lea.vmem %s5621_s8, 512 }
 0x228   : > { %v7101_v61 = vpop.permute.xlu1 %822  ;;  %1612 = vrot.lane.b32.xlu0 %v622_v43, %s5689_s16  ;;  %v1706_v50 = vsel %vm1680_vm5, %v1673_v57, %v8376_v48 }
 0x229   : > { %v1739_v9 = vsel %vm8366_vm6, %v1706_v50, %v6795_v8  ;;  %vm8381_vm6 = vcmask 58368  }
 0x22a   : > { %1614 = vrot.lane.b32.xlu1 %v623_v59, %s5689_s16  ;;  %v7105_v11 = vpop.permute.xlu0 %948  ;;  %v1772_v34 = vsel %vm1746_vm7, %v1739_v9, %v6869_v47  ;;  %vm8383_vm1 = vmmov %vm8381_vm6 }
 0x22b   : > { %v1805_v1 = vsel %vm1779_vm8, %v1772_v34, %v6936_v33  ;;  %v352_v34 = vld [vmem:[#allocation2 + $0x10f] sm:$0xff]  ;;  %vm8384_vm14 = vmmov %vm8383_vm1 }
 0x22c   : > { %v7107_v35 = vpop.permute.xlu1 %1094  ;;  %4295 = vrot.lane.b32.xlu0 %v4222_v62, %s5691_s10  ;;  %v1838_v6 = vsel %vm1812_vm9, %v1805_v1, %v7023_v15 }
 0x22d   : > { %v1871_v8 = vsel %vm1845_vm10, %v1838_v6, %v1475_v49  ;;  %v351_v49 = vld [vmem:[#allocation2 + $0x107] sm:$0xff] }
 0x22e   : > { %4297 = vrot.lane.b32.xlu1 %v4223_v36, %s5691_s10  ;;  %v7117_v5 = vpop.permute.xlu0 %1220  ;;  %v7136_v33 = vld [vmem:[#allocation3 + $0x37] sm:$0xff]  ;;  %v1664_v13 = vsel %vm223_vm0, %v351_v49, %v8379_v3 }
 0x22f   : > { %v5452_v58 = vpop.f32.mrb[8].mxu0  ;;  %8378 = vst [vmem:[#allocation15_spill] sm:$0xff] %v7136_v33  ;;  %v7145_v22 = vld [vmem:[#allocation3 + $0x38] sm:$0xff]  ;;  %v1697_v51 = vsel %vm1680_vm5, %v1664_v13, %v6781_v55 }
 0x230   : > { %v7119_v26 = vpop.permute.xlu1 %1330  ;;  %4327 = vrot.lane.b32.xlu0 %v4230_v2, %s5692_s11  ;;  %v2129_v4 = vpop.f32.mrb[9].mxu0  ;;  %v2135_v38 = vadd.f32 %v7156_v32, %v5452_v58  ;;  %v7168_v23 = vld [vmem:[#allocation3 + $0x39] sm:$0xff]  ;;  %v1730_v43 = vsel %vm8380_vm15, %v1697_v51, %v6867_v20  ;;  %vm8382_vm15 = vmmov %vm8381_vm6 }
 0x231   : > { %v2130_v59 = vadd.f32 %v7156_v32, %v2129_v4  ;;  %v1763_v16 = vsel %vm1746_vm7, %v1730_v43, %v6922_v46 }
 0x232   : > { %4329 = vrot.lane.b32.xlu1 %v4231_v40, %s5692_s11  ;;  %v1457_v21 = vpop.permute.xlu0 %1456  ;;  %v2433_v53 = vcombine.high %v2135_v38, %v2135_v38  ;;  %v1796_v57 = vsel %vm1779_vm8, %v1763_v16, %v7021_v17 }
 0x233   : > { %v1829_v48 = vsel %vm1812_vm9, %v1796_v57, %v7076_v37  ;;  %v2416_v20 = vcombine.high %v2130_v59, %v2130_v59  ;;  %v2423_v50 = vrot.slane %v2130_v59, %v6581_v18 }
 0x234   : > { %v1603_v63 = vpop.permute.xlu1 %1602  ;;  %4359 = vrot.lane.b32.xlu0 %v7131_v45, %s5689_s16  ;;  %v2447_v55 = vrot.slane %v2433_v53, %v6581_v18  ;;  %v1862_v2 = vsel %vm1845_vm10, %v1829_v48, %v1457_v21 }
 0x235   : > { %v1904_v47 = vsel %vm1878_vm11, %v1871_v8, %v1603_v63  ;;  %v2430_v4 = vrot.slane %v2416_v20, %v6581_v18  ;;  %v1665_v8 = vsel %vm223_vm0, %v352_v34, %v6779_v0  ;;  %v3177_v21 = vsel %vm8382_vm15, %v2423_v50, -inf  ;;  %vm8387_vm15 = vmmov %vm8383_vm1 }
 0x236   : > { %5475 = vmatmul.mubr.msk.f32.gmra.mrb[4].mxu1 %vm1922_vm12, %v1904_v47  ;;  %4361 = vrot.lane.b32.xlu1 %v7136_v33, %s5689_s16  ;;  %v7140_v15 = vpop.permute.xlu0 %714  ;;  %v2449_v1 = vcombine.high %v2447_v55, %v2447_v55  ;;  %v1698_v47 = vsel %vm1680_vm5, %v1665_v8, %v6855_v56  ;;  %v3219_v49 = vsel %vm8384_vm14, %v2447_v55, -inf  ;;  %v3178_v43 = vrot.slane %v3177_v21, 4 }
 0x237   : > { %v1731_v13 = vsel %vm8386_vm4, %v1698_v47, %v6920_v30  ;;  %v2432_v51 = vcombine.high %v2430_v4, %v2430_v4  ;;  %v3220_v16 = vrot.slane %v3219_v49, 4  ;;  %vm8388_vm4 = vmmov %vm8383_vm1  ;;  %vm8389_vm14 = vcmask 72704  }
 0x238   : > { %v7142_v52 = vpop.permute.xlu1 %840  ;;  %4391 = vrot.lane.b32.xlu0 %v4223_v36, %s5693_s12  ;;  %v2440_v36 = vrot.slane %v2135_v38, %v6581_v18  ;;  %v1764_v0 = vsel %vm1746_vm7, %v1731_v13, %v7012_v39 }
 0x239   : > { %v1797_v48 = vsel %vm1779_vm8, %v1764_v0, %v7074_v29  ;;  %v361_v29 = vld [vmem:[#allocation2 + $0x1a7] sm:$0xff] }
 0x23a   : > { %4299 = vrot.lane.b32.xlu1 %v7145_v22, %s5691_s10  ;;  %v7149_v31 = vpop.permute.xlu0 %950  ;;  %v2448_v58 = vcombine.high %v2440_v36, %v2440_v36  ;;  %v3205_v37 = vsel %vm8381_vm6, %v2440_v36, -inf  ;;  %vm8385_vm6 = vmmov %vm8383_vm1  ;;  %v3191_v36 = vsel %vm8383_vm1, %v2430_v4, -inf  ;;  %v1830_v30 = vsel %vm1812_vm9, %v1797_v48, %v7119_v26 }
 0x23b   : > { %v3226_v3 = vsel %vm8385_vm6, %v2449_v1, -inf  ;;  %v3206_v53 = vrot.slane %v3205_v37, 4  ;;  %vm8391_vm6 = vmmov %vm8389_vm14 }
 0x23c   : > { %v7151_v60 = vpop.permute.xlu1 %1076  ;;  %4393 = vrot.lane.b32.xlu0 %v7145_v22, %s5693_s12  ;;  %v3212_v38 = vsel %vm8383_vm1, %v2448_v58, -inf  ;;  %v3227_v57 = vrot.slane %v3226_v3, 4  ;;  %vm8393_vm1 = vmmov %vm8391_vm6 }
 0x23d   : > { %v3213_v56 = vrot.slane %v3212_v38, 4  ;;  %v3207_v20 = vmax.f32 %v3205_v37, %v3206_v53 }
 0x23e   : > { %4423 = vrot.lane.b32.xlu1 %v4231_v40, %s5694_s15  ;;  %v7162_v27 = vpop.permute.xlu0 %1222  ;;  %v2431_v40 = vcombine.high %v2423_v50, %v2423_v50  ;;  %v3179_v50 = vmax.f32 %v3177_v21, %v3178_v43  ;;  %v3228_v8 = vmax.f32 %v3226_v3, %v3227_v57 }
 0x23f   : > { %v3214_v1 = vmax.f32 %v3212_v38, %v3213_v56  ;;  %v3208_v13 = vrot.slane %v3207_v20, 2 }
 0x240   : > { %v7164_v25 = vpop.permute.xlu1 %1348  ;;  %v3184_v59 = vsel %vm8387_vm15, %v2431_v40, -inf  ;;  %v3221_v40 = vmax.f32 %v3219_v49, %v3220_v16  ;;  %v3180_v21 = vrot.slane %v3179_v50, 2  ;;  %v3229_v43 = vrot.slane %v3228_v8, 2  ;;  %vm8392_vm15 = vmmov %vm8391_vm6 }
 0x241   : > { %v3185_v39 = vrot.slane %v3184_v59, 4  ;;  %v1674_v49 = vsel %vm223_vm0, %v361_v29, %v6853_v12  ;;  %v3209_v57 = vmax.f32 %v3207_v20, %v3208_v13 }
 0x242   : > { %4331 = vrot.lane.b32.xlu1 %v7168_v23, %s5692_s11  ;;  %v1459_v62 = vpop.permute.xlu0 %1458  ;;  %v1707_v3 = vsel %vm1680_vm5, %v1674_v49, %v6904_v54 }
 0x243   : > { %v1863_v34 = vsel %vm1845_vm10, %v1830_v30, %v1459_v62  ;;  %v3186_v26 = vmax.f32 %v3184_v59, %v3185_v39  ;;  %v3222_v62 = vrot.slane %v3221_v40, 2  ;;  %v1740_v59 = vsel %vm8389_vm14, %v1707_v3, %v7010_v10  ;;  %vm8394_vm14 = vmmov %vm8388_vm4 }
 0x244   : > { %v1585_v7 = vpop.permute.xlu1 %1584  ;;  %v1773_v39 = vsel %vm1746_vm7, %v1740_v59, %v7051_v28  ;;  %v3210_v20 = vrot.slane %v3209_v57, 1  ;;  %v353_v28 = vld [vmem:[#allocation2 + $0x127] sm:$0xff] }
 0x245   : > { %v1895_v17 = vsel %vm1878_vm11, %v1862_v2, %v1585_v7  ;;  %v3192_v2 = vrot.slane %v3191_v36, 4  ;;  %v3187_v56 = vrot.slane %v3186_v26, 2  ;;  %v1806_v54 = vsel %vm1779_vm8, %v1773_v39, %v7117_v5  ;;  %v354_v5 = vld [vmem:[#allocation2 + $0x12f] sm:$0xff] }
 0x246   : > { %4455 = vrot.lane.b32.xlu1 %v7136_v33, %s5695_s23  ;;  %v7189_v46 = vpop.permute.xlu0 %842  ;;  %5462 = vmatprep.mubr.msk.f32.mxu0 %vm1922_vm12, %v1895_v17  ;;  %v3198_v17 = vsel %vm8388_vm4, %v2432_v51, -inf  ;;  %v3215_v51 = vrot.slane %v3214_v1, 2  ;;  %v1839_v10 = vsel %vm1812_vm9, %v1806_v54, %v7164_v25 }
 0x247   : > { %v3199_v37 = vrot.slane %v3198_v17, 4  ;;  %v3193_v53 = vmax.f32 %v3191_v36, %v3192_v2  ;;  %v3181_v36 = vmax.f32 %v3179_v50, %v3180_v21  ;;  %v362_v21 = vld [vmem:[#allocation2 + $0x1af] sm:$0xff] }
 0x248   : > { %v7191_v9 = vpop.permute.xlu1 %968  ;;  %v3216_v2 = vmax.f32 %v3214_v1, %v3215_v51 }
 0x249   : > { %v3200_v16 = vmax.f32 %v3198_v17, %v3199_v37  ;;  %v3194_v48 = vrot.slane %v3193_v53, 2  ;;  %v3182_v50 = vrot.slane %v3181_v36, 1 }
 0x24a   : > { %v7197_v6 = vpop.permute.xlu0 %1078  ;;  %v3217_v1 = vrot.slane %v3216_v2, 1 }
 0x24b   : > { %v3201_v17 = vrot.slane %v3200_v16, 2  ;;  %v3195_v29 = vmax.f32 %v3193_v53, %v3194_v48  ;;  %v1675_v53 = vsel %vm223_vm0, %v362_v21, %v6902_v42  ;;  %v3183_v39 = vmax.f32 %v3181_v36, %v3182_v50 }
 0x24c   : > { %v7202_v63 = vpop.permute.xlu1 %1204 }
 0x24d   : > { %v3202_v25 = vmax.f32 %v3200_v16, %v3201_v17  ;;  %v3196_v49 = vrot.slane %v3195_v29, 1  ;;  %v1667_v16 = vsel %vm223_vm0, %v354_v5, %v7033_v19 }
 0x24e   : > { %v7214_v7 = vpop.permute.xlu0 %1350 }
 0x24f   : > { %v3197_v19 = vmax.f32 %v3195_v29, %v3196_v49 }
 0x250   : > { %v1477_v55 = vpop.permute.xlu1 %1476 }
 0x251   : > { %v1872_v37 = vsel %vm1845_vm10, %v1839_v10, %v1477_v55  ;;  %v1666_v55 = vsel %vm223_vm0, %v353_v28, %v6985_v14  ;;  %v8390_v10 = vld [vmem:[#allocation9_spill] sm:$0xff] }
 0x252   : > { %v1587_v58 = vpop.permute.xlu0 %1586  ;;  %v1699_v42 = vsel %vm1680_vm5, %v1666_v55, %v7035_v44 }
 0x253   : > { %v1896_v4 = vsel %vm1878_vm11, %v1863_v34, %v1587_v58  ;;  %v3223_v34 = vmax.f32 %v3221_v40, %v3222_v62  ;;  %v3230_v58 = vmax.f32 %v3228_v8, %v3229_v43  ;;  %v3211_v43 = vmax.f32 %v3209_v57, %v3210_v20 }
 0x254   : > { %v7224_v47 = vpop.permute.xlu1 %970  ;;  %5463 = vmatmul.mubr.msk.f32.gmra.mrb[16].mxu0 %vm1922_vm12, %v1896_v4  ;;  %v3188_v4 = vmax.f32 %v3186_v26, %v3187_v56  ;;  %v3218_v56 = vmax.f32 %v3216_v2, %v3217_v1  ;;  %v1700_v57 = vsel %vm1680_vm5, %v1667_v16, %v7101_v61  ;;  %v1732_v36 = vsel %vm8392_vm15, %v1699_v42, %v7105_v11  ;;  %vm8396_vm15 = vmmov %vm8388_vm4 }
 0x255   : > { %v3224_v40 = vrot.slane %v3223_v34, 1  ;;  %v3231_v8 = vrot.slane %v3230_v58, 1  ;;  %v7273_v17 = vsel %vm3849_vm13, %v3211_v43, -inf  ;;  %v7287_v11 = vsel %vm3849_vm13, %v3183_v39, -inf }
 0x256   : > { %v7227_v0 = vpop.permute.xlu0 %1096  ;;  %v3189_v26 = vrot.slane %v3188_v4, 1  ;;  %v7278_v44 = vsel %vm3849_vm13, %v3218_v56, -inf  ;;  %v1733_v50 = vsel %vm8393_vm1, %v1700_v57, %v7149_v31  ;;  %v1765_v29 = vsel %vm1746_vm7, %v1732_v36, %v7151_v60  ;;  %vm8397_vm1 = vmmov %vm8388_vm4 }
 0x257   : > { %v3225_v59 = vmax.f32 %v3223_v34, %v3224_v40  ;;  %v3232_v48 = vmax.f32 %v3230_v58, %v3231_v8  ;;  %v3203_v34 = vrot.slane %v3202_v25, 1  ;;  %v7307_v31 = vsel %vm3849_vm13, %v3197_v19, -inf }
 0x258   : > { %v7229_v38 = vpop.permute.xlu1 %1206  ;;  %v3190_v2 = vmax.f32 %v3188_v4, %v3189_v26  ;;  %v7321_v49 = vsel %vm1779_vm8, %v1765_v29, %v7202_v63 }
 0x259   : > { %v7284_v61 = vsel %vm3849_vm13, %v3232_v48, -inf  ;;  %v7298_v1 = vmax.f32 %v3202_v25, %v3203_v34  ;;  %v7313_v25 = vsel %vm1746_vm7, %v1733_v50, %v7197_v6 }
 0x25a   : > { %v7237_v30 = vpop.permute.xlu0 %1332  ;;  %v7301_v40 = vsel %vm3849_vm13, %v3190_v2, -inf }
 0x25c   : > { %v1479_v12 = vpop.permute.xlu1 %1478 }
 0x25e   : > { %v1605_v13 = vpop.permute.xlu0 %1604 }
 0x25f   : > { %v1905_v51 = vsel %vm1878_vm11, %v1872_v37, %v1605_v13  ;;  %v1708_v37 = vsel %vm1680_vm5, %v1675_v53, %v8390_v10 }
 0x260   : > { %v7247_v62 = vpop.permute.xlu1 %716  ;;  %5477 = vmatprep.mubr.msk.f32.mxu1 %vm1922_vm12, %v1905_v51  ;;  %v1741_v14 = vsel %vm8391_vm6, %v1708_v37, %v7049_v41  ;;  %v7281_v41 = vsel %vm3849_vm13, %v3225_v59, -inf  ;;  %vm8395_vm6 = vmmov %vm8388_vm4 }
 0x261   : > { %v1774_v58 = vsel %vm1746_vm7, %v1741_v14, %v7107_v35 }
 0x262   : > { %v7254_v3 = vpop.permute.xlu0 %1098  ;;  %v1807_v13 = vsel %vm1779_vm8, %v1774_v58, %v7162_v27 }
 0x263   : > { %v1840_v8 = vsel %vm1812_vm9, %v1807_v13, %v7214_v7 }
 0x264   : > { %v7256_v54 = vpop.permute.xlu1 %1224  ;;  %v1873_v60 = vsel %vm1845_vm10, %v1840_v8, %v1479_v12 }
 0x266   : > { %v7275_v20 = vpop.permute.xlu0 %1334 }
 0x268   : > { %v7289_v4 = vpop.permute.xlu1 %1460 }
 0x269   : > { %v5455_v35 = vpop.f32.mrb[10].mxu0 }
 0x26a   : > { %v2145_v21 = vadd.f32 %v7156_v32, %v5455_v35  ;;  %v2139_v28 = vpop.f32.mrb[11].mxu0  ;;  %v1607_v26 = vpop.permute.xlu0 %1606 }
 0x26b   : > { %v2140_v51 = vadd.f32 %v7156_v32, %v2139_v28  ;;  %v1906_v7 = vsel %vm1878_vm11, %v1873_v60, %v1607_v26 }
 0x26c   : > { %v2467_v5 = vcombine.high %v2145_v21, %v2145_v21  ;;  %v2474_v27 = vrot.slane %v2145_v21, %v6581_v18  ;;  %v7317_v43 = vpop.permute.xlu1 %718  ;;  %5478 = vmatmul.mubr.msk.f32.gmra.mrb[6].mxu1 %vm1922_vm12, %v1906_v7 }
 0x26d   : > { %v2450_v53 = vcombine.high %v2140_v51, %v2140_v51  ;;  %v2457_v55 = vrot.slane %v2140_v51, %v6581_v18 }
 0x26e   : > { %v2481_v12 = vrot.slane %v2467_v5, %v6581_v18  ;;  %v2482_v56 = vcombine.high %v2474_v27, %v2474_v27  ;;  %v3261_v59 = vsel %vm8388_vm4, %v2474_v27, -inf  ;;  %v7330_v14 = vpop.permute.xlu0 %844  ;;  %vm8398_vm4 = vmmov %vm8397_vm1 }
 0x26f   : > { %v3262_v6 = vrot.slane %v3261_v59, 4  ;;  %v2464_v48 = vrot.slane %v2450_v53, %v6581_v18  ;;  %v2465_v39 = vcombine.high %v2457_v55, %v2457_v55  ;;  %v3233_v10 = vsel %vm8394_vm14, %v2457_v55, -inf  ;;  %vm8399_vm14 = vmmov %vm8397_vm1 }
 0x270   : > { %v2483_v37 = vcombine.high %v2481_v12, %v2481_v12  ;;  %v3268_v16 = vsel %vm8395_vm6, %v2482_v56, -inf  ;;  %v3275_v42 = vsel %vm8396_vm15, %v2481_v12, -inf  ;;  %v3234_v63 = vrot.slane %v3233_v10, 4  ;;  %v7332_v58 = vpop.permute.xlu1 %1226  ;;  %vm8400_vm6 = vmmov %vm8397_vm1 }
 0x271   : > { %v3263_v57 = vmax.f32 %v3261_v59, %v3262_v6  ;;  %v3269_v2 = vrot.slane %v3268_v16, 4  ;;  %v3276_v34 = vrot.slane %v3275_v42, 4  ;;  %v2466_v36 = vcombine.high %v2464_v48, %v2464_v48 }
 0x272   : > { %v3282_v19 = vsel %vm8397_vm1, %v2483_v37, -inf  ;;  %v3235_v35 = vmax.f32 %v3233_v10, %v3234_v63  ;;  %v3240_v50 = vsel %vm8398_vm4, %v2465_v39, -inf  ;;  %v3247_v29 = vsel %vm8399_vm14, %v2464_v48, -inf  ;;  %v7338_v26 = vpop.permute.xlu0 %1352 }
 0x273   : > { %v3264_v13 = vrot.slane %v3263_v57, 2  ;;  %v3270_v21 = vmax.f32 %v3268_v16, %v3269_v2  ;;  %v3277_v28 = vmax.f32 %v3275_v42, %v3276_v34  ;;  %v3283_v8 = vrot.slane %v3282_v19, 4 }
 0x274   : > { %v3236_v51 = vrot.slane %v3235_v35, 2  ;;  %v3241_v60 = vrot.slane %v3240_v50, 4  ;;  %v3248_v5 = vrot.slane %v3247_v29, 4  ;;  %v3254_v27 = vsel %vm8400_vm6, %v2466_v36, -inf  ;;  %v7340_v56 = vpop.permute.xlu1 %1462 }
 0x275   : > { %v3265_v53 = vmax.f32 %v3263_v57, %v3264_v13  ;;  %v3271_v55 = vrot.slane %v3270_v21, 2  ;;  %v3278_v7 = vrot.slane %v3277_v28, 2  ;;  %v3284_v12 = vmax.f32 %v3282_v19, %v3283_v8 }
 0x276   : > { %v3237_v59 = vmax.f32 %v3235_v35, %v3236_v51  ;;  %v3242_v6 = vmax.f32 %v3240_v50, %v3241_v60  ;;  %v3249_v48 = vmax.f32 %v3247_v29, %v3248_v5  ;;  %v3255_v39 = vrot.slane %v3254_v27, 4  ;;  %v1589_v33 = vpop.permute.xlu0 %1588 }
 0x277   : > { %v3266_v10 = vrot.slane %v3265_v53, 1  ;;  %v3272_v37 = vmax.f32 %v3270_v21, %v3271_v55  ;;  %v3279_v16 = vmax.f32 %v3277_v28, %v3278_v7  ;;  %v3285_v42 = vrot.slane %v3284_v12, 2 }
 0x278   : > { %v3238_v63 = vrot.slane %v3237_v59, 1  ;;  %v3243_v2 = vrot.slane %v3242_v6, 2  ;;  %v3250_v34 = vrot.slane %v3249_v48, 2  ;;  %v3256_v36 = vmax.f32 %v3254_v27, %v3255_v39  ;;  %v7342_v19 = vpop.permute.xlu1 %846 }
 0x279   : > { %v3267_v18 = vmax.f32 %v3265_v53, %v3266_v10  ;;  %v3273_v57 = vrot.slane %v3272_v37, 1  ;;  %v3280_v13 = vrot.slane %v3279_v16, 1  ;;  %v3286_v45 = vmax.f32 %v3284_v12, %v3285_v42 }
 0x27a   : > { %v3239_v8 = vmax.f32 %v3237_v59, %v3238_v63  ;;  %v3244_v35 = vmax.f32 %v3242_v6, %v3243_v2  ;;  %v3251_v50 = vmax.f32 %v3249_v48, %v3250_v34  ;;  %v3257_v29 = vrot.slane %v3256_v36, 2  ;;  %v7346_v53 = vpop.permute.xlu0 %972 }
 0x27b   : > { %v3274_v51 = vmax.f32 %v3272_v37, %v3273_v57  ;;  %v3281_v60 = vmax.f32 %v3279_v16, %v3280_v13  ;;  %v3287_v21 = vrot.slane %v3286_v45, 1  ;;  %v3911_v28 = vsel %vm3849_vm13, %v3267_v18, -inf }
 0x27c   : > { %v3912_v5 = vmax.f32 %v7273_v17, %v3911_v28  ;;  %v3245_v55 = vrot.slane %v3244_v35, 1  ;;  %v3252_v27 = vrot.slane %v3251_v50, 1  ;;  %v3258_v7 = vmax.f32 %v3256_v36, %v3257_v29  ;;  %v1355_v48 = vpop.permute.xlu1 %1354  ;;  %v363_v17 = vld [vmem:[#allocation2 + $0x1c7] sm:$0xff] }
 0x27d   : > { %v3288_v39 = vmax.f32 %v3286_v45, %v3287_v21  ;;  %v3914_v12 = vsel %vm3849_vm13, %v3274_v51, -inf  ;;  %v3917_v59 = vsel %vm3849_vm13, %v3281_v60, -inf  ;;  %v3899_v6 = vsel %vm3849_vm13, %v3239_v8, -inf  ;;  %v364_v21 = vld [vmem:[#allocation2 + $0x1cf] sm:$0xff] }
 0x27e   : > { %v3915_v10 = vmax.f32 %v7278_v44, %v3914_v12  ;;  %v3918_v37 = vmax.f32 %v7281_v41, %v3917_v59  ;;  %v3246_v18 = vmax.f32 %v3244_v35, %v3245_v55  ;;  %v3253_v16 = vmax.f32 %v3251_v50, %v3252_v27  ;;  %v1481_v57 = vpop.permute.xlu0 %1480 }
 0x27f   : > { %v1799_v42 = vsel %vm1779_vm8, %v7313_v25, %v7229_v38  ;;  %v3920_v45 = vsel %vm3849_vm13, %v3288_v39, -inf  ;;  %v3259_v63 = vrot.slane %v3258_v7, 1  ;;  %v3900_v2 = vmax.f32 %v7287_v11, %v3899_v6 }
 0x280   : > { %v1831_v34 = vsel %vm1812_vm9, %v7321_v49, %v7237_v30  ;;  %v3921_v44 = vmax.f32 %v7284_v61, %v3920_v45  ;;  %v3902_v41 = vsel %vm3849_vm13, %v3246_v18, -inf  ;;  %v3905_v36 = vsel %vm3849_vm13, %v3253_v16, -inf  ;;  %v1591_v11 = vpop.permute.xlu1 %1590 }
 0x281   : > { %v1864_v13 = vsel %vm1845_vm10, %v1831_v34, %v7289_v4  ;;  %v3260_v38 = vmax.f32 %v3258_v7, %v3259_v63  ;;  %v3903_v25 = vmax.f32 %v7301_v40, %v3902_v41  ;;  %v3906_v8 = vmax.f32 %v7307_v31, %v3905_v36  ;;  %v366_v41 = vld [vmem:[#allocation2 + $0x1ef] sm:$0xff] }
 0x282   : > { %v1676_v35 = vsel %vm223_vm0, %v363_v17, %v7099_v24  ;;  %v1832_v30 = vsel %vm1812_vm9, %v1799_v42, %v7275_v20  ;;  %v1897_v61 = vsel %vm1878_vm11, %v1864_v13, %v1589_v33  ;;  %v3907_v49 = vsel %vm3849_vm13, %v7298_v1, -inf  ;;  %v975_v29 = vpop.permute.xlu0 %974 }
 0x283   : > { %v3908_v50 = vsel %vm3849_vm13, %v3260_v38, -inf  ;;  %vm8401_vm15 = vcmask 1041409   ;;  %v1865_v40 = vsel %vm1845_vm10, %v1832_v30, %v7340_v56  ;;  %5465 = vmatprep.mubr.msk.f32.mxu0 %vm1922_vm12, %v1897_v61  ;;  %v1709_v24 = vsel %vm1680_vm5, %v1676_v35, %v7142_v52 }
 0x284   : > { %v4155_v4 = vsel %vm8401_vm15, %v3903_v25, %v3900_v2  ;;  %v3909_v31 = vmax.f32 %v3907_v49, %v3908_v50  ;;  %v1898_v33 = vsel %vm1878_vm11, %v1865_v40, %v1591_v11  ;;  %vm8402_vm1 = vcmask 72704   ;;  %v1101_v51 = vpop.permute.xlu1 %1100 }
 0x285   : > { %v4156_v20 = vsel %vm4136_vm2, %v3906_v8, %v4155_v4  ;;  %v1742_v1 = vsel %vm8402_vm1, %v1709_v24, %v7191_v9  ;;  %5466 = vmatmul.mubr.msk.f32.gmra.mrb[18].mxu0 %vm1922_vm12, %v1898_v33  ;;  %vm8403_vm4 = vcmask 1044484   ;;  %vm8404_vm14 = vcmask 1045509  }
 0x286   : > { %v1775_v56 = vsel %vm1746_vm7, %v1742_v1, %v7227_v0  ;;  %v4157_v60 = vsel %vm4138_vm3, %v3909_v31, %v4156_v20  ;;  %v1483_v9 = vpop.permute.xlu0 %1482  ;;  %vm8405_vm6 = vcmask 1046534   ;;  %v1677_v0 = vsel %vm223_vm0, %v364_v21, %v7140_v15  ;;  %v8409_v31 = vld [vmem:[#allocation8_spill] sm:$0xff] }
 0x287   : > { %v1808_v52 = vsel %vm1779_vm8, %v1775_v56, %v7256_v54  ;;  %v4158_v28 = vsel %vm8403_vm4, %v3912_v5, %v4157_v60  ;;  %vm8406_vm15 = vcmask 1047559   ;;  %v1710_v5 = vsel %vm1680_vm5, %v1677_v0, %v7189_v46  ;;  %vm8407_vm4 = vmmov %vm8402_vm1  ;;  %v8410_v60 = vld [vmem:[#allocation7_spill] sm:$0xff] }
 0x288   : > { %v4159_v55 = vsel %vm8404_vm14, %v3915_v10, %v4158_v28  ;;  %v1841_v27 = vsel %vm1812_vm9, %v1808_v52, %v7338_v26  ;;  %v1609_v12 = vpop.permute.xlu1 %1608  ;;  %v1743_v26 = vsel %vm8402_vm1, %v1710_v5, %v7224_v47  ;;  %vm8408_vm14 = vmmov %vm8402_vm1 }
 0x289   : > { %v4160_v7 = vsel %vm8405_vm6, %v3918_v37, %v4159_v55  ;;  %v1874_v39 = vsel %vm1845_vm10, %v1841_v27, %v1481_v57  ;;  %v1776_v10 = vsel %vm1746_vm7, %v1743_v26, %v7254_v3 }
 0x28a   : > { %v4161_v59 = vsel %vm8406_vm15, %v3921_v44, %v4160_v7  ;;  %v1907_v54 = vsel %vm1878_vm11, %v1874_v39, %v1609_v12  ;;  %v1103_v6 = vpop.permute.xlu0 %1102  ;;  %v1809_v15 = vsel %vm1779_vm8, %v1776_v10, %v7332_v58  ;;  %v365_v44 = vld [vmem:[#allocation2 + $0x1e7] sm:$0xff] }
 0x28b   : > { %4208 = vst.msk [vmem:[#allocation3 + $0x50] sm:$0xff] %vm3849_vm13, %v4161_v59  ;;  %5480 = vmatprep.mubr.msk.f32.mxu1 %vm1922_vm12, %v1907_v54  ;;  %v1842_v18 = vsel %vm1812_vm9, %v1809_v15, %v1355_v48  ;;  %v1678_v13 = vsel %vm223_vm0, %v365_v44, %v7247_v62 }
 0x28c   : > { %v1229_v37 = vpop.permute.xlu1 %1228  ;;  %v1875_v16 = vsel %vm1845_vm10, %v1842_v18, %v1483_v9  ;;  %v5470_v46 = vpop.f32.mrb[0].mxu1  ;;  %v1711_v38 = vsel %vm1680_vm5, %v1678_v13, %v7330_v14 }
 0x28d   : > { %v2189_v42 = vpop.f32.mrb[1].mxu1  ;;  %v1744_v8 = vsel %vm8407_vm4, %v1711_v38, %v7346_v53  ;;  %v2195_v49 = vadd.f32 %v7156_v32, %v5470_v46 }
 0x28e   : > { %v1611_v17 = vpop.permute.xlu0 %1610  ;;  %v1777_v35 = vsel %vm1746_vm7, %v1744_v8, %v1101_v51 }
 0x28f   : > { %v1908_v45 = vsel %vm1878_vm11, %v1875_v16, %v1611_v17  ;;  %v2637_v33 = vcombine.high %v2195_v49, %v2195_v49  ;;  %v2644_v21 = vrot.slane %v2195_v49, %v8410_v60  ;;  %v8417_v17 = vld [vmem:[#allocation15_spill] sm:$0xff] }
 0x290   : > { %v1231_v63 = vpop.permute.xlu1 %1230  ;;  %5481 = vmatmul.mubr.msk.f32.gmra.mrb[8].mxu1 %vm1922_vm12, %v1908_v45 }
 0x291   : > { %v2651_v52 = vrot.slane %v2637_v33, %v8410_v60  ;;  %v2652_v9 = vcombine.high %v2644_v21, %v2644_v21 }
 0x292   : > { %v7415_v2 = vld [vmem:[#allocation3 + $0x50] sm:$0xff]  ;;  %v1357_v58 = vpop.permute.xlu0 %1356 }
 0x293   : > { %v7417_v47 = vld [vmem:[#allocation3 + $0x4f] sm:$0xff]  ;;  %4301 = vrot.lane.b32.xlu0 %v7415_v2, %s5691_s10  ;;  %v2653_v39 = vcombine.high %v2651_v52, %v2651_v52 }
 0x294   : > { %4363 = vrot.lane.b32.xlu1 %v7417_v47, %s5689_s16  ;;  %v1359_v3 = vpop.permute.xlu1 %1358  ;;  %v7428_v34 = vld [vmem:[#allocation3 + $0x51] sm:$0xff] }
 0x296   : > { %v1485_v36 = vpop.permute.xlu0 %1484 }
 0x297   : > { %4425 = vrot.lane.b32.xlu0 %v7168_v23, %s5694_s15 }
 0x298   : > { %4487 = vrot.lane.b32.xlu1 %v7145_v22, %s5696_s25  ;;  %v1487_v48 = vpop.permute.xlu1 %1486  ;;  %v1679_v22 = vsel %vm223_vm0, %v366_v41, %v7317_v43  ;;  %vm8352_vm0 = vcmask 130048  }
 0x299   : > { %v1712_v25 = vsel %vm1680_vm5, %v1679_v22, %v7342_v19  ;;  %vm8411_vm5 = vcmask 58368  }
 0x29a   : > { %v1745_v11 = vsel %vm8408_vm14, %v1712_v25, %v975_v29  ;;  %v1613_v61 = vpop.permute.xlu0 %1612  ;;  %v2190_v29 = vadd.f32 %v7156_v32, %v2189_v42  ;;  %v3541_v7 = vsel %vm8411_vm5, %v2644_v21, -inf  ;;  %vm8418_vm6 = vmmov %vm8411_vm5 }
 0x29b   : > { %4333 = vrot.lane.b32.xlu0 %v7428_v34, %s5692_s11  ;;  %v1778_v30 = vsel %vm1746_vm7, %v1745_v11, %v1103_v6  ;;  %vm8412_vm7 = vmmov %vm8411_vm5  ;;  %v3542_v5 = vrot.slane %v3541_v7, 4 }
 0x29c   : > { %4395 = vrot.lane.b32.xlu1 %v7415_v2, %s5693_s12  ;;  %v1615_v57 = vpop.permute.xlu1 %1614  ;;  %v1811_v43 = vsel %vm1779_vm8, %v1778_v30, %v1231_v63  ;;  %v2620_v28 = vcombine.high %v2190_v29, %v2190_v29  ;;  %v2627_v55 = vrot.slane %v2190_v29, %v8410_v60  ;;  %vm8419_vm15 = vmmov %vm8411_vm5 }
 0x29d   : > { %v1844_v19 = vsel %vm1812_vm9, %v1811_v43, %v1359_v3  ;;  %v3543_v63 = vmax.f32 %v3541_v7, %v3542_v5  ;;  %vm8420_vm1 = vmmov %vm8411_vm5 }
 0x29e   : > { %v1877_v4 = vsel %vm1845_vm10, %v1844_v19, %v1487_v48  ;;  %v2634_v12 = vrot.slane %v2620_v28, %v8410_v60  ;;  %v2635_v0 = vcombine.high %v2627_v55, %v2627_v55  ;;  %v3513_v59 = vsel %vm8412_vm7, %v2627_v55, -inf  ;;  %vm8421_vm4 = vmmov %vm8420_vm1 }
 0x29f   : > { %4457 = vrot.lane.b32.xlu0 %v7417_v47, %s5695_s23  ;;  %v1910_v24 = vsel %vm1878_vm11, %v1877_v4, %v1615_v57  ;;  %v3514_v15 = vrot.slane %v3513_v59, 4  ;;  %v3544_v38 = vrot.slane %v3543_v63, 2  ;;  %vm8422_vm14 = vmmov %vm8420_vm1 }
 0x2a0   : > { %4519 = vrot.lane.b32.xlu1 %v7168_v23, %s5697_s26  ;;  %v4298_v62 = vpop.permute.xlu1 %4297  ;;  %v1810_v23 = vsel %vm1779_vm8, %v1777_v35, %v1229_v37  ;;  %vm8413_vm8 = vmmov %vm8411_vm5  ;;  %v2636_v16 = vcombine.high %v2634_v12, %v2634_v12 }
 0x2a1   : > { %v1843_v14 = vsel %vm1812_vm9, %v1810_v23, %v1357_v58  ;;  %v4544_v20 = vsel %vm3849_vm13, %v8409_v31, %v4298_v62  ;;  %v3548_v6 = vsel %vm8413_vm8, %v2652_v9, -inf  ;;  %vm8414_vm9 = vmmov %vm8411_vm5  ;;  %v3527_v58 = vsel %vm8418_vm6, %v2634_v12, -inf }
 0x2a2   : > { %v1876_v53 = vsel %vm1845_vm10, %v1843_v14, %v1485_v36  ;;  %v3555_v37 = vsel %vm8414_vm9, %v2651_v52, -inf  ;;  %vm8415_vm10 = vmmov %vm8411_vm5  ;;  %v3549_v3 = vrot.slane %v3548_v6, 4  ;;  %v3515_v57 = vmax.f32 %v3513_v59, %v3514_v15 }
 0x2a3   : > { %v1909_v40 = vsel %vm1878_vm11, %v1876_v53, %v1613_v61  ;;  %v3562_v18 = vsel %vm8415_vm10, %v2653_v39, -inf  ;;  %v3556_v44 = vrot.slane %v3555_v37, 4  ;;  %v3528_v13 = vrot.slane %v3527_v58, 4  ;;  %vm8424_vm7 = vmmov %vm8420_vm1 }
 0x2a4   : > { %v4330_v50 = vpop.permute.xlu1 %4329  ;;  %5483 = vmatprep.mubr.msk.f32.mxu1 %vm1922_vm12, %v1909_v40  ;;  %v3563_v41 = vrot.slane %v3562_v18, 4  ;;  %v3534_v22 = vsel %vm8419_vm15, %v2636_v16, -inf  ;;  %v3550_v25 = vmax.f32 %v3548_v6, %v3549_v3  ;;  %v3516_v61 = vrot.slane %v3515_v57, 2  ;;  %vm8425_vm8 = vmmov %vm8420_vm1 }
 0x2a5   : > { %5484 = vmatmul.mubr.msk.f32.gmra.mrb[10].mxu1 %vm1922_vm12, %v1910_v24  ;;  %v4553_v1 = vsel %vm8352_vm0, %v4544_v20, %v4330_v50  ;;  %vm8416_vm12 = vmmov %vm8411_vm5  ;;  %v3557_v62 = vmax.f32 %v3555_v37, %v3556_v44  ;;  %v3535_v30 = vrot.slane %v3534_v22, 4  ;;  %v3529_v43 = vmax.f32 %v3527_v58, %v3528_v13 }
 0x2a6   : > { %v3520_v46 = vsel %vm8416_vm12, %v2635_v0, -inf  ;;  %v3564_v11 = vmax.f32 %v3562_v18, %v3563_v41  ;;  %v3545_v14 = vmax.f32 %v3543_v63, %v3544_v38  ;;  %v3551_v49 = vrot.slane %v3550_v25, 2  ;;  %vm8423_vm5 = vmmov %vm8420_vm1 }
 0x2a7   : > { %v3521_v36 = vrot.slane %v3520_v46, 4  ;;  %v3558_v53 = vrot.slane %v3557_v62, 2  ;;  %v3536_v24 = vmax.f32 %v3534_v22, %v3535_v30  ;;  %v3517_v20 = vmax.f32 %v3515_v57, %v3516_v61  ;;  %vm8426_vm9 = vmmov %vm8420_vm1 }
 0x2a8   : > { %v4362_v51 = vpop.permute.xlu1 %4361  ;;  %v3565_v4 = vrot.slane %v3564_v11, 2  ;;  %v3530_v33 = vrot.slane %v3529_v43, 2  ;;  %v3546_v29 = vrot.slane %v3545_v14, 1  ;;  %vm8427_vm10 = vmmov %vm8420_vm1 }
 0x2a9   : > { %v7467_v56 = vsel %vm1878_vm11, %v4553_v1, %v4362_v51  ;;  %v3522_v35 = vmax.f32 %v3520_v46, %v3521_v36  ;;  %v3552_v1 = vmax.f32 %v3550_v25, %v3551_v49  ;;  %v3559_v21 = vmax.f32 %v3557_v62, %v3558_v53  ;;  %vm8428_vm12 = vmmov %vm8420_vm1 }
 0x2aa   : > { %v3566_v55 = vmax.f32 %v3564_v11, %v3565_v4  ;;  %v3537_v9 = vrot.slane %v3536_v24, 2  ;;  %v3518_v39 = vrot.slane %v3517_v20, 1  ;;  %v3531_v12 = vmax.f32 %v3529_v43, %v3530_v33  ;;  %vm8429_vm6 = vmmov %vm8420_vm1 }
 0x2ab   : > { %v3523_v40 = vrot.slane %v3522_v35, 2  ;;  %v3547_v59 = vmax.f32 %v3545_v14, %v3546_v29  ;;  %v3553_v5 = vrot.slane %v3552_v1, 1  ;;  %vm8430_vm15 = vmmov %vm8420_vm1 }
 0x2ac   : > { %v4300_v27 = vpop.permute.xlu1 %4299  ;;  %v3567_v16 = vrot.slane %v3566_v55, 1  ;;  %v3532_v63 = vrot.slane %v3531_v12, 1 }
 0x2ad   : > { %v4545_v42 = vsel %vm3849_vm13, %v8417_v17, %v4300_v27  ;;  %v3524_v27 = vmax.f32 %v3522_v35, %v3523_v40  ;;  %v3538_v17 = vmax.f32 %v3536_v24, %v3537_v9  ;;  %v3554_v57 = vmax.f32 %v3552_v1, %v3553_v5 }
 0x2ae   : > { %v7500_v22 = vsel %vm3849_vm13, %v3547_v59, -inf  ;;  %v3568_v25 = vmax.f32 %v3566_v55, %v3567_v16  ;;  %v3533_v35 = vmax.f32 %v3531_v12, %v3532_v63 }
 0x2af   : > { %v3525_v46 = vrot.slane %v3524_v27, 1  ;;  %v3539_v62 = vrot.slane %v3538_v17, 1  ;;  %v7512_v53 = vsel %vm3849_vm13, %v3554_v57, -inf }
 0x2b0   : > { %v7475_v54 = vpop.permute.xlu1 %4423  ;;  %v7518_v24 = vsel %vm3849_vm13, %v3568_v25, -inf  ;;  %v7526_v1 = vsel %vm3849_vm13, %v3533_v35, -inf }
 0x2b2   : > { %v5458_v26 = vpop.f32.mrb[12].mxu0 }
 0x2b3   : > { %v2149_v10 = vpop.f32.mrb[13].mxu0  ;;  %v2155_v8 = vadd.f32 %v7156_v32, %v5458_v26 }
 0x2b4   : > { %v4332_v45 = vpop.permute.xlu1 %4331  ;;  %v2150_v23 = vadd.f32 %v7156_v32, %v2149_v10  ;;  %v3560_v10 = vrot.slane %v3559_v21, 1 }
 0x2b5   : > { %v7485_v48 = vsel %vm8352_vm0, %v4545_v42, %v4332_v45  ;;  %v2501_v19 = vcombine.high %v2155_v8, %v2155_v8  ;;  %v2508_v50 = vrot.slane %v2155_v8, %v8410_v60  ;;  %v3519_v45 = vmax.f32 %v3517_v20, %v3518_v39 }
 0x2b6   : > { %v2491_v31 = vrot.slane %v2150_v23, %v8410_v60  ;;  %v2484_v0 = vcombine.high %v2150_v23, %v2150_v23  ;;  %v3561_v13 = vmax.f32 %v3559_v21, %v3560_v10  ;;  %v3526_v8 = vmax.f32 %v3524_v27, %v3525_v46 }
 0x2b7   : > { %v2515_v51 = vrot.slane %v2501_v19, %v8410_v60  ;;  %v2516_v52 = vcombine.high %v2508_v50, %v2508_v50  ;;  %v3317_v28 = vsel %vm8420_vm1, %v2508_v50, -inf  ;;  %v7505_v43 = vsel %vm3849_vm13, %v3519_v45, -inf }
 0x2b8   : > { %v3289_v7 = vsel %vm8421_vm4, %v2491_v31, -inf  ;;  %v3318_v6 = vrot.slane %v3317_v28, 4  ;;  %v2499_v42 = vcombine.high %v2491_v31, %v2491_v31  ;;  %v2498_v3 = vrot.slane %v2484_v0, %v8410_v60  ;;  %vm8431_vm4 = vmmov %vm8420_vm1 }
 0x2b9   : > { %v2517_v26 = vcombine.high %v2515_v51, %v2515_v51  ;;  %v3324_v37 = vsel %vm8422_vm14, %v2516_v52, -inf  ;;  %v3331_v15 = vsel %vm8423_vm5, %v2515_v51, -inf  ;;  %v3290_v18 = vrot.slane %v3289_v7, 4  ;;  %vm8432_vm14 = vmmov %vm8420_vm1 }
 0x2ba   : > { %v3319_v58 = vmax.f32 %v3317_v28, %v3318_v6  ;;  %v3325_v44 = vrot.slane %v3324_v37, 4  ;;  %v3332_v41 = vrot.slane %v3331_v15, 4  ;;  %v3296_v11 = vsel %vm8425_vm8, %v2499_v42, -inf  ;;  %vm8433_vm5 = vmmov %vm8420_vm1 }
 0x2bb   : > { %v3338_v36 = vsel %vm8424_vm7, %v2517_v26, -inf  ;;  %v3291_v38 = vmax.f32 %v3289_v7, %v3290_v18  ;;  %v2500_v23 = vcombine.high %v2498_v3, %v2498_v3  ;;  %v3303_v61 = vsel %vm8426_vm9, %v2498_v3, -inf  ;;  %vm8434_vm7 = vmmov %vm8420_vm1 }
 0x2bc   : > { %v3339_v30 = vrot.slane %v3338_v36, 4  ;;  %v3320_v14 = vrot.slane %v3319_v58, 2  ;;  %v7507_v49 = vmax.f32 %v3324_v37, %v3325_v44  ;;  %v7509_v19 = vmax.f32 %v3331_v15, %v3332_v41 }
 0x2bd   : > { %v7515_v50 = vsel %vm3849_vm13, %v3561_v13, -inf  ;;  %v3292_v4 = vrot.slane %v3291_v38, 2  ;;  %v3297_v40 = vrot.slane %v3296_v11, 4  ;;  %v7520_v31 = vmax.f32 %v3538_v17, %v3539_v62 }
 0x2be   : > { %v7523_v20 = vsel %vm3849_vm13, %v3526_v8, -inf  ;;  %v3304_v33 = vrot.slane %v3303_v61, 4  ;;  %v7528_v51 = vmax.f32 %v3338_v36, %v3339_v30  ;;  %v7531_v21 = vsel %vm8427_vm10, %v2500_v23, -inf }
 0x2bf   : > { %v7534_v55 = vmax.f32 %v3319_v58, %v3320_v14  ;;  %v3327_v27 = vrot.slane %v7507_v49, 2  ;;  %v3334_v9 = vrot.slane %v7509_v19, 2  ;;  %v7539_v39 = vmax.f32 %v3291_v38, %v3292_v4 }
 0x2c0   : > { %v7541_v12 = vmax.f32 %v3296_v11, %v3297_v40  ;;  %v7544_v5 = vmax.f32 %v3303_v61, %v3304_v33  ;;  %v3311_v26 = vrot.slane %v7531_v21, 4  ;;  %v3341_v37 = vrot.slane %v7528_v51, 2 }
 0x2c1   : > { %vm8435_vm8 = vcmask 1041409   ;;  %vm8436_vm9 = vcmask 1044484   ;;  %vm8437_vm10 = vcmask 1045509  }
 0x2ca   : > { %v5473_v29 = vpop.f32.mrb[2].mxu1 }
 0x2cb   : > { %v2205_v52 = vadd.f32 %v7156_v32, %v5473_v29  ;;  %v2199_v28 = vpop.f32.mrb[3].mxu1 }
 0x2cc   : > { %v2200_v7 = vadd.f32 %v7156_v32, %v2199_v28 }
 0x2cd   : > { %v2671_v0 = vcombine.high %v2205_v52, %v2205_v52  ;;  %v2678_v59 = vrot.slane %v2205_v52, %v8410_v60 }
 0x2ce   : > { %v2654_v6 = vcombine.high %v2200_v7, %v2200_v7  ;;  %v2661_v10 = vrot.slane %v2200_v7, %v8410_v60 }
 0x2cf   : > { %v2685_v15 = vrot.slane %v2671_v0, %v8410_v60  ;;  %v2686_v18 = vcombine.high %v2678_v59, %v2678_v59  ;;  %v3597_v32 = vsel %vm8428_vm12, %v2678_v59, -inf  ;;  %vm8438_vm12 = vcmask 1046534  }
 0x2d0   : > { %v3598_v16 = vrot.slane %v3597_v32, 4  ;;  %v2668_v46 = vrot.slane %v2654_v6, %v8410_v60  ;;  %v2669_v17 = vcombine.high %v2661_v10, %v2661_v10  ;;  %v3569_v42 = vsel %vm8429_vm6, %v2661_v10, -inf }
 0x2d1   : > { %v2687_v45 = vcombine.high %v2685_v15, %v2685_v15  ;;  %v3604_v63 = vsel %vm8430_vm15, %v2686_v18, -inf  ;;  %v3611_v3 = vsel %vm8420_vm1, %v2685_v15, -inf  ;;  %v3570_v58 = vrot.slane %v3569_v42, 4  ;;  %vm8440_vm15 = vmmov %vm8420_vm1 }
 0x2d2   : > { %v3599_v44 = vmax.f32 %v3597_v32, %v3598_v16  ;;  %v3605_v41 = vrot.slane %v3604_v63, 4  ;;  %v3612_v36 = vrot.slane %v3611_v3, 4  ;;  %v2670_v57 = vcombine.high %v2668_v46, %v2668_v46 }
 0x2d3   : > { %v3618_v13 = vsel %vm8431_vm4, %v2687_v45, -inf  ;;  %v3571_v38 = vmax.f32 %v3569_v42, %v3570_v58  ;;  %v3576_v25 = vsel %vm8432_vm14, %v2669_v17, -inf  ;;  %v3583_v8 = vsel %vm8433_vm5, %v2668_v46, -inf  ;;  %vm8441_vm4 = vmmov %vm8420_vm1 }
 0x2d4   : > { %v3600_v62 = vrot.slane %v3599_v44, 2  ;;  %v3606_v11 = vmax.f32 %v3604_v63, %v3605_v41  ;;  %v3613_v35 = vmax.f32 %v3611_v3, %v3612_v36  ;;  %v3619_v30 = vrot.slane %v3618_v13, 4  ;;  %vm8442_vm14 = vmmov %vm8420_vm1 }
 0x2d5   : > { %v3572_v23 = vrot.slane %v3571_v38, 2  ;;  %v3577_v61 = vrot.slane %v3576_v25, 4  ;;  %v3584_v14 = vrot.slane %v3583_v8, 4  ;;  %v3590_v4 = vsel %vm8434_vm7, %v2670_v57, -inf  ;;  %vm8443_vm5 = vmmov %vm8420_vm1 }
 0x2d6   : > { %v3601_v40 = vmax.f32 %v3599_v44, %v3600_v62  ;;  %v3607_v33 = vrot.slane %v3606_v11, 2  ;;  %v3614_v29 = vrot.slane %v3613_v35, 2  ;;  %v3620_v52 = vmax.f32 %v3618_v13, %v3619_v30  ;;  %vm8444_vm7 = vmmov %vm8420_vm1 }
 0x2d7   : > { %v3573_v28 = vmax.f32 %v3571_v38, %v3572_v23  ;;  %v3578_v7 = vmax.f32 %v3576_v25, %v3577_v61  ;;  %v3585_v0 = vmax.f32 %v3583_v8, %v3584_v14  ;;  %v3591_v59 = vrot.slane %v3590_v4, 4 }
 0x2d8   : > { %v3602_v6 = vrot.slane %v3601_v40, 1  ;;  %v3608_v10 = vmax.f32 %v3606_v11, %v3607_v33  ;;  %v3615_v15 = vmax.f32 %v3613_v35, %v3614_v29  ;;  %v3621_v18 = vrot.slane %v3620_v52, 2 }
 0x2d9   : > { %v3574_v32 = vrot.slane %v3573_v28, 1  ;;  %v3579_v16 = vrot.slane %v3578_v7, 2  ;;  %v3586_v46 = vrot.slane %v3585_v0, 2  ;;  %v3592_v17 = vmax.f32 %v3590_v4, %v3591_v59 }
 0x2da   : > { %v3603_v42 = vmax.f32 %v3601_v40, %v3602_v6  ;;  %v3609_v45 = vrot.slane %v3608_v10, 1  ;;  %v3616_v63 = vrot.slane %v3615_v15, 1  ;;  %v3622_v3 = vmax.f32 %v3620_v52, %v3621_v18 }
 0x2db   : > { %v3575_v58 = vmax.f32 %v3573_v28, %v3574_v32  ;;  %v3580_v44 = vmax.f32 %v3578_v7, %v3579_v16  ;;  %v3587_v41 = vmax.f32 %v3585_v0, %v3586_v46  ;;  %v3593_v36 = vrot.slane %v3592_v17, 2 }
 0x2dc   : > { %v3610_v57 = vmax.f32 %v3608_v10, %v3609_v45  ;;  %v3617_v13 = vmax.f32 %v3615_v15, %v3616_v63  ;;  %v3623_v38 = vrot.slane %v3622_v3, 1  ;;  %v3983_v25 = vsel %vm3849_vm13, %v3603_v42, -inf  ;;  %v7582_v15 = vpop.permute.xlu0 %4295 }
 0x2dd   : > { %v3984_v8 = vmax.f32 %v7500_v22, %v3983_v25  ;;  %v3581_v62 = vrot.slane %v3580_v44, 1  ;;  %v3588_v11 = vrot.slane %v3587_v41, 1  ;;  %v3594_v35 = vmax.f32 %v3592_v17, %v3593_v36 }
 0x2de   : > { %v3624_v30 = vmax.f32 %v3622_v3, %v3623_v38  ;;  %v3986_v23 = vsel %vm3849_vm13, %v3610_v57, -inf  ;;  %v3989_v61 = vsel %vm3849_vm13, %v3617_v13, -inf  ;;  %v3971_v14 = vsel %vm3849_vm13, %v3575_v58, -inf }
 0x2df   : > { %v3987_v4 = vmax.f32 %v7512_v53, %v3986_v23  ;;  %v3990_v40 = vmax.f32 %v7515_v50, %v3989_v61  ;;  %v3582_v33 = vmax.f32 %v3580_v44, %v3581_v62  ;;  %v3589_v29 = vmax.f32 %v3587_v41, %v3588_v11 }
 0x2e0   : > { %v3312_v22 = vmax.f32 %v7531_v21, %v3311_v26  ;;  %v3992_v52 = vsel %vm3849_vm13, %v3624_v30, -inf  ;;  %v3595_v28 = vrot.slane %v3594_v35, 1  ;;  %v3972_v7 = vmax.f32 %v7505_v43, %v3971_v14  ;;  %v7600_v3 = vpop.permute.xlu0 %4327 }
 0x2e1   : > { %v3299_v0 = vrot.slane %v7541_v12, 2  ;;  %v3993_v59 = vmax.f32 %v7518_v24, %v3992_v52  ;;  %v3974_v6 = vsel %vm3849_vm13, %v3582_v33, -inf  ;;  %v3977_v53 = vsel %vm3849_vm13, %v3589_v29, -inf }
 0x2e2   : > { %v3328_v50 = vmax.f32 %v7507_v49, %v3327_v27  ;;  %v3596_v10 = vmax.f32 %v3594_v35, %v3595_v28  ;;  %v3975_v21 = vmax.f32 %v7523_v20, %v3974_v6  ;;  %v3978_v26 = vmax.f32 %v7526_v1, %v3977_v53  ;;  %v7611_v35 = vld [vmem:[%s8337_s2] ss:$0 sm:$0xff] }
 0x2e3   : > { %v3979_v43 = vsel %vm3849_vm13, %v7520_v31, -inf  ;;  %v3335_v24 = vmax.f32 %v7509_v19, %v3334_v9  ;;  %v3306_v18 = vrot.slane %v7544_v5, 2  ;;  %v3342_v49 = vmax.f32 %v7528_v51, %v3341_v37 }
 0x2e4   : > { %v3313_v27 = vrot.slane %v3312_v22, 2  ;;  %v3980_v20 = vsel %vm3849_vm13, %v3596_v10, -inf  ;;  %v4176_v1 = vsel %vm8435_vm8, %v3975_v21, %v3972_v7  ;;  %v3300_v32 = vmax.f32 %v7541_v12, %v3299_v0  ;;  %vm8445_vm8 = vmmov %vm8420_vm1 }
 0x2e5   : > { %v3981_v31 = vmax.f32 %v3979_v43, %v3980_v20  ;;  %v4177_v16 = vsel %vm4136_vm2, %v3978_v26, %v4176_v1  ;;  %v3322_v46 = vrot.slane %v7534_v55, 1  ;;  %v3329_v17 = vrot.slane %v3328_v50, 1 }
 0x2e6   : > { %v3294_v19 = vrot.slane %v7539_v39, 1  ;;  %v3336_v9 = vrot.slane %v3335_v24, 1  ;;  %v3307_v42 = vmax.f32 %v7544_v5, %v3306_v18  ;;  %v3343_v37 = vrot.slane %v3342_v49, 1 }
 0x2e7   : > { %v4178_v51 = vsel %vm4138_vm3, %v3981_v31, %v4177_v16  ;;  %v3314_v45 = vmax.f32 %v3312_v22, %v3313_v27  ;;  %v3301_v12 = vrot.slane %v3300_v32, 1  ;;  %v3323_v44 = vmax.f32 %v7534_v55, %v3322_v46 }
 0x2e8   : > { %v4179_v63 = vsel %vm8436_vm9, %v3984_v8, %v4178_v51  ;;  %v3330_v41 = vmax.f32 %v3328_v50, %v3329_v17  ;;  %v3295_v36 = vmax.f32 %v7539_v39, %v3294_v19  ;;  %v3337_v13 = vmax.f32 %v3335_v24, %v3336_v9  ;;  %vm8446_vm9 = vmmov %vm8420_vm1 }
 0x2e9   : > { %v4180_v58 = vsel %vm8437_vm10, %v3987_v4, %v4179_v63  ;;  %v3308_v5 = vrot.slane %v3307_v42, 1  ;;  %vm8439_vm6 = vcmask 1047559   ;;  %v3344_v25 = vmax.f32 %v3342_v49, %v3343_v37  ;;  %v7624_v4 = vpop.permute.xlu0 %4359 }
 0x2ea   : > { %v4181_v57 = vsel %vm8438_vm12, %v3990_v40, %v4180_v58  ;;  %v3315_v62 = vrot.slane %v3314_v45, 1  ;;  %v3302_v11 = vmax.f32 %v3300_v32, %v3301_v12  ;;  %v7615_v30 = vsel %vm3849_vm13, %v3323_v44, -inf }
 0x2eb   : > { %v4182_v38 = vsel %vm8439_vm6, %v3993_v59, %v4181_v57  ;;  %v7618_v23 = vsel %vm3849_vm13, %v3330_v41, -inf  ;;  %v7621_v61 = vsel %vm3849_vm13, %v3295_v36, -inf  ;;  %v7627_v40 = vsel %vm3849_vm13, %v3337_v13, -inf }
 0x2ec   : > { %4211 = vst.msk [vmem:[#allocation3 + $0x98] sm:$0xff] %vm3849_vm13, %v4182_v38  ;;  %v7629_v33 = vmax.f32 %v3307_v42, %v3308_v5  ;;  %v7633_v52 = vsel %vm3849_vm13, %v3344_v25, -inf  ;;  %v7635_v28 = vmax.f32 %v3314_v45, %v3315_v62  ;;  %v7639_v59 = vsel %vm3849_vm13, %v3302_v11, -inf }
 0x2ed   : > { %v7647_v16 = vpop.permute.xlu0 %4391  ;;  %vm4568_vm10 = vcmask 261120   ;;  %vm8447_vm12 = vcmask 1041409   ;;  %vm8448_vm6 = vcmask 1044484  }
 0x2f2   : > { %v5461_v8 = vpop.f32.mrb[14].mxu0 }
 0x2f3   : > { %v2165_v55 = vadd.f32 %v7611_v35, %v5461_v8  ;;  %v2159_v39 = vpop.f32.mrb[15].mxu0 }
 0x2f4   : > { %v2160_v14 = vadd.f32 %v7611_v35, %v2159_v39 }
 0x2f5   : > { %v2535_v29 = vcombine.high %v2165_v55, %v2165_v55  ;;  %v2542_v22 = vrot.slane %v2165_v55, %v8410_v60 }
 0x2f6   : > { %v2518_v7 = vcombine.high %v2160_v14, %v2160_v14  ;;  %v2525_v0 = vrot.slane %v2160_v14, %v8410_v60  ;;  %v7653_v14 = vpop.permute.xlu0 %4393 }
 0x2f7   : > { %v2549_v6 = vrot.slane %v2535_v29, %v8410_v60  ;;  %v2550_v53 = vcombine.high %v2542_v22, %v2542_v22  ;;  %v3373_v50 = vsel %vm8440_vm15, %v2542_v22, -inf  ;;  %v7655_v29 = vpop.permute.xlu1 %4455  ;;  %vm8449_vm15 = vcmask 1045509  }
 0x2f8   : > { %v3374_v10 = vrot.slane %v3373_v50, 4  ;;  %v2532_v21 = vrot.slane %v2518_v7, %v8410_v60  ;;  %v2533_v26 = vcombine.high %v2525_v0, %v2525_v0  ;;  %v3345_v43 = vsel %vm8420_vm1, %v2525_v0, -inf }
 0x2f9   : > { %v2551_v24 = vcombine.high %v2549_v6, %v2549_v6  ;;  %v3380_v18 = vsel %vm8441_vm4, %v2550_v53, -inf  ;;  %v3387_v49 = vsel %vm8442_vm14, %v2549_v6, -inf  ;;  %v3346_v27 = vrot.slane %v3345_v43, 4  ;;  %vm8452_vm14 = vmmov %vm8443_vm5 }
 0x2fa   : > { %v3375_v20 = vmax.f32 %v3373_v50, %v3374_v10  ;;  %v3381_v1 = vrot.slane %v3380_v18, 4  ;;  %v3388_v32 = vrot.slane %v3387_v49, 4  ;;  %v2534_v31 = vcombine.high %v2532_v21, %v2532_v21 }
 0x2fb   : > { %v3394_v46 = vsel %vm8443_vm5, %v2551_v24, -inf  ;;  %v3347_v17 = vmax.f32 %v3345_v43, %v3346_v27  ;;  %v3352_v19 = vsel %vm8444_vm7, %v2533_v26, -inf  ;;  %v3359_v9 = vsel %vm8445_vm8, %v2532_v21, -inf }
 0x2fc   : > { %v3376_v42 = vrot.slane %v3375_v20, 2  ;;  %v3382_v51 = vmax.f32 %v3380_v18, %v3381_v1  ;;  %v3389_v37 = vmax.f32 %v3387_v49, %v3388_v32  ;;  %v3395_v45 = vrot.slane %v3394_v46, 4 }
 0x2fd   : > { %v3348_v63 = vrot.slane %v3347_v17, 2  ;;  %v3353_v12 = vrot.slane %v3352_v19, 4  ;;  %v3360_v58 = vrot.slane %v3359_v9, 4  ;;  %v3366_v44 = vsel %vm8446_vm9, %v2534_v31, -inf }
 0x2fe   : > { %v3377_v41 = vmax.f32 %v3375_v20, %v3376_v42  ;;  %v3383_v36 = vrot.slane %v3382_v51, 2  ;;  %v3390_v57 = vrot.slane %v3389_v37, 2  ;;  %v3396_v13 = vmax.f32 %v3394_v46, %v3395_v45 }
 0x2ff   : > { %v3349_v5 = vmax.f32 %v3347_v17, %v3348_v63  ;;  %v3354_v38 = vmax.f32 %v3352_v19, %v3353_v12  ;;  %v3361_v25 = vmax.f32 %v3359_v9, %v3360_v58  ;;  %v3367_v62 = vrot.slane %v3366_v44, 4 }
 0x300   : > { %v3378_v8 = vrot.slane %v3377_v41, 1  ;;  %v3384_v11 = vmax.f32 %v3382_v51, %v3383_v36  ;;  %v3391_v55 = vmax.f32 %v3389_v37, %v3390_v57  ;;  %v3397_v39 = vrot.slane %v3396_v13, 2 }
 0x301   : > { %v3350_v22 = vrot.slane %v3349_v5, 1  ;;  %v3355_v7 = vrot.slane %v3354_v38, 2  ;;  %v3362_v0 = vrot.slane %v3361_v25, 2  ;;  %v3368_v6 = vmax.f32 %v3366_v44, %v3367_v62 }
 0x302   : > { %v3379_v53 = vmax.f32 %v3377_v41, %v3378_v8  ;;  %v3385_v50 = vrot.slane %v3384_v11, 1  ;;  %v3392_v10 = vrot.slane %v3391_v55, 1  ;;  %v3398_v21 = vmax.f32 %v3396_v13, %v3397_v39 }
 0x303   : > { %v3351_v26 = vmax.f32 %v3349_v5, %v3350_v22  ;;  %v3356_v43 = vmax.f32 %v3354_v38, %v3355_v7  ;;  %v3363_v24 = vmax.f32 %v3361_v25, %v3362_v0  ;;  %v3369_v18 = vrot.slane %v3368_v6, 2 }
 0x304   : > { %v3386_v49 = vmax.f32 %v3384_v11, %v3385_v50  ;;  %v3393_v27 = vmax.f32 %v3391_v55, %v3392_v10  ;;  %v3399_v20 = vrot.slane %v3398_v21, 1  ;;  %v3935_v1 = vsel %vm3849_vm13, %v3379_v53, -inf }
 0x305   : > { %v3936_v32 = vmax.f32 %v7615_v30, %v3935_v1  ;;  %v3357_v31 = vrot.slane %v3356_v43, 1  ;;  %v3364_v46 = vrot.slane %v3363_v24, 1  ;;  %v3370_v17 = vmax.f32 %v3368_v6, %v3369_v18  ;;  %v4302_v19 = vpop.permute.xlu0 %4301 }
 0x306   : > { %v4364_v9 = vpop.permute.xlu1 %4363  ;;  %v3400_v42 = vmax.f32 %v3398_v21, %v3399_v20  ;;  %v3938_v51 = vsel %vm3849_vm13, %v3386_v49, -inf  ;;  %v3941_v37 = vsel %vm3849_vm13, %v3393_v27, -inf  ;;  %v3923_v45 = vsel %vm3849_vm13, %v3351_v26, -inf }
 0x307   : > { %v3939_v63 = vmax.f32 %v7618_v23, %v3938_v51  ;;  %v3942_v12 = vmax.f32 %v7627_v40, %v3941_v37  ;;  %v3358_v58 = vmax.f32 %v3356_v43, %v3357_v31  ;;  %v3365_v44 = vmax.f32 %v3363_v24, %v3364_v46  ;;  %v4214_v24 = vld [vmem:[#allocation3 + $0x7] sm:$0xff] }
 0x308   : > { %v3928_v30 = vsel %vm3849_vm13, %v7629_v33, -inf  ;;  %v3944_v41 = vsel %vm3849_vm13, %v3400_v42, -inf  ;;  %v3371_v36 = vrot.slane %v3370_v17, 1  ;;  %v3924_v57 = vmax.f32 %v7621_v61, %v3923_v45  ;;  %v4613_v61 = vld [vmem:[%s8338_s3] sm:$0xff] }
 0x309   : > { %v3945_v13 = vmax.f32 %v7633_v52, %v3944_v41  ;;  %v3926_v5 = vsel %vm3849_vm13, %v3358_v58, -inf  ;;  %v3929_v38 = vsel %vm3849_vm13, %v3365_v44, -inf  ;;  %v4562_v23 = vsel %vm1878_vm11, %v7485_v48, %v4364_v9  ;;  %v7673_v40 = vpop.permute.xlu0 %4425  ;;  %v5476_v11 = vpop.f32.mrb[4].mxu1  ;;  %v4614_v52 = vld [vmem:[%s8338_s3 + $0x8] sm:$0xff] }
 0x30a   : > { %v4488_v25 = vpop.permute.xlu1 %4487  ;;  %v3372_v62 = vmax.f32 %v3370_v17, %v3371_v36  ;;  %v3927_v33 = vmax.f32 %v7639_v59, %v3926_v5  ;;  %v3930_v8 = vmax.f32 %v3928_v30, %v3929_v38  ;;  %v2209_v55 = vpop.f32.mrb[5].mxu1  ;;  %v5526_v39 = vpack.c.bf16 %v4614_v52, %v4613_v61  ;;  %v4616_v36 = vld [vmem:[%s8338_s3 + $0x18] sm:$0xff]  ;;  %v4618_v5 = vld [vmem:[%s8338_s3 + $0x28] sm:$0xff] }
 0x30b   : > { %v3931_v48 = vsel %vm3849_vm13, %v7635_v28, -inf  ;;  %v4546_v6 = vsel %vm3849_vm13, %v7417_v47, %v4302_v19  ;;  %v2215_v53 = vadd.f32 %v7611_v35, %v5476_v11  ;;  %vm8450_vm1 = vcmask 1046534  }
 0x30c   : > { %v3932_v22 = vsel %vm3849_vm13, %v3372_v62, -inf  ;;  %v4162_v59 = vsel %vm8447_vm12, %v3927_v33, %v3924_v57  ;;  %5527 = vmatprep.subr.bf16.mxu1 %v5526_v39  ;;  %vm8451_vm4 = vcmask 1047559   ;;  %v2210_v20 = vadd.f32 %v7611_v35, %v2209_v55  ;;  %vm8453_vm12 = vmmov %vm8446_vm9 }
 0x30d   : > { %v3933_v7 = vmax.f32 %v3931_v48, %v3932_v22  ;;  %v4163_v0 = vsel %vm4136_vm2, %v3930_v8, %v4162_v59  ;;  %v4334_v50 = vpop.permute.xlu0 %4333  ;;  %5529 = vmatpush3.bf16.msra.mxu1 %v5526_v39  ;;  %v2705_v47 = vcombine.high %v2215_v53, %v2215_v53  ;;  %v4543_v1 = vsel %vm3849_vm13, %v4214_v24, %v7582_v15  ;;  %v4619_v48 = vld [vmem:[%s8338_s3 + $0x30] sm:$0xff] }
 0x30e   : > { %v4396_v10 = vpop.permute.xlu1 %4395  ;;  %v7691_v21 = vsel %vm8352_vm0, %v4546_v6, %v4334_v50  ;;  %v2712_v31 = vrot.slane %v2215_v53, %v8410_v60  ;;  %v2688_v17 = vcombine.high %v2210_v20, %v2210_v20  ;;  %vm4577_vm5 = vcmask 326656  }
 0x30f   : > { %v7694_v28 = vsel %vm4568_vm10, %v4562_v23, %v4396_v10  ;;  %v4164_v26 = vsel %vm4138_vm3, %v3933_v7, %v4163_v0  ;;  %v2719_v46 = vrot.slane %v2705_v47, %v8410_v60  ;;  %vm4586_vm7 = vcmask 392192  }
 0x310   : > { %v4165_v43 = vsel %vm8448_vm6, %v3936_v32, %v4164_v26  ;;  %v4552_v32 = vsel %vm8352_vm0, %v4543_v1, %v7600_v3  ;;  %v2720_v19 = vcombine.high %v2712_v31, %v2712_v31  ;;  %v3653_v9 = vsel %vm8452_vm14, %v2712_v31, -inf  ;;  %vm8454_vm6 = vmmov %vm8446_vm9 }
 0x311   : > { %v4166_v18 = vsel %vm8449_vm15, %v3939_v63, %v4165_v43  ;;  %v2721_v42 = vcombine.high %v2719_v46, %v2719_v46  ;;  %v4560_v51 = vsel %vm1878_vm11, %v4552_v32, %v7624_v4  ;;  %v2695_v15 = vrot.slane %v2210_v20, %v8410_v60  ;;  %v4621_v32 = vld [vmem:[%s8338_s3 + $0x40] sm:$0xff] }
 0x312   : > { %v4167_v49 = vsel %vm8450_vm1, %v3942_v12, %v4166_v18  ;;  %v4569_v37 = vsel %vm4568_vm10, %v4560_v51, %v7647_v16  ;;  %vm4595_vm8 = vcmask 457728   ;;  %v3654_v45 = vrot.slane %v3653_v9, 4  ;;  %v4520_v41 = vpop.permute.xlu1 %4519 }
 0x313   : > { %v4168_v27 = vsel %vm8451_vm4, %v3945_v13, %v4167_v49  ;;  %v2702_v63 = vrot.slane %v2688_v17, %v8410_v60  ;;  %v4578_v58 = vsel %vm4577_vm5, %v4569_v37, %v7475_v54  ;;  %v3660_v44 = vsel %vm8446_vm9, %v2720_v19, -inf  ;;  %v4615_v54 = vld [vmem:[%s8338_s3 + $0x10] sm:$0xff]  ;;  %vm8455_vm4 = vmmov %vm8454_vm6 }
 0x314   : > { %4209 = vst.msk [vmem:[#allocation3 + $0x68] sm:$0xff] %vm3849_vm13, %v4168_v27  ;;  %v3667_v4 = vsel %vm8453_vm12, %v2719_v46, -inf  ;;  %v4587_v16 = vsel %vm4586_vm7, %v4578_v58, %v7655_v29  ;;  %v3674_v30 = vsel %vm8454_vm6, %v2721_v42, -inf  ;;  %vm8354_vm15 = vcmask 523264   ;;  %v4617_v29 = vld [vmem:[%s8338_s3 + $0x20] sm:$0xff]  ;;  %vm8456_vm14 = vmmov %vm8455_vm4 }
 0x315   : > { %v4596_v57 = vsel %vm4595_vm8, %v4587_v16, %v4488_v25  ;;  %v2703_v13 = vcombine.high %v2695_v15, %v2695_v15  ;;  %vm8353_vm1 = vcmask 588800   ;;  %v3655_v38 = vmax.f32 %v3653_v9, %v3654_v45  ;;  %vm8457_vm9 = vmmov %vm8455_vm4 }
 0x316   : > { %v3661_v23 = vrot.slane %v3660_v44, 4  ;;  %v3668_v62 = vrot.slane %v3667_v4, 4  ;;  %v2704_v33 = vcombine.high %v2702_v63, %v2702_v63  ;;  %v3675_v8 = vrot.slane %v3674_v30, 4  ;;  %vm8458_vm12 = vmmov %vm8455_vm4 }
 0x317   : > { %v4605_v11 = vsel %vm8354_vm15, %v4596_v57, %v4520_v41  ;;  %v5530_v25 = vpack.c.bf16 %v4616_v36, %v4615_v54  ;;  %v3625_v61 = vsel %vm8455_vm4, %v2695_v15, -inf  ;;  %v5534_v52 = vpack.c.bf16 %v4618_v5, %v4617_v29  ;;  %vm8459_vm6 = vmmov %vm8455_vm4 }
 0x318   : > { %5504 = vmatprep.mubr.msk.f32.mxu1 %vm8353_vm1, %v4605_v11  ;;  %v3632_v55 = vsel %vm8456_vm14, %v2703_v13, -inf  ;;  %v3639_v39 = vsel %vm8457_vm9, %v2702_v63, -inf  ;;  %v3656_v22 = vrot.slane %v3655_v38, 2  ;;  %v3662_v59 = vmax.f32 %v3660_v44, %v3661_v23  ;;  %vm8460_vm14 = vmmov %vm8455_vm4 }
 0x319   : > { %5531 = vmatprep.subr.bf16.mxu1 %v5530_v25  ;;  %v3669_v7 = vmax.f32 %v3667_v4, %v3668_v62  ;;  %v3646_v0 = vsel %vm8458_vm12, %v2704_v33, -inf  ;;  %v3676_v53 = vmax.f32 %v3674_v30, %v3675_v8  ;;  %v3626_v50 = vrot.slane %v3625_v61, 4  ;;  %vm8461_vm9 = vmmov %vm8455_vm4 }
 0x31a   : > { %5533 = vmatpush3.bf16.msra.mxu1 %v5530_v25  ;;  %v3633_v10 = vrot.slane %v3632_v55, 4  ;;  %v3640_v26 = vrot.slane %v3639_v39, 4  ;;  %v3647_v24 = vrot.slane %v3646_v0, 4  ;;  %v7763_v18 = vmax.f32 %v3655_v38, %v3656_v22  ;;  %vm8462_vm12 = vmmov %vm8455_vm4 }
 0x31b   : > { %v4241_v3 = vld [vmem:[#allocation3 + $0x67] sm:$0xff]  ;;  %5535 = vmatprep.subr.bf16.mxu1 %v5534_v52  ;;  %v3663_v47 = vrot.slane %v3662_v59, 2  ;;  %v3670_v49 = vrot.slane %v3669_v7, 2  ;;  %v3677_v27 = vrot.slane %v3676_v53, 2  ;;  %v3627_v20 = vmax.f32 %v3625_v61, %v3626_v50  ;;  %vm8464_vm0 = vmmov %vm8455_vm4 }
 0x31c   : > { %v7716_v12 = vld [vmem:[#allocation3 + $0x68] sm:$0xff]  ;;  %4365 = vrot.lane.b32.xlu0 %v4241_v3, %s5689_s16  ;;  %v3634_v1 = vmax.f32 %v3632_v55, %v3633_v10  ;;  %v3641_v31 = vmax.f32 %v3639_v39, %v3640_v26  ;;  %v3648_v17 = vmax.f32 %v3646_v0, %v3647_v24  ;;  %v3658_v42 = vrot.slane %v7763_v18, 1  ;;  %vm8479_vm1 = vmmov %vm8464_vm0 }
 0x31d   : > { %4397 = vrot.lane.b32.xlu1 %v7716_v12, %s5693_s12  ;;  %v7757_v6 = vld [vmem:[#allocation3 + $0x69] sm:$0xff]  ;;  %v7773_v51 = vmax.f32 %v3662_v59, %v3663_v47  ;;  %v7775_v15 = vmax.f32 %v3669_v7, %v3670_v49  ;;  %v7778_v37 = vmax.f32 %v3676_v53, %v3677_v27  ;;  %v3628_v45 = vrot.slane %v3627_v20, 2 }
 0x31e   : > { %5537 = vmatpush3.bf16.msra.mxu1 %v5534_v52  ;;  %v3635_v58 = vrot.slane %v3634_v1, 2  ;;  %v3642_v44 = vrot.slane %v3641_v31, 2  ;;  %v3649_v30 = vrot.slane %v3648_v17, 2  ;;  %vm8480_vm15 = vcmask 1047559  }
 0x31f   : > { %v3629_v26 = vmax.f32 %v3627_v20, %v3628_v45 }
 0x320   : > { %4489 = vrot.lane.b32.xlu0 %v7415_v2, %s5696_s25  ;;  %v4620_v2 = vld [vmem:[%s8338_s3 + $0x38] sm:$0xff]  ;;  %v3643_v49 = vmax.f32 %v3641_v31, %v3642_v44  ;;  %v3650_v27 = vmax.f32 %v3648_v17, %v3649_v30  ;;  %v3659_v31 = vmax.f32 %v7763_v18, %v3658_v42 }
 0x321   : > { %4521 = vrot.lane.b32.xlu1 %v7428_v34, %s5697_s26  ;;  %v5538_v43 = vpack.c.bf16 %v4620_v2, %v4619_v48 }
 0x322   : > { %v3644_v17 = vrot.slane %v3643_v49, 1  ;;  %v7802_v18 = vsel %vm3849_vm13, %v3659_v31, -inf }
 0x323   : > { %5539 = vmatprep.subr.bf16.mxu1 %v5538_v43 }
 0x324   : > { %4303 = vrot.lane.b32.xlu0 %v7716_v12, %s5691_s10  ;;  %5541 = vmatpush3.bf16.msra.mxu1 %v5538_v43  ;;  %v3636_v43 = vmax.f32 %v3634_v1, %v3635_v58  ;;  %v3651_v58 = vrot.slane %v3650_v27, 1  ;;  %v3645_v42 = vmax.f32 %v3643_v49, %v3644_v17 }
 0x325   : > { %4335 = vrot.lane.b32.xlu1 %v7757_v6, %s5692_s11  ;;  %5502 = vmatprep.subr.mxu1 %v4621_v32 }
 0x326   : > { %v3637_v20 = vrot.slane %v3636_v43, 1 }
 0x327   : > { %v5464_v46 = vpop.f32.mrb[16].mxu0 }
 0x328   : > { %4427 = vrot.lane.b32.xlu0 %v7428_v34, %s5694_s15  ;;  %v2175_v19 = vadd.f32 %v7611_v35, %v5464_v46  ;;  %v2169_v9 = vpop.f32.mrb[17].mxu0  ;;  %5503 = vmatpush3.msra.mxu1 %v4621_v32 }
 0x329   : > { %4459 = vrot.lane.b32.xlu1 %v4241_v3, %s5695_s23  ;;  %v2170_v34 = vadd.f32 %v7611_v35, %v2169_v9 }
 0x32a   : > { %v2569_v63 = vcombine.high %v2175_v19, %v2175_v19  ;;  %v2576_v3 = vrot.slane %v2175_v19, %v8410_v60  ;;  %v3665_v19 = vrot.slane %v7773_v51, 1 }
 0x32b   : > { %v2552_v4 = vcombine.high %v2170_v34, %v2170_v34  ;;  %v2559_v16 = vrot.slane %v2170_v34, %v8410_v60 }
 0x32c   : > { %v2583_v41 = vrot.slane %v2569_v63, %v8410_v60  ;;  %v2584_v54 = vcombine.high %v2576_v3, %v2576_v3  ;;  %v3429_v36 = vsel %vm8459_vm6, %v2576_v3, -inf  ;;  %vm8463_vm6 = vmmov %vm8455_vm4  ;;  %v3672_v3 = vrot.slane %v7775_v15, 1 }
 0x32d   : > { %v3430_v57 = vrot.slane %v3429_v36, 4  ;;  %v2566_v13 = vrot.slane %v2552_v4, %v8410_v60  ;;  %v2567_v29 = vcombine.high %v2559_v16, %v2559_v16  ;;  %v3401_v5 = vsel %vm8455_vm4, %v2559_v16, -inf  ;;  %vm8465_vm4 = vmmov %vm8464_vm0 }
 0x32e   : > { %v2585_v38 = vcombine.high %v2583_v41, %v2583_v41  ;;  %v3436_v23 = vsel %vm8460_vm14, %v2584_v54, -inf  ;;  %v3443_v62 = vsel %vm8461_vm9, %v2583_v41, -inf  ;;  %v3402_v33 = vrot.slane %v3401_v5, 4  ;;  %vm8466_vm14 = vmmov %vm8464_vm0 }
 0x32f   : > { %v3431_v8 = vmax.f32 %v3429_v36, %v3430_v57  ;;  %v3437_v11 = vrot.slane %v3436_v23, 4  ;;  %v3444_v25 = vrot.slane %v3443_v62, 4  ;;  %v2568_v61 = vcombine.high %v2566_v13, %v2566_v13  ;;  %vm8467_vm9 = vmmov %vm8464_vm0 }
 0x330   : > { %v3450_v52 = vsel %vm8462_vm12, %v2585_v38, -inf  ;;  %v3403_v55 = vmax.f32 %v3401_v5, %v3402_v33  ;;  %v3408_v39 = vsel %vm8463_vm6, %v2567_v29, -inf  ;;  %v3415_v48 = vsel %vm8464_vm0, %v2566_v13, -inf  ;;  %vm8468_vm12 = vmmov %vm8464_vm0 }
 0x331   : > { %v3432_v2 = vrot.slane %v3431_v8, 2  ;;  %v3438_v22 = vmax.f32 %v3436_v23, %v3437_v11  ;;  %v3445_v59 = vmax.f32 %v3443_v62, %v3444_v25  ;;  %v3451_v7 = vrot.slane %v3450_v52, 4  ;;  %vm8469_vm6 = vmmov %vm8464_vm0 }
 0x332   : > { %v3404_v0 = vrot.slane %v3403_v55, 2  ;;  %v3409_v53 = vrot.slane %v3408_v39, 4  ;;  %v3416_v50 = vrot.slane %v3415_v48, 4  ;;  %v3422_v10 = vsel %vm8465_vm4, %v2568_v61, -inf  ;;  %vm8470_vm4 = vmmov %vm8464_vm0 }
 0x333   : > { %v3439_v24 = vrot.slane %v3438_v22, 2  ;;  %v3452_v47 = vmax.f32 %v3450_v52, %v3451_v7  ;;  %v3423_v32 = vrot.slane %v3422_v10, 4  ;;  %v3433_v9 = vmax.f32 %v3431_v8, %v3432_v2 }
 0x334   : > { %v3410_v46 = vmax.f32 %v3408_v39, %v3409_v53  ;;  %v3446_v34 = vrot.slane %v3445_v59, 2  ;;  %v3417_v63 = vmax.f32 %v3415_v48, %v3416_v50  ;;  %v3679_v4 = vrot.slane %v7778_v37, 1 }
 0x335   : > { %v3453_v16 = vrot.slane %v3452_v47, 2  ;;  %v3405_v41 = vmax.f32 %v3403_v55, %v3404_v0  ;;  %v3630_v54 = vrot.slane %v3629_v26, 1  ;;  %v3440_v1 = vmax.f32 %v3438_v22, %v3439_v24 }
 0x336   : > { %v3411_v45 = vrot.slane %v3410_v46, 2  ;;  %v3424_v44 = vmax.f32 %v3422_v10, %v3423_v32  ;;  %v3666_v30 = vmax.f32 %v7773_v51, %v3665_v19  ;;  %v3434_v36 = vrot.slane %v3433_v9, 1 }
 0x337   : > { %v3447_v57 = vmax.f32 %v3445_v59, %v3446_v34  ;;  %v3418_v13 = vrot.slane %v3417_v63, 2  ;;  %v3673_v29 = vmax.f32 %v7775_v15, %v3672_v3  ;;  %v3680_v5 = vmax.f32 %v7778_v37, %v3679_v4 }
 0x338   : > { %v3454_v38 = vmax.f32 %v3452_v47, %v3453_v16  ;;  %v3406_v23 = vrot.slane %v3405_v41, 1  ;;  %v3631_v62 = vmax.f32 %v3629_v26, %v3630_v54  ;;  %v3638_v33 = vmax.f32 %v3636_v43, %v3637_v20 }
 0x339   : > { %v3441_v8 = vrot.slane %v3440_v1, 1  ;;  %v3412_v11 = vmax.f32 %v3410_v46, %v3411_v45  ;;  %v3652_v25 = vmax.f32 %v3650_v27, %v3651_v58  ;;  %v3425_v61 = vrot.slane %v3424_v44, 2 }
 0x33a   : > { %v7805_v51 = vsel %vm3849_vm13, %v3666_v30, -inf  ;;  %v3435_v52 = vmax.f32 %v3433_v9, %v3434_v36  ;;  %v3448_v55 = vrot.slane %v3447_v57, 1  ;;  %v7807_v15 = vmax.f32 %v3417_v63, %v3418_v13 }
 0x33b   : > { %v7810_v37 = vsel %vm3849_vm13, %v3673_v29, -inf  ;;  %v7813_v39 = vsel %vm3849_vm13, %v3680_v5, -inf  ;;  %v3455_v48 = vrot.slane %v3454_v38, 1  ;;  %v3407_v2 = vmax.f32 %v3405_v41, %v3406_v23 }
 0x33c   : > { %v7816_v22 = vsel %vm3849_vm13, %v3631_v62, -inf  ;;  %v7819_v59 = vsel %vm3849_vm13, %v3638_v33, -inf  ;;  %v3442_v7 = vmax.f32 %v3440_v1, %v3441_v8  ;;  %v3413_v0 = vrot.slane %v3412_v11, 1 }
 0x33d   : > { %v7822_v50 = vsel %vm3849_vm13, %v3645_v42, -inf  ;;  %v7825_v10 = vsel %vm3849_vm13, %v3652_v25, -inf  ;;  %v7827_v26 = vmax.f32 %v3424_v44, %v3425_v61  ;;  %v7830_v47 = vmax.f32 %v3447_v57, %v3448_v55 }
 0x33e   : > { %v7833_v49 = vsel %vm3849_vm13, %v3435_v52, -inf  ;;  %v3420_v27 = vrot.slane %v7807_v15, 1  ;;  %v7837_v32 = vmax.f32 %v3454_v38, %v3455_v48  ;;  %v7840_v19 = vsel %vm3849_vm13, %v3407_v2, -inf }
 0x33f   : > { %v5479_v53 = vpop.f32.mrb[6].mxu1  ;;  %v7844_v63 = vsel %vm3849_vm13, %v3442_v7, -inf  ;;  %v7846_v3 = vmax.f32 %v3412_v11, %v3413_v0  ;;  %v3427_v41 = vrot.slane %v7827_v26, 1 }
 0x340   : > { %v2225_v43 = vadd.f32 %v7611_v35, %v5479_v53  ;;  %v2219_v24 = vpop.f32.mrb[7].mxu1 }
 0x341   : > { %v2220_v46 = vadd.f32 %v7611_v35, %v2219_v24 }
 0x342   : > { %v2739_v9 = vcombine.high %v2225_v43, %v2225_v43  ;;  %v2746_v34 = vrot.slane %v2225_v43, %v8410_v60 }
 0x343   : > { %v2722_v4 = vcombine.high %v2220_v46, %v2220_v46  ;;  %v2729_v16 = vrot.slane %v2220_v46, %v8410_v60 }
 0x344   : > { %v2753_v54 = vrot.slane %v2739_v9, %v8410_v60  ;;  %v2754_v20 = vcombine.high %v2746_v34, %v2746_v34  ;;  %v3709_v1 = vsel %vm8464_vm0, %v2746_v34, -inf }
 0x345   : > { %v3710_v45 = vrot.slane %v3709_v1, 4  ;;  %v2736_v31 = vrot.slane %v2722_v4, %v8410_v60  ;;  %v2737_v17 = vcombine.high %v2729_v16, %v2729_v16  ;;  %v3681_v58 = vsel %vm8466_vm14, %v2729_v16, -inf  ;;  %vm8471_vm14 = vmmov %vm8464_vm0 }
 0x346   : > { %v2755_v44 = vcombine.high %v2753_v54, %v2753_v54  ;;  %v3716_v30 = vsel %vm8467_vm9, %v2754_v20, -inf  ;;  %v3723_v36 = vsel %vm8468_vm12, %v2753_v54, -inf  ;;  %v3682_v57 = vrot.slane %v3681_v58, 4  ;;  %vm8473_vm12 = vmmov %vm8464_vm0 }
 0x347   : > { %v3711_v13 = vmax.f32 %v3709_v1, %v3710_v45  ;;  %v3717_v29 = vrot.slane %v3716_v30, 4  ;;  %v3724_v5 = vrot.slane %v3723_v36, 4  ;;  %v2738_v38 = vcombine.high %v2736_v31, %v2736_v31 }
 0x348   : > { %v3730_v23 = vsel %vm8469_vm6, %v2755_v44, -inf  ;;  %v3683_v62 = vmax.f32 %v3681_v58, %v3682_v57  ;;  %v3688_v33 = vsel %vm8470_vm4, %v2737_v17, -inf  ;;  %v3695_v8 = vsel %vm8464_vm0, %v2736_v31, -inf  ;;  %vm8475_vm4 = vmmov %vm8464_vm0 }
 0x349   : > { %v3712_v11 = vrot.slane %v3711_v13, 2  ;;  %v3718_v42 = vmax.f32 %v3716_v30, %v3717_v29  ;;  %v3725_v25 = vmax.f32 %v3723_v36, %v3724_v5  ;;  %v3731_v61 = vrot.slane %v3730_v23, 4 }
 0x34a   : > { %v3684_v52 = vrot.slane %v3683_v62, 2  ;;  %v3689_v55 = vrot.slane %v3688_v33, 4  ;;  %v3696_v48 = vrot.slane %v3695_v8, 4  ;;  %v3702_v2 = vsel %vm8471_vm14, %v2738_v38, -inf }
 0x34b   : > { %v3713_v7 = vmax.f32 %v3711_v13, %v3712_v11  ;;  %v3719_v0 = vrot.slane %v3718_v42, 2  ;;  %v3726_v53 = vrot.slane %v3725_v25, 2  ;;  %v3732_v43 = vmax.f32 %v3730_v23, %v3731_v61 }
 0x34c   : > { %v3685_v24 = vmax.f32 %v3683_v62, %v3684_v52  ;;  %v3690_v46 = vmax.f32 %v3688_v33, %v3689_v55  ;;  %v3697_v9 = vmax.f32 %v3695_v8, %v3696_v48  ;;  %v3703_v34 = vrot.slane %v3702_v2, 4 }
 0x34d   : > { %v3714_v4 = vrot.slane %v3713_v7, 1  ;;  %v3720_v16 = vmax.f32 %v3718_v42, %v3719_v0  ;;  %v3727_v54 = vmax.f32 %v3725_v25, %v3726_v53  ;;  %v3733_v20 = vrot.slane %v3732_v43, 2 }
 0x34e   : > { %v3686_v1 = vrot.slane %v3685_v24, 1  ;;  %v3691_v45 = vrot.slane %v3690_v46, 2  ;;  %v3698_v31 = vrot.slane %v3697_v9, 2  ;;  %v3704_v17 = vmax.f32 %v3702_v2, %v3703_v34 }
 0x34f   : > { %v3715_v58 = vmax.f32 %v3713_v7, %v3714_v4  ;;  %v3721_v44 = vrot.slane %v3720_v16, 1  ;;  %v3728_v30 = vrot.slane %v3727_v54, 1  ;;  %v3734_v36 = vmax.f32 %v3732_v43, %v3733_v20 }
 0x350   : > { %v3687_v57 = vmax.f32 %v3685_v24, %v3686_v1  ;;  %v3692_v13 = vmax.f32 %v3690_v46, %v3691_v45  ;;  %v3699_v29 = vmax.f32 %v3697_v9, %v3698_v31  ;;  %v3705_v5 = vrot.slane %v3704_v17, 2 }
 0x351   : > { %v3722_v38 = vmax.f32 %v3720_v16, %v3721_v44  ;;  %v3729_v23 = vmax.f32 %v3727_v54, %v3728_v30  ;;  %v3735_v62 = vrot.slane %v3734_v36, 1  ;;  %v4007_v33 = vsel %vm3849_vm13, %v3715_v58, -inf }
 0x352   : > { %v4008_v8 = vmax.f32 %v7802_v18, %v4007_v33  ;;  %v3693_v11 = vrot.slane %v3692_v13, 1  ;;  %v3700_v42 = vrot.slane %v3699_v29, 1  ;;  %v3706_v25 = vmax.f32 %v3704_v17, %v3705_v5 }
 0x353   : > { %v3736_v61 = vmax.f32 %v3734_v36, %v3735_v62  ;;  %v4010_v52 = vsel %vm3849_vm13, %v3722_v38, -inf  ;;  %v4013_v55 = vsel %vm3849_vm13, %v3729_v23, -inf  ;;  %v3995_v48 = vsel %vm3849_vm13, %v3687_v57, -inf }
 0x354   : > { %v4011_v2 = vmax.f32 %v7805_v51, %v4010_v52  ;;  %v4014_v7 = vmax.f32 %v7810_v37, %v4013_v55  ;;  %v3694_v0 = vmax.f32 %v3692_v13, %v3693_v11  ;;  %v3701_v53 = vmax.f32 %v3699_v29, %v3700_v42 }
 0x355   : > { %v7869_v43 = vsel %vm3849_vm13, %v7830_v47, -inf  ;;  %v4016_v18 = vsel %vm3849_vm13, %v3736_v61, -inf  ;;  %v3707_v24 = vrot.slane %v3706_v25, 1  ;;  %v3996_v46 = vmax.f32 %v7816_v22, %v3995_v48 }
 0x356   : > { %v3421_v9 = vmax.f32 %v7807_v15, %v3420_v27  ;;  %v4017_v34 = vmax.f32 %v7813_v39, %v4016_v18  ;;  %v3998_v51 = vsel %vm3849_vm13, %v3694_v0, -inf  ;;  %v4001_v37 = vsel %vm3849_vm13, %v3701_v53, -inf }
 0x357   : > { %v3708_v16 = vmax.f32 %v3706_v25, %v3707_v24  ;;  %v3999_v47 = vmax.f32 %v7819_v59, %v3998_v51  ;;  %v4002_v54 = vmax.f32 %v7822_v50, %v4001_v37  ;;  %v7884_v22 = vsel %vm3849_vm13, %v7837_v32, -inf }
 0x358   : > { %v5467_v4 = vpop.f32.mrb[18].mxu0  ;;  %v7889_v15 = vmax.f32 %v7827_v26, %v3427_v41  ;;  %v7893_v39 = vsel %vm3849_vm13, %v7846_v3, -inf  ;;  %vm8472_vm9 = vcmask 1041409   ;;  %v7903_v41 = vsel %vm3849_vm13, %v3421_v9, -inf }
 0x359   : > { %v2185_v20 = vadd.f32 %v7611_v35, %v5467_v4  ;;  %v2179_v1 = vpop.f32.mrb[19].mxu0  ;;  %v4004_v50 = vsel %vm3849_vm13, %v3708_v16, -inf  ;;  %v4183_v27 = vsel %vm8472_vm9, %v3999_v47, %v3996_v46  ;;  %vm8474_vm6 = vcmask 1044484  }
 0x35a   : > { %v2180_v59 = vadd.f32 %v7611_v35, %v2179_v1  ;;  %v4005_v32 = vmax.f32 %v7825_v10, %v4004_v50  ;;  %v4184_v17 = vsel %vm4136_vm2, %v4002_v54, %v4183_v27  ;;  %vm8476_vm14 = vcmask 1045509  }
 0x35b   : > { %v2603_v45 = vcombine.high %v2185_v20, %v2185_v20  ;;  %v2610_v31 = vrot.slane %v2185_v20, %v8410_v60  ;;  %vm8477_vm9 = vcmask 1046534  }
 0x35c   : > { %v2586_v58 = vcombine.high %v2180_v59, %v2180_v59  ;;  %v2593_v26 = vrot.slane %v2180_v59, %v8410_v60  ;;  %v4185_v36 = vsel %vm4138_vm3, %v4005_v32, %v4184_v17 }
 0x35d   : > { %v2617_v3 = vrot.slane %v2603_v45, %v8410_v60  ;;  %v2618_v44 = vcombine.high %v2610_v31, %v2610_v31  ;;  %v3485_v30 = vsel %vm8473_vm12, %v2610_v31, -inf  ;;  %v4186_v10 = vsel %vm8474_vm6, %v4008_v8, %v4185_v36  ;;  %vm8478_vm12 = vmmov %vm8464_vm0 }
 0x35e   : > { %v3486_v57 = vrot.slane %v3485_v30, 4  ;;  %v2600_v13 = vrot.slane %v2586_v58, %v8410_v60  ;;  %v2601_v29 = vcombine.high %v2593_v26, %v2593_v26  ;;  %v4187_v62 = vsel %vm8476_vm14, %v4011_v2, %v4186_v10  ;;  %vm8481_vm6 = vmmov %vm8464_vm0 }
 0x35f   : > { %v2619_v5 = vcombine.high %v2617_v3, %v2617_v3  ;;  %v3492_v38 = vsel %vm8475_vm4, %v2618_v44, -inf  ;;  %v3499_v23 = vsel %vm8464_vm0, %v2617_v3, -inf  ;;  %v4188_v25 = vsel %vm8477_vm9, %v4014_v7, %v4187_v62  ;;  %vm8482_vm4 = vmmov %vm8464_vm0 }
 0x360   : > { %v3487_v33 = vmax.f32 %v3485_v30, %v3486_v57  ;;  %v3493_v11 = vrot.slane %v3492_v38, 4  ;;  %v3500_v42 = vrot.slane %v3499_v23, 4  ;;  %v2602_v52 = vcombine.high %v2600_v13, %v2600_v13 }
 0x361   : > { %v3506_v61 = vsel %vm8478_vm12, %v2619_v5, -inf  ;;  %v3457_v55 = vsel %vm8479_vm1, %v2593_v26, -inf  ;;  %v4189_v48 = vsel %vm8480_vm15, %v4017_v34, %v4188_v25  ;;  %v3464_v2 = vsel %vm8481_vm6, %v2601_v29, -inf  ;;  %vm8483_vm1 = vmmov %vm8464_vm0 }
 0x362   : > { %v3488_v8 = vrot.slane %v3487_v33, 2  ;;  %v3494_v0 = vmax.f32 %v3492_v38, %v3493_v11  ;;  %v3501_v53 = vmax.f32 %v3499_v23, %v3500_v42  ;;  %4212 = vst.msk [vmem:[#allocation3 + $0xb0] sm:$0xff] %vm3849_vm13, %v4189_v48  ;;  %v3507_v18 = vrot.slane %v3506_v61, 4  ;;  %vm8484_vm15 = vmmov %vm8464_vm0 }
 0x363   : > { %v3458_v24 = vrot.slane %v3457_v55, 4  ;;  %v3471_v46 = vsel %vm8482_vm4, %v2600_v13, -inf  ;;  %v3465_v37 = vrot.slane %v3464_v2, 4  ;;  %v3478_v34 = vsel %vm8483_vm1, %v2602_v52, -inf  ;;  %v5482_v54 = vpop.f32.mrb[8].mxu1  ;;  %vm8486_vm14 = vmmov %vm8483_vm1 }
 0x364   : > { %v3489_v9 = vmax.f32 %v3487_v33, %v3488_v8  ;;  %v3495_v7 = vrot.slane %v3494_v0, 2  ;;  %v3502_v51 = vrot.slane %v3501_v53, 2  ;;  %v3508_v4 = vmax.f32 %v3506_v61, %v3507_v18  ;;  %v2229_v27 = vpop.f32.mrb[9].mxu1  ;;  %vm8487_vm9 = vmmov %vm8483_vm1 }
 0x365   : > { %v3459_v16 = vmax.f32 %v3457_v55, %v3458_v24  ;;  %v3472_v47 = vrot.slane %v3471_v46, 4  ;;  %v3466_v50 = vmax.f32 %v3464_v2, %v3465_v37  ;;  %v3479_v17 = vrot.slane %v3478_v34, 4  ;;  %vm8488_vm12 = vmmov %vm8483_vm1 }
 0x366   : > { %v3490_v20 = vrot.slane %v3489_v9, 1  ;;  %v3496_v1 = vmax.f32 %v3494_v0, %v3495_v7  ;;  %v3503_v59 = vmax.f32 %v3501_v53, %v3502_v51  ;;  %v3509_v45 = vrot.slane %v3508_v4, 2 }
 0x367   : > { %v3460_v31 = vrot.slane %v3459_v16, 2  ;;  %v3473_v32 = vmax.f32 %v3471_v46, %v3472_v47  ;;  %v3467_v44 = vrot.slane %v3466_v50, 2  ;;  %v3480_v13 = vmax.f32 %v3478_v34, %v3479_v17 }
 0x368   : > { %v3491_v58 = vmax.f32 %v3489_v9, %v3490_v20  ;;  %v3497_v26 = vrot.slane %v3496_v1, 1  ;;  %v3504_v3 = vrot.slane %v3503_v59, 1  ;;  %v3510_v30 = vmax.f32 %v3508_v4, %v3509_v45 }
 0x369   : > { %v3461_v36 = vmax.f32 %v3459_v16, %v3460_v31  ;;  %v3474_v57 = vrot.slane %v3473_v32, 2  ;;  %v3468_v38 = vmax.f32 %v3466_v50, %v3467_v44  ;;  %v3481_v52 = vrot.slane %v3480_v13, 2 }
 0x36a   : > { %v3498_v29 = vmax.f32 %v3496_v1, %v3497_v26  ;;  %v3505_v10 = vmax.f32 %v3503_v59, %v3504_v3  ;;  %v3959_v5 = vsel %vm3849_vm13, %v3491_v58, -inf  ;;  %v3511_v23 = vrot.slane %v3510_v30, 1 }
 0x36b   : > { %v3960_v62 = vmax.f32 %v7833_v49, %v3959_v5  ;;  %v3462_v33 = vrot.slane %v3461_v36, 1  ;;  %v3475_v11 = vmax.f32 %v3473_v32, %v3474_v57  ;;  %v3469_v61 = vrot.slane %v3468_v38, 1 }
 0x36c   : > { %v3962_v42 = vsel %vm3849_vm13, %v3498_v29, -inf  ;;  %v3965_v25 = vsel %vm3849_vm13, %v3505_v10, -inf  ;;  %v3512_v55 = vmax.f32 %v3510_v30, %v3511_v23  ;;  %v3482_v24 = vmax.f32 %v3480_v13, %v3481_v52 }
 0x36d   : > { %v3963_v48 = vmax.f32 %v7844_v63, %v3962_v42  ;;  %v3966_v8 = vmax.f32 %v7869_v43, %v3965_v25  ;;  %v3463_v0 = vmax.f32 %v3461_v36, %v3462_v33  ;;  %v3470_v53 = vmax.f32 %v3468_v38, %v3469_v61 }
 0x36e   : > { %v3476_v18 = vrot.slane %v3475_v11, 1  ;;  %v2235_v2 = vadd.f32 %v7611_v35, %v5482_v54  ;;  %v3955_v49 = vsel %vm3849_vm13, %v7889_v15, -inf  ;;  %v3968_v46 = vsel %vm3849_vm13, %v3512_v55, -inf }
 0x36f   : > { %v3947_v9 = vsel %vm3849_vm13, %v3463_v0, -inf  ;;  %v2230_v7 = vadd.f32 %v7611_v35, %v2229_v27  ;;  %v3969_v51 = vmax.f32 %v7884_v22, %v3968_v46  ;;  %v3483_v37 = vrot.slane %v3482_v24, 1 }
 0x370   : > { %v3477_v63 = vmax.f32 %v3475_v11, %v3476_v18  ;;  %v3948_v43 = vmax.f32 %v7840_v19, %v3947_v9  ;;  %v3950_v4 = vsel %vm3849_vm13, %v3470_v53, -inf  ;;  %v2773_v16 = vcombine.high %v2235_v2, %v2235_v2 }
 0x371   : > { %v2780_v47 = vrot.slane %v2235_v2, %v8410_v60  ;;  %v2756_v34 = vcombine.high %v2230_v7, %v2230_v7  ;;  %v3484_v54 = vmax.f32 %v3482_v24, %v3483_v37  ;;  %v3951_v15 = vmax.f32 %v7893_v39, %v3950_v4 }
 0x372   : > { %v3953_v20 = vsel %vm3849_vm13, %v3477_v63, -inf  ;;  %v2763_v1 = vrot.slane %v2230_v7, %v8410_v60  ;;  %v2787_v22 = vrot.slane %v2773_v16, %v8410_v60  ;;  %vm8485_vm0 = vcmask 1041409  }
 0x373   : > { %v3954_v35 = vmax.f32 %v7903_v41, %v3953_v20  ;;  %v2788_v59 = vcombine.high %v2780_v47, %v2780_v47  ;;  %v3765_v19 = vsel %vm8484_vm15, %v2780_v47, -inf  ;;  %v3956_v50 = vsel %vm3849_vm13, %v3484_v54, -inf  ;;  %vm8491_vm15 = vmmov %vm8483_vm1 }
 0x374   : > { %v4169_v27 = vsel %vm8485_vm0, %v3951_v15, %v3948_v43  ;;  %v3766_v45 = vrot.slane %v3765_v19, 4  ;;  %v2770_v31 = vrot.slane %v2756_v34, %v8410_v60  ;;  %v3957_v32 = vmax.f32 %v3955_v49, %v3956_v50 }
 0x375   : > { %v4170_v39 = vsel %vm4136_vm2, %v3954_v35, %v4169_v27  ;;  %v2789_v17 = vcombine.high %v2787_v22, %v2787_v22  ;;  %v3772_v58 = vsel %vm8486_vm14, %v2788_v59, -inf  ;;  %v3779_v3 = vsel %vm8487_vm9, %v2787_v22, -inf  ;;  %vm8494_vm9 = vmmov %vm8483_vm1  ;;  %v4458_v35 = vpop.permute.xlu0 %4457 }
 0x376   : > { %v3767_v26 = vmax.f32 %v3765_v19, %v3766_v45  ;;  %v3773_v41 = vrot.slane %v3772_v58, 4  ;;  %v2771_v44 = vcombine.high %v2763_v1, %v2763_v1  ;;  %v4171_v30 = vsel %vm4138_vm3, %v3957_v32, %v4170_v39 }
 0x377   : > { %v3780_v36 = vrot.slane %v3779_v3, 4  ;;  %v3786_v57 = vsel %vm8488_vm12, %v2789_v17, -inf  ;;  %v2772_v13 = vcombine.high %v2770_v31, %v2770_v31  ;;  %vm8489_vm6 = vcmask 1044484   ;;  %vm8495_vm12 = vmmov %vm8483_vm1 }
 0x378   : > { %v4172_v29 = vsel %vm8489_vm6, %v3960_v62, %v4171_v30  ;;  %v3768_v10 = vrot.slane %v3767_v26, 2  ;;  %v3774_v5 = vmax.f32 %v3772_v58, %v3773_v41  ;;  %v3787_v38 = vrot.slane %v3786_v57, 4  ;;  %v5485_v24 = vpop.f32.mrb[10].mxu1  ;;  %vm8496_vm6 = vmmov %vm8483_vm1 }
 0x379   : > { %vm8490_vm4 = vcmask 1045509   ;;  %v3781_v33 = vmax.f32 %v3779_v3, %v3780_v36  ;;  %v3737_v11 = vsel %vm8483_vm1, %v2763_v1, -inf  ;;  %v3744_v42 = vsel %vm8491_vm15, %v2771_v44, -inf  ;;  %v2239_v9 = vpop.f32.mrb[11].mxu1  ;;  %vm8498_vm15 = vmmov %vm8483_vm1 }
 0x37a   : > { %v4173_v23 = vsel %vm8490_vm4, %v3963_v48, %v4172_v29  ;;  %vm8492_vm0 = vcmask 1046534   ;;  %v3769_v61 = vmax.f32 %v3767_v26, %v3768_v10  ;;  %v3775_v52 = vrot.slane %v3774_v5, 2  ;;  %vm8497_vm4 = vmmov %vm8483_vm1 }
 0x37b   : > { %v4174_v25 = vsel %vm8492_vm0, %v3966_v8, %v4173_v23  ;;  %v3788_v55 = vmax.f32 %v3786_v57, %v3787_v38  ;;  %vm8493_vm14 = vcmask 1047559   ;;  %v3782_v53 = vrot.slane %v3781_v33, 2  ;;  %vm8499_vm0 = vmmov %vm8483_vm1 }
 0x37c   : > { %v4175_v0 = vsel %vm8493_vm14, %v3969_v51, %v4174_v25  ;;  %v3738_v18 = vrot.slane %v3737_v11, 4  ;;  %v3745_v62 = vrot.slane %v3744_v42, 4  ;;  %v3770_v2 = vrot.slane %v3769_v61, 1  ;;  %vm8500_vm14 = vmmov %vm8499_vm0 }
 0x37d   : > { %4210 = vst.msk [vmem:[#allocation3 + $0x80] sm:$0xff] %vm3849_vm13, %v4175_v0  ;;  %v3776_v48 = vmax.f32 %v3774_v5, %v3775_v52  ;;  %v3789_v49 = vrot.slane %v3788_v55, 2  ;;  %v3751_v46 = vsel %vm8494_vm9, %v2770_v31, -inf  ;;  %v3783_v7 = vmax.f32 %v3781_v33, %v3782_v53  ;;  %v5614_v31 = vld [vmem:[%s8337_s2] ss:$0 sm:$0xff]  ;;  %vm8501_vm9 = vmmov %vm8499_vm0 }
 0x37e   : > { %v3739_v63 = vmax.f32 %v3737_v11, %v3738_v18  ;;  %v3746_v8 = vmax.f32 %v3744_v42, %v3745_v62  ;;  %v3752_v37 = vrot.slane %v3751_v46, 4  ;;  %v3758_v51 = vsel %vm8495_vm12, %v2772_v13, -inf  ;;  %vm8502_vm12 = vmmov %vm8499_vm0 }
 0x37f   : > { %v3777_v43 = vrot.slane %v3776_v48, 1  ;;  %v3790_v4 = vmax.f32 %v3788_v55, %v3789_v49  ;;  %v3784_v16 = vrot.slane %v3783_v7, 1  ;;  %v3771_v15 = vmax.f32 %v3769_v61, %v3770_v2 }
 0x380   : > { %v3740_v47 = vrot.slane %v3739_v63, 2  ;;  %v3747_v34 = vrot.slane %v3746_v8, 2  ;;  %v3753_v54 = vmax.f32 %v3751_v46, %v3752_v37  ;;  %v3759_v1 = vrot.slane %v3758_v51, 4 }
 0x381   : > { %v3791_v20 = vrot.slane %v3790_v4, 1  ;;  %v3778_v22 = vmax.f32 %v3776_v48, %v3777_v43  ;;  %v4570_v27 = vsel %vm4568_vm10, %v7467_v56, %v7653_v14  ;;  %v2245_v32 = vadd.f32 %v5614_v31, %v5485_v24 }
 0x382   : > { %v3741_v59 = vmax.f32 %v3739_v63, %v3740_v47  ;;  %v3748_v19 = vmax.f32 %v3746_v8, %v3747_v34  ;;  %v3754_v50 = vrot.slane %v3753_v54, 2  ;;  %v3760_v45 = vmax.f32 %v3758_v51, %v3759_v1 }
 0x383   : > { %v4579_v39 = vsel %vm4577_vm5, %v4570_v27, %v7673_v40  ;;  %v3785_v17 = vmax.f32 %v3783_v7, %v3784_v16  ;;  %v3792_v58 = vmax.f32 %v3790_v4, %v3791_v20  ;;  %v2807_v14 = vcombine.high %v2245_v32, %v2245_v32 }
 0x384   : > { %v3742_v26 = vrot.slane %v3741_v59, 1  ;;  %v7968_v41 = vld [vmem:[#allocation3 + $0x80] sm:$0xff]  ;;  %v7973_v44 = vsel %vm4586_vm7, %v4579_v39, %v4458_v35  ;;  %v3761_v56 = vrot.slane %v3760_v45, 2  ;;  %v2814_v30 = vrot.slane %v2245_v32, %v8410_v60 }
 0x385   : > { %v7970_v3 = vld [vmem:[#allocation3 + $0x7f] sm:$0xff]  ;;  %4305 = vrot.lane.b32.xlu0 %v7968_v41, %s5691_s10  ;;  %v7981_v40 = vsel %vm3849_vm13, %v3771_v15, -inf  ;;  %v7984_v36 = vsel %vm3849_vm13, %v3778_v22, -inf  ;;  %v3749_v57 = vrot.slane %v3748_v19, 1  ;;  %v7986_v13 = vmax.f32 %v3753_v54, %v3754_v50 }
 0x386   : > { %4367 = vrot.lane.b32.xlu1 %v7970_v3, %s5689_s16  ;;  %v2821_v29 = vrot.slane %v2807_v14, %v8410_v60  ;;  %v2822_v10 = vcombine.high %v2814_v30, %v2814_v30  ;;  %v3821_v5 = vsel %vm8496_vm6, %v2814_v30, -inf  ;;  %v2240_v38 = vadd.f32 %v5614_v31, %v2239_v9  ;;  %v8011_v8 = vld [vmem:[#allocation3 + $0x81] sm:$0xff] }
 0x387   : > { %v7991_v23 = vsel %vm3849_vm13, %v3785_v17, -inf  ;;  %v7994_v33 = vsel %vm3849_vm13, %v3792_v58, -inf  ;;  %v7996_v11 = vmax.f32 %v3741_v59, %v3742_v26  ;;  %v3822_v42 = vrot.slane %v3821_v5, 4 }
 0x388   : > { %v7998_v25 = vmax.f32 %v3760_v45, %v3761_v56  ;;  %v2823_v61 = vcombine.high %v2821_v29, %v2821_v29  ;;  %v3828_v52 = vsel %vm8497_vm4, %v2822_v10, -inf  ;;  %v3835_v55 = vsel %vm8483_vm1, %v2821_v29, -inf }
 0x389   : > { %4429 = vrot.lane.b32.xlu0 %v7757_v6, %s5694_s15  ;;  %v8006_v0 = vmax.f32 %v3748_v19, %v3749_v57  ;;  %v3823_v53 = vmax.f32 %v3821_v5, %v3822_v42  ;;  %v3829_v18 = vrot.slane %v3828_v52, 4  ;;  %v3836_v62 = vrot.slane %v3835_v55, 4 }
 0x38a   : > { %4491 = vrot.lane.b32.xlu1 %v7716_v12, %s5696_s25  ;;  %v3756_v24 = vrot.slane %v7986_v13, 1  ;;  %v3842_v2 = vsel %vm8498_vm15, %v2823_v61, -inf  ;;  %v2790_v48 = vcombine.high %v2240_v38, %v2240_v38  ;;  %v2797_v49 = vrot.slane %v2240_v38, %v8410_v60  ;;  %v8028_v61 = vld [vmem:[#allocation3 + $0x97] sm:$0xff] }
 0x38b   : > { %v3824_v46 = vrot.slane %v3823_v53, 2  ;;  %v3830_v9 = vmax.f32 %v3828_v52, %v3829_v18  ;;  %v3837_v7 = vmax.f32 %v3835_v55, %v3836_v62  ;;  %v3843_v63 = vrot.slane %v3842_v2, 4  ;;  %v8030_v52 = vld [vmem:[#allocation3 + $0x98] sm:$0xff] }
 0x38c   : > { %v3763_v12 = vrot.slane %v7998_v25, 1  ;;  %v2804_v37 = vrot.slane %v2790_v48, %v8410_v60  ;;  %v2805_v43 = vcombine.high %v2797_v49, %v2797_v49  ;;  %v3793_v4 = vsel %vm8499_vm0, %v2797_v49, -inf }
 0x38d   : > { %4337 = vrot.lane.b32.xlu0 %v8011_v8, %s5692_s11  ;;  %v3825_v51 = vmax.f32 %v3823_v53, %v3824_v46  ;;  %v3831_v16 = vrot.slane %v3830_v9, 2  ;;  %v3838_v47 = vrot.slane %v3837_v7, 2  ;;  %v3844_v34 = vmax.f32 %v3842_v2, %v3843_v63 }
 0x38e   : > { %4399 = vrot.lane.b32.xlu1 %v7968_v41, %s5693_s12  ;;  %v2806_v54 = vcombine.high %v2804_v37, %v2804_v37  ;;  %v3794_v15 = vrot.slane %v3793_v4, 4  ;;  %v3800_v20 = vsel %vm8500_vm14, %v2805_v43, -inf  ;;  %v3807_v1 = vsel %vm8501_vm9, %v2804_v37, -inf  ;;  %v4366_v32 = vpop.permute.xlu0 %4365 }
 0x38f   : > { %v3826_v35 = vrot.slane %v3825_v51, 1  ;;  %v3832_v22 = vmax.f32 %v3830_v9, %v3831_v16  ;;  %v3839_v59 = vmax.f32 %v3837_v7, %v3838_v47  ;;  %v3845_v19 = vrot.slane %v3844_v34, 2  ;;  %v4398_v56 = vpop.permute.xlu1 %4397 }
 0x390   : > { %v3795_v50 = vmax.f32 %v3793_v4, %v3794_v15  ;;  %v3801_v27 = vrot.slane %v3800_v20, 4  ;;  %v3808_v45 = vrot.slane %v3807_v1, 4  ;;  %v3814_v31 = vsel %vm8502_vm12, %v2806_v54, -inf }
 0x391   : > { %4461 = vrot.lane.b32.xlu0 %v7970_v3, %s5695_s23  ;;  %v3827_v39 = vmax.f32 %v3825_v51, %v3826_v35  ;;  %v3833_v17 = vrot.slane %v3832_v22, 1  ;;  %v3840_v58 = vrot.slane %v3839_v59, 1  ;;  %v3846_v26 = vmax.f32 %v3844_v34, %v3845_v19 }
 0x392   : > { %4523 = vrot.lane.b32.xlu1 %v7757_v6, %s5697_s26  ;;  %v3796_v14 = vrot.slane %v3795_v50, 2  ;;  %v3802_v30 = vmax.f32 %v3800_v20, %v3801_v27  ;;  %v3809_v57 = vmax.f32 %v3807_v1, %v3808_v45  ;;  %v3815_v29 = vrot.slane %v3814_v31, 4  ;;  %v4490_v63 = vpop.permute.xlu0 %4489 }
 0x393   : > { %v3834_v10 = vmax.f32 %v3832_v22, %v3833_v17  ;;  %v3841_v5 = vmax.f32 %v3839_v59, %v3840_v58  ;;  %v3847_v38 = vrot.slane %v3846_v26, 1  ;;  %v4031_v42 = vsel %vm3849_vm13, %v3827_v39, -inf  ;;  %v4522_v16 = vpop.permute.xlu1 %4521 }
 0x394   : > { %v4032_v6 = vmax.f32 %v7981_v40, %v4031_v42  ;;  %v3797_v55 = vmax.f32 %v3795_v50, %v3796_v14  ;;  %v3803_v53 = vrot.slane %v3802_v30, 2  ;;  %v3810_v18 = vrot.slane %v3809_v57, 2  ;;  %v8083_v14 = vld [vmem:[#allocation3 + $0xaf] sm:$0xff] }
 0x395   : > { %4369 = vrot.lane.b32.xlu0 %v8028_v61, %s5689_s16  ;;  %v3848_v62 = vmax.f32 %v3846_v26, %v3847_v38  ;;  %v4034_v2 = vsel %vm3849_vm13, %v3834_v10, -inf  ;;  %v4037_v48 = vsel %vm3849_vm13, %v3841_v5, -inf  ;;  %v3816_v49 = vmax.f32 %v3814_v31, %v3815_v29  ;;  %v4237_v29 = vld [vmem:[#allocation3 + $0xb1] sm:$0xff]  ;;  %v4270_v38 = vld [vmem:[#allocation3 + $0xdf] sm:$0xff] }
 0x396   : > { %4401 = vrot.lane.b32.xlu1 %v8030_v52, %s5693_s12  ;;  %v4035_v46 = vmax.f32 %v7984_v36, %v4034_v2  ;;  %v4038_v9 = vmax.f32 %v7991_v23, %v4037_v48  ;;  %v3798_v40 = vrot.slane %v3797_v55, 1  ;;  %v3804_v7 = vmax.f32 %v3802_v30, %v3803_v53 }
 0x397   : > { %v4040_v37 = vsel %vm3849_vm13, %v3848_v62, -inf  ;;  %v3811_v43 = vmax.f32 %v3809_v57, %v3810_v18  ;;  %v3817_v4 = vrot.slane %v3816_v49, 2  ;;  %v4563_v51 = vsel %vm1878_vm11, %v7691_v21, %v4366_v32  ;;  %v4336_v53 = vpop.permute.xlu1 %4335 }
 0x398   : > { %v4041_v47 = vmax.f32 %v7994_v33, %v4040_v37  ;;  %v3799_v34 = vmax.f32 %v3797_v55, %v3798_v40  ;;  %v3805_v54 = vrot.slane %v3804_v7, 1  ;;  %v8046_v15 = vsel %vm4568_vm10, %v4563_v51, %v4398_v56  ;;  %v4229_v56 = vld [vmem:[#allocation3 + $0xb0] sm:$0xff]  ;;  %v4304_v55 = vpop.permute.xlu0 %4303 }
 0x399   : > { %4493 = vrot.lane.b32.xlu0 %v7968_v41, %s5696_s25  ;;  %v3757_v36 = vmax.f32 %v7986_v13, %v3756_v24  ;;  %v3812_v23 = vrot.slane %v3811_v43, 1  ;;  %v3818_v21 = vmax.f32 %v3816_v49, %v3817_v4  ;;  %v4597_v33 = vsel %vm4595_vm8, %v7973_v44, %v4490_v63  ;;  %v4236_v24 = vld [vmem:[#allocation3 + $0x99] sm:$0xff] }
 0x39a   : > { %4525 = vrot.lane.b32.xlu1 %v8011_v8, %s5697_s26  ;;  %v4018_v20 = vsel %vm3849_vm13, %v7996_v11, -inf  ;;  %v3806_v1 = vmax.f32 %v3804_v7, %v3805_v54  ;;  %v4019_v35 = vsel %vm3849_vm13, %v3799_v34, -inf  ;;  %vm8503_vm6 = vcmask 523264  }
 0x39b   : > { %v4606_v41 = vsel %vm8503_vm6, %v4597_v33, %v4522_v16  ;;  %v3764_v22 = vmax.f32 %v7998_v25, %v3763_v12  ;;  %v3813_v59 = vmax.f32 %v3811_v43, %v3812_v23  ;;  %v3819_v19 = vrot.slane %v3818_v21, 1  ;;  %v4460_v62 = vpop.permute.xlu1 %4459  ;;  %vm8510_vm12 = vmmov %vm8503_vm6 }
 0x39c   : > { %v4020_v13 = vmax.f32 %v4018_v20, %v4019_v35  ;;  %vm8504_vm4 = vcmask 588800   ;;  %v4021_v44 = vsel %vm3849_vm13, %v8006_v0, -inf  ;;  %v4022_v11 = vsel %vm3849_vm13, %v3806_v1, -inf  ;;  %v4428_v18 = vpop.permute.xlu0 %4427 }
 0x39d   : > { %5505 = vmatmul.mubr.msk.f32.vlgmr.msra.gmra.mrb[12].mxu1 %vm8504_vm4, %v4606_v41  ;;  %4307 = vrot.lane.b32.xlu0 %v8030_v52, %s5691_s10  ;;  %v4024_v50 = vsel %vm3849_vm13, %v3757_v36, -inf  ;;  %v3820_v27 = vmax.f32 %v3818_v21, %v3819_v19  ;;  %v4023_v25 = vmax.f32 %v4021_v44, %v4022_v11  ;;  %v4025_v12 = vsel %vm3849_vm13, %v3813_v59, -inf  ;;  %vm8511_vm6 = vmmov %vm8504_vm4  ;;  %v5615_v59 = vld [vmem:[#allocation3 + $0x67] sm:$0xff] }
 0x39e   : > { %4339 = vrot.lane.b32.xlu1 %v4236_v24, %s5692_s11  ;;  %v4026_v45 = vmax.f32 %v4024_v50, %v4025_v12  ;;  %v4027_v31 = vsel %vm3849_vm13, %v3764_v22, -inf  ;;  %vm8505_vm1 = vcmask 1041409   ;;  %vm8506_vm15 = vcmask 1044484   ;;  %vm8512_vm4 = vmmov %vm8510_vm12 }
 0x39f   : > { %v4028_v32 = vsel %vm3849_vm13, %v3820_v27, -inf  ;;  %v4190_v0 = vsel %vm8505_vm1, %v4023_v25, %v4020_v13  ;;  %vm8507_vm0 = vcmask 1045509   ;;  %vm8508_vm14 = vcmask 1046534   ;;  %vm8513_vm1 = vmmov %vm8511_vm6 }
 0x3a0   : > { %v4029_v39 = vmax.f32 %v4027_v31, %v4028_v32  ;;  %v4191_v17 = vsel %vm4136_vm2, %v4026_v45, %v4190_v0  ;;  %vm8509_vm9 = vcmask 1047559   ;;  %v4547_v19 = vsel %vm3849_vm13, %v5615_v59, %v4304_v55 }
 0x3a1   : > { %4431 = vrot.lane.b32.xlu0 %v8011_v8, %s5694_s15 }
 0x3a2   : > { %4463 = vrot.lane.b32.xlu1 %v8028_v61, %s5695_s23  ;;  %v4192_v58 = vsel %vm4138_vm3, %v4029_v39, %v4191_v17 }
 0x3a3   : > { %v4193_v26 = vsel %vm8506_vm15, %v4032_v6, %v4192_v58  ;;  %v4286_v6 = vld [vmem:[#allocation3 + $0xe1] sm:$0xff]  ;;  %vm8514_vm15 = vcmask 130048  }
 0x3a4   : > { %v4194_v30 = vsel %vm8507_vm0, %v4035_v46, %v4193_v26  ;;  %vm8515_vm0 = vmmov %vm8512_vm4 }
 0x3a5   : > { %4309 = vrot.lane.b32.xlu0 %v4229_v56, %s5691_s10  ;;  %v4195_v57 = vsel %vm8508_vm14, %v4038_v9, %v4194_v30  ;;  %v4580_v9 = vsel %vm4577_vm5, %v7694_v28, %v4428_v18  ;;  %vm8516_vm14 = vmmov %vm8513_vm1 }
 0x3a6   : > { %4371 = vrot.lane.b32.xlu1 %v8083_v14, %s5689_s16  ;;  %v4196_v8 = vsel %vm8509_vm9, %v4041_v47, %v4195_v57  ;;  %v4589_v63 = vsel %vm4586_vm7, %v4580_v9, %v4460_v62  ;;  %vm8517_vm9 = vmmov %vm8514_vm15 }
 0x3a7   : > { %4213 = vst.msk [vmem:[#allocation3 + $0xc8] sm:$0xff] %vm3849_vm13, %v4196_v8 }
 0x3a9   : > { %4433 = vrot.lane.b32.xlu0 %v4236_v24, %s5694_s15 }
 0x3aa   : > { %4495 = vrot.lane.b32.xlu1 %v8030_v52, %s5696_s25  ;;  %v4278_v52 = vld [vmem:[#allocation3 + $0xe0] sm:$0xff] }
 0x3ad   : > { %4341 = vrot.lane.b32.xlu0 %v4237_v29, %s5692_s11  ;;  %s215_s11 = sand.u32 1, %s5670_s19  }
 0x3ae   : > { %4403 = vrot.lane.b32.xlu1 %v4229_v56, %s5693_s12  ;;  %v4245_v10 = vld [vmem:[#allocation3 + $0xc7] sm:$0xff] }
 0x3af   : > { %v4261_v5 = vld [vmem:[#allocation3 + $0xc9] sm:$0xff] }
 0x3b0   : > { %v4253_v42 = vld [vmem:[#allocation3 + $0xc8] sm:$0xff] }
 0x3b1   : > { %4465 = vrot.lane.b32.xlu0 %v8083_v14, %s5695_s23 }
 0x3b2   : > { %4527 = vrot.lane.b32.xlu1 %v4236_v24, %s5697_s26  ;;  %v4556_v24 = vsel %vm8514_vm15, %v4547_v19, %v4336_v53  ;;  %vm8522_vm15 = vmmov %vm8515_vm0 }
 0x3b5   : > { %4373 = vrot.lane.b32.xlu0 %v4245_v10, %s5689_s16 }
 0x3b6   : > { %4435 = vrot.lane.b32.xlu1 %v4237_v29, %s5694_s15 }
 0x3b9   : > { %4497 = vrot.lane.b32.xlu0 %v4229_v56, %s5696_s25 }
 0x3ba   : > { %4437 = vrot.lane.b32.xlu1 %v4261_v5, %s5694_s15 }
 0x3bd   : > { %4405 = vrot.lane.b32.xlu0 %v4253_v42, %s5693_s12  ;;  %s5324_s12 = sshll.u32 %s215_s11, 4 }
 0x3be   : > { %4469 = vrot.lane.b32.xlu1 %v4270_v38, %s5695_s23  ;;  %s8196_s15 = scalar_lea.vmem [#allocation4], %s5324_s12 }
 0x3c1   : > { %4529 = vrot.lane.b32.xlu0 %v4237_v29, %s5697_s26 }
 0x3c2   : > { %4501 = vrot.lane.b32.xlu1 %v4278_v52, %s5696_s25 }
 0x3c5   : > { %4467 = vrot.lane.b32.xlu0 %v4245_v10, %s5695_s23  ;;  %s5376_s23 = sshll.u32 %s5751_s22, 8  ;;  %s8292_s22 = scalar_lea.sflag [#allocation5], %s215_s11 }
 0x3c6   : > { %4533 = vrot.lane.b32.xlu1 %v4286_v6, %s5697_s26  ;;  %s8283_s30 = scalar_lea.hbm %s8340_s5, %s5376_s23 }
 0x3c9   : > { %4499 = vrot.lane.b32.xlu0 %v4253_v42, %s5696_s25  ;;  %s5258_s25 = sshll.u32 %s8196_s15, 4  ;;  %s8285_s25 = int_to_ptr.vmem [resolvable:$true] %s5258_s25 }
 0x3ca   : > { %s5616_s6 = scalar_lea.vmem %s8285_s25, 256  ;;  %p5623_p0 = scmp.lt.s32.totalorder %s8285_s25, %s5621_s8 }
 0x3cb   : > { %p5617_p11 = scmp.ne.s32.totalorder %s8285_s25, %s5616_s6  ;;  %p5624_p1 = scmp.lt.s32.totalorder %s5622_s9, %s5616_s6 }
 0x3cd   : > { %4531 = vrot.lane.b32.xlu0 %v4261_v5, %s5697_s26  ;;  %p5618_p12 = pnand %p5617_p11, %p5768_p5  ;;  %p5625_p2 = por %p5624_p1, %p5623_p0 }
 0x3cf   : > { %p5619_p13 = pneg %p5618_p12 }
 0x3d1   : > { %p5626_p3 = pnand %p5625_p2, %p5619_p13 }
 0x3f7   : > { %v4306_v2 = vpop.permute.xlu0 %4305 }
 0x3f8   : > { %v4368_v48 = vpop.permute.xlu1 %4367  ;;  %v4548_v58 = vsel %vm3849_vm13, %v7970_v3, %v4306_v2 }
 0x3f9   : > { %v4564_v44 = vsel %vm1878_vm11, %v4556_v24, %v4368_v48 }
 0x3fb   : > { %v4430_v49 = vpop.permute.xlu0 %4429 }
 0x3fc   : > { %v4492_v46 = vpop.permute.xlu1 %4491  ;;  %v4581_v34 = vsel %vm4577_vm5, %v8046_v15, %v4430_v49 }
 0x3fd   : > { %v4598_v37 = vsel %vm4595_vm8, %v4589_v63, %v4492_v46 }
 0x3ff   : > { %v4338_v40 = vpop.permute.xlu0 %4337 }
 0x400   : > { %v4400_v7 = vpop.permute.xlu1 %4399  ;;  %v4557_v56 = vsel %vm8517_vm9, %v4548_v58, %v4338_v40 }
 0x401   : > { %v4573_v11 = vsel %vm4568_vm10, %v4564_v44, %v4400_v7 }
 0x403   : > { %v4462_v43 = vpop.permute.xlu0 %4461 }
 0x404   : > { %v4524_v4 = vpop.permute.xlu1 %4523  ;;  %v4590_v54 = vsel %vm4586_vm7, %v4581_v34, %v4462_v43  ;;  %v8166_v34 = vld [vmem:[%s8339_s4] ss:$0 sm:$0xff] }
 0x405   : > { %v4607_v51 = vsel %vm8510_vm12, %v4598_v37, %v4524_v4  ;;  %vm8518_vm12 = vmmov %vm8515_vm0 }
 0x406   : > { %5507 = vmatprep.mubr.msk.f32.mxu1 %vm8511_vm6, %v4607_v51  ;;  %vm8519_vm6 = vmmov %vm8517_vm9 }
 0x407   : > { %v4370_v16 = vpop.permute.xlu0 %4369 }
 0x408   : > { %v4402_v47 = vpop.permute.xlu1 %4401  ;;  %v4565_v57 = vsel %vm1878_vm11, %v4557_v56, %v4370_v16 }
 0x409   : > { %v4574_v29 = vsel %vm4568_vm10, %v4565_v57, %v4402_v47 }
 0x40b   : > { %v4494_v28 = vpop.permute.xlu0 %4493 }
 0x40c   : > { %v4526_v36 = vpop.permute.xlu1 %4525  ;;  %v4599_v23 = vsel %vm4595_vm8, %v4590_v54, %v4494_v28 }
 0x40d   : > { %v4608_v21 = vsel %vm8512_vm4, %v4599_v23, %v4526_v36  ;;  %vm8520_vm4 = vmmov %vm8513_vm1 }
 0x40e   : > { %5508 = vmatmul.mubr.msk.f32.gmra.mrb[14].mxu1 %vm8513_vm1, %v4608_v21  ;;  %vm8521_vm1 = vmmov %vm8519_vm6 }
 0x40f   : > { %v4308_v33 = vpop.permute.xlu0 %4307 }
 0x410   : > { %v4340_v20 = vpop.permute.xlu1 %4339  ;;  %v4549_v18 = vsel %vm3849_vm13, %v8028_v61, %v4308_v33 }
 0x411   : > { %v4558_v49 = vsel %vm8521_vm1, %v4549_v18, %v4340_v20  ;;  %vm8533_vm1 = vcmask 1041409  }
 0x413   : > { %v4432_v1 = vpop.permute.xlu0 %4431 }
 0x414   : > { %v4464_v35 = vpop.permute.xlu1 %4463  ;;  %v4582_v50 = vsel %vm4577_vm5, %v4573_v11, %v4432_v1 }
 0x415   : > { %v4591_v12 = vsel %vm4586_vm7, %v4582_v50, %v4464_v35 }
 0x417   : > { %v4310_v41 = vpop.permute.xlu0 %4309 }
 0x418   : > { %v4372_v22 = vpop.permute.xlu1 %4371  ;;  %v4550_v3 = vsel %vm3849_vm13, %v8083_v14, %v4310_v41 }
 0x419   : > { %v4566_v14 = vsel %vm1878_vm11, %v4558_v49, %v4372_v22 }
 0x41b   : > { %v4434_v15 = vpop.permute.xlu0 %4433 }
 0x41c   : > { %v4496_v13 = vpop.permute.xlu1 %4495  ;;  %v4583_v10 = vsel %vm4577_vm5, %v4574_v29, %v4434_v15 }
 0x41d   : > { %v4600_v45 = vsel %vm4595_vm8, %v4591_v12, %v4496_v13 }
 0x41f   : > { %v4342_v27 = vpop.permute.xlu0 %4341 }
 0x420   : > { %v4404_v25 = vpop.permute.xlu1 %4403  ;;  %v4559_v55 = vsel %vm8519_vm6, %v4550_v3, %v4342_v27 }
 0x421   : > { %v4575_v40 = vsel %vm4568_vm10, %v4566_v14, %v4404_v25 }
 0x423   : > { %v4466_v31 = vpop.permute.xlu0 %4465 }
 0x424   : > { %v4528_v32 = vpop.permute.xlu1 %4527  ;;  %v4592_v5 = vsel %vm4586_vm7, %v4583_v10, %v4466_v31 }
 0x425   : > { %v4609_v0 = vsel %vm8515_vm0, %v4600_v45, %v4528_v32 }
 0x426   : > { %5510 = vmatprep.mubr.msk.f32.mxu1 %vm8516_vm14, %v4609_v0  ;;  %vm8524_vm14 = vmmov %vm8520_vm4 }
 0x427   : > { %v4374_v39 = vpop.permute.xlu0 %4373 }
 0x428   : > { %v4436_v17 = vpop.permute.xlu1 %4435  ;;  %v4567_v53 = vsel %vm1878_vm11, %v4559_v55, %v4374_v39  ;;  %vm8523_vm11 = vmmov %vm8520_vm4 }
 0x429   : > { %v4584_v7 = vsel %vm4577_vm5, %v4575_v40, %v4436_v17 }
 0x42b   : > { %v4498_v26 = vpop.permute.xlu0 %4497 }
 0x42c   : > { %v4438_v30 = vpop.permute.xlu1 %4437  ;;  %v4601_v42 = vsel %vm4595_vm8, %v4592_v5, %v4498_v26 }
 0x42f   : > { %v4406_v8 = vpop.permute.xlu0 %4405 }
 0x430   : > { %v4470_v38 = vpop.permute.xlu1 %4469  ;;  %v4576_v62 = vsel %vm4568_vm10, %v4567_v53, %v4406_v8  ;;  %vm8525_vm10 = vcmask 58368  }
 0x431   : > { %v4585_v46 = vsel %vm4577_vm5, %v4576_v62, %v4438_v30  ;;  %vm8526_vm5 = vmmov %vm8525_vm10 }
 0x432   : > { %v4594_v63 = vsel %vm4586_vm7, %v4585_v46, %v4470_v38  ;;  %vm8529_vm9 = vmmov %vm8526_vm5 }
 0x433   : > { %v4530_v52 = vpop.permute.xlu0 %4529  ;;  %vm8531_vm6 = vmmov %vm8526_vm5 }
 0x434   : > { %v4610_v6 = vsel %vm8518_vm12, %v4601_v42, %v4530_v52  ;;  %v4502_v48 = vpop.permute.xlu1 %4501  ;;  %vm8530_vm12 = vmmov %vm8526_vm5 }
 0x435   : > { %5511 = vmatmul.mubr.msk.f32.gmra.mrb[16].mxu1 %vm8520_vm4, %v4610_v6  ;;  %v4603_v51 = vsel %vm4595_vm8, %v4594_v63, %v4502_v48  ;;  %vm8532_vm4 = vmmov %vm8526_vm5 }
 0x437   : > { %v4468_v2 = vpop.permute.xlu0 %4467 }
 0x438   : > { %v4593_v37 = vsel %vm4586_vm7, %v4584_v7, %v4468_v2  ;;  %v4534_v61 = vpop.permute.xlu1 %4533  ;;  %vm8527_vm7 = vmmov %vm8526_vm5 }
 0x439   : > { %v4612_v47 = vsel %vm8515_vm0, %v4603_v51, %v4534_v61  ;;  %vm8534_vm0 = vmmov %vm8532_vm4 }
 0x43b   : > { %v4500_v9 = vpop.permute.xlu0 %4499 }
 0x43c   : > { %v4602_v43 = vsel %vm4595_vm8, %v4593_v37, %v4500_v9  ;;  %vm8528_vm8 = vmmov %vm8526_vm5 }
 0x43f   : > { %v4532_v4 = vpop.permute.xlu0 %4531 }
 0x440   : > { %v4611_v16 = vsel %vm8522_vm15, %v4602_v43, %v4532_v4  ;;  %vm5239_vm15 = vcmask 60416  }
 0x441   : > { %5513 = vmatprep.mubr.msk.f32.mxu1 %vm8523_vm11, %v4611_v16  ;;  %vm8535_vm11 = vmmov %vm8534_vm0 }
 0x442   : > { %5514 = vmatmul.mubr.msk.f32.gmra.mrb[18].mxu1 %vm8524_vm14, %v4612_v47  ;;  %vm8536_vm14 = vmmov %vm8534_vm0 }
 0x470   : > { %v5506_v54 = vpop.f32.mrb[12].mxu1 }
 0x471   : > { %v4726_v28 = vadd.f32 %v5506_v54, %v8166_v34  ;;  %v4720_v36 = vpop.f32.mrb[13].mxu1 }
 0x472   : > { %v4721_v23 = vadd.f32 %v8166_v34, %v4720_v36 }
 0x473   : > { %v4784_v21 = vcombine.high %v4726_v28, %v4726_v28  ;;  %v4791_v33 = vrot.slane %v4726_v28, %v8410_v60 }
 0x474   : > { %v4767_v20 = vcombine.high %v4721_v23, %v4721_v23  ;;  %v4774_v1 = vrot.slane %v4721_v23, %v8410_v60 }
 0x475   : > { %v4798_v35 = vrot.slane %v4784_v21, %v8410_v60  ;;  %v4799_v41 = vcombine.high %v4791_v33, %v4791_v33  ;;  %v4963_v22 = vsel %vm8525_vm10, %v4791_v33, -inf  ;;  %vm8537_vm10 = vmmov %vm8534_vm0 }
 0x476   : > { %v4964_v59 = vrot.slane %v4963_v22, 4  ;;  %v4781_v19 = vrot.slane %v4767_v20, %v8410_v60  ;;  %v4782_v15 = vcombine.high %v4774_v1, %v4774_v1  ;;  %v4935_v13 = vsel %vm8526_vm5, %v4774_v1, -inf  ;;  %vm8538_vm5 = vmmov %vm8534_vm0 }
 0x477   : > { %v4800_v24 = vcombine.high %v4798_v35, %v4798_v35  ;;  %v4970_v44 = vsel %vm8527_vm7, %v4799_v41, -inf  ;;  %v4977_v11 = vsel %vm8528_vm8, %v4798_v35, -inf  ;;  %v4936_v50 = vrot.slane %v4935_v13, 4  ;;  %vm8539_vm7 = vmmov %vm8534_vm0 }
 0x478   : > { %v4965_v27 = vmax.f32 %v4963_v22, %v4964_v59  ;;  %v4971_v25 = vrot.slane %v4970_v44, 4  ;;  %v4978_v12 = vrot.slane %v4977_v11, 4  ;;  %v4783_v45 = vcombine.high %v4781_v19, %v4781_v19  ;;  %vm8540_vm8 = vmmov %vm8534_vm0 }
 0x479   : > { %v4984_v31 = vsel %vm8529_vm9, %v4800_v24, -inf  ;;  %v4937_v32 = vmax.f32 %v4935_v13, %v4936_v50  ;;  %v4942_v0 = vsel %vm8530_vm12, %v4782_v15, -inf  ;;  %v4949_v39 = vsel %vm8531_vm6, %v4781_v19, -inf  ;;  %vm8541_vm9 = vmmov %vm8534_vm0 }
 0x47a   : > { %v4966_v17 = vrot.slane %v4965_v27, 2  ;;  %v4972_v58 = vmax.f32 %v4970_v44, %v4971_v25  ;;  %v4979_v26 = vmax.f32 %v4977_v11, %v4978_v12  ;;  %v4985_v56 = vrot.slane %v4984_v31, 4  ;;  %vm8542_vm12 = vmmov %vm8533_vm1 }
 0x47b   : > { %v4938_v30 = vrot.slane %v4937_v32, 2  ;;  %v4943_v57 = vrot.slane %v4942_v0, 4  ;;  %v4950_v8 = vrot.slane %v4949_v39, 4  ;;  %v4956_v29 = vsel %vm8532_vm4, %v4783_v45, -inf  ;;  %vm8543_vm6 = vmmov %vm8534_vm0 }
 0x47c   : > { %v4967_v10 = vmax.f32 %v4965_v27, %v4966_v17  ;;  %v4973_v5 = vrot.slane %v4972_v58, 2  ;;  %v4980_v38 = vrot.slane %v4979_v26, 2  ;;  %v4986_v42 = vmax.f32 %v4984_v31, %v4985_v56  ;;  %vm8544_vm4 = vmmov %vm8534_vm0 }
 0x47d   : > { %v4939_v52 = vmax.f32 %v4937_v32, %v4938_v30  ;;  %v4944_v3 = vmax.f32 %v4942_v0, %v4943_v57  ;;  %v4951_v6 = vmax.f32 %v4949_v39, %v4950_v8  ;;  %v4957_v55 = vrot.slane %v4956_v29, 4 }
 0x47e   : > { %v4968_v53 = vrot.slane %v4967_v10, 1  ;;  %v4974_v18 = vmax.f32 %v4972_v58, %v4973_v5  ;;  %v4981_v62 = vmax.f32 %v4979_v26, %v4980_v38  ;;  %v4987_v2 = vrot.slane %v4986_v42, 2 }
 0x47f   : > { %v4940_v48 = vrot.slane %v4939_v52, 1  ;;  %v4945_v49 = vrot.slane %v4944_v3, 2  ;;  %v4952_v46 = vrot.slane %v4951_v6, 2  ;;  %v4958_v14 = vmax.f32 %v4956_v29, %v4957_v55 }
 0x480   : > { %v4969_v9 = vmax.f32 %v4967_v10, %v4968_v53  ;;  %v4975_v40 = vrot.slane %v4974_v18, 1  ;;  %v4982_v7 = vrot.slane %v4981_v62, 1  ;;  %v4988_v63 = vmax.f32 %v4986_v42, %v4987_v2 }
 0x481   : > { %v4941_v37 = vmax.f32 %v4939_v52, %v4940_v48  ;;  %v4946_v61 = vmax.f32 %v4944_v3, %v4945_v49  ;;  %v4953_v43 = vmax.f32 %v4951_v6, %v4952_v46  ;;  %v4959_v4 = vrot.slane %v4958_v14, 2 }
 0x482   : > { %v4976_v51 = vmax.f32 %v4974_v18, %v4975_v40  ;;  %v4983_v16 = vmax.f32 %v4981_v62, %v4982_v7  ;;  %v4989_v47 = vrot.slane %v4988_v63, 1  ;;  %v5160_v54 = vsel %vm3849_vm13, %v4969_v9, -inf }
 0x483   : > { %v4947_v28 = vrot.slane %v4946_v61, 1  ;;  %v4954_v36 = vrot.slane %v4953_v43, 1  ;;  %v4960_v23 = vmax.f32 %v4958_v14, %v4959_v4  ;;  %v5159_v21 = vsel %vm3849_vm13, %v4941_v37, -inf }
 0x484   : > { %v4990_v33 = vmax.f32 %v4988_v63, %v4989_v47  ;;  %v5163_v20 = vsel %vm3849_vm13, %v4976_v51, -inf  ;;  %v5161_v1 = vmax.f32 %v5159_v21, %v5160_v54  ;;  %v5166_v35 = vsel %vm3849_vm13, %v4983_v16, -inf }
 0x485   : > { %v4948_v41 = vmax.f32 %v4946_v61, %v4947_v28  ;;  %v4955_v22 = vmax.f32 %v4953_v43, %v4954_v36  ;;  %v4961_v59 = vrot.slane %v4960_v23, 1 }
 0x486   : > { %v5169_v19 = vsel %vm3849_vm13, %v4990_v33, -inf }
 0x487   : > { %v4962_v15 = vmax.f32 %v4960_v23, %v4961_v59  ;;  %v5162_v13 = vsel %vm3849_vm13, %v4948_v41, -inf  ;;  %v5165_v24 = vsel %vm3849_vm13, %v4955_v22, -inf }
 0x488   : > { %v5164_v44 = vmax.f32 %v5162_v13, %v5163_v20  ;;  %v5167_v11 = vmax.f32 %v5165_v24, %v5166_v35 }
 0x489   : > { %v5168_v50 = vsel %vm3849_vm13, %v4962_v15, -inf }
 0x48a   : > { %v5170_v27 = vmax.f32 %v5168_v50, %v5169_v19  ;;  %v5223_v25 = vsel %vm8533_vm1, %v5164_v44, %v5161_v1  ;;  %vm8545_vm1 = vmmov %vm8534_vm0 }
 0x48b   : > { %v5224_v12 = vsel %vm4136_vm2, %v5167_v11, %v5223_v25 }
 0x48c   : > { %v5225_v45 = vsel %vm4138_vm3, %v5170_v27, %v5224_v12 }
 0x48d   : > { %5240 = vst.msk [vmem:[%s8196_s15] sm:$0xf] %vm5239_vm15, %v5225_v45 }
 0x4e1   : > { %v5509_v31 = vpop.f32.mrb[14].mxu1 }
 0x4e2   : > { %v4736_v32 = vadd.f32 %v5509_v31, %v8166_v34  ;;  %v4730_v0 = vpop.f32.mrb[15].mxu1 }
 0x4e3   : > { %v4731_v39 = vadd.f32 %v8166_v34, %v4730_v0 }
 0x4e4   : > { %v4818_v17 = vcombine.high %v4736_v32, %v4736_v32  ;;  %v4825_v58 = vrot.slane %v4736_v32, %v8410_v60 }
 0x4e5   : > { %v4801_v26 = vcombine.high %v4731_v39, %v4731_v39  ;;  %v4808_v56 = vrot.slane %v4731_v39, %v8410_v60 }
 0x4e6   : > { %v4832_v30 = vrot.slane %v4818_v17, %v8410_v60  ;;  %v4833_v57 = vcombine.high %v4825_v58, %v4825_v58  ;;  %v5019_v8 = vsel %vm8534_vm0, %v4825_v58, -inf }
 0x4e7   : > { %v5020_v29 = vrot.slane %v5019_v8, 4  ;;  %v4815_v10 = vrot.slane %v4801_v26, %v8410_v60  ;;  %v4816_v5 = vcombine.high %v4808_v56, %v4808_v56  ;;  %v4991_v38 = vsel %vm8535_vm11, %v4808_v56, -inf  ;;  %vm8546_vm11 = vmmov %vm8534_vm0 }
 0x4e8   : > { %v4834_v42 = vcombine.high %v4832_v30, %v4832_v30  ;;  %v5026_v52 = vsel %vm8536_vm14, %v4833_v57, -inf  ;;  %v5033_v3 = vsel %vm8537_vm10, %v4832_v30, -inf  ;;  %v4992_v6 = vrot.slane %v4991_v38, 4  ;;  %vm8547_vm14 = vmmov %vm8534_vm0 }
 0x4e9   : > { %v5021_v55 = vmax.f32 %v5019_v8, %v5020_v29  ;;  %v5027_v53 = vrot.slane %v5026_v52, 4  ;;  %v5034_v18 = vrot.slane %v5033_v3, 4  ;;  %v4817_v62 = vcombine.high %v4815_v10, %v4815_v10  ;;  %vm8548_vm10 = vmmov %vm8534_vm0 }
 0x4ea   : > { %v5040_v2 = vsel %vm8538_vm5, %v4834_v42, -inf  ;;  %v4993_v48 = vmax.f32 %v4991_v38, %v4992_v6  ;;  %v4998_v49 = vsel %vm8539_vm7, %v4816_v5, -inf  ;;  %v5005_v46 = vsel %vm8540_vm8, %v4815_v10, -inf  ;;  %vm8549_vm5 = vmmov %vm8534_vm0 }
 0x4eb   : > { %v5022_v14 = vrot.slane %v5021_v55, 2  ;;  %v5028_v9 = vmax.f32 %v5026_v52, %v5027_v53  ;;  %v5035_v40 = vmax.f32 %v5033_v3, %v5034_v18  ;;  %v5041_v7 = vrot.slane %v5040_v2, 4  ;;  %vm8550_vm7 = vmmov %vm8542_vm12 }
 0x4ec   : > { %v4994_v63 = vrot.slane %v4993_v48, 2  ;;  %v4999_v37 = vrot.slane %v4998_v49, 4  ;;  %v5006_v61 = vrot.slane %v5005_v46, 4  ;;  %v5012_v43 = vsel %vm8541_vm9, %v4817_v62, -inf  ;;  %vm8551_vm8 = vmmov %vm8534_vm0 }
 0x4ed   : > { %v5023_v4 = vmax.f32 %v5021_v55, %v5022_v14  ;;  %v5029_v51 = vrot.slane %v5028_v9, 2  ;;  %v5036_v16 = vrot.slane %v5035_v40, 2  ;;  %v5042_v47 = vmax.f32 %v5040_v2, %v5041_v7  ;;  %vm8552_vm9 = vmmov %vm8534_vm0 }
 0x4ee   : > { %v4995_v54 = vmax.f32 %v4993_v48, %v4994_v63  ;;  %v5000_v28 = vmax.f32 %v4998_v49, %v4999_v37  ;;  %v5007_v36 = vmax.f32 %v5005_v46, %v5006_v61  ;;  %v5013_v23 = vrot.slane %v5012_v43, 4 }
 0x4ef   : > { %v5024_v21 = vrot.slane %v5023_v4, 1  ;;  %v5030_v33 = vmax.f32 %v5028_v9, %v5029_v51  ;;  %v5037_v20 = vmax.f32 %v5035_v40, %v5036_v16  ;;  %v5043_v1 = vrot.slane %v5042_v47, 2 }
 0x4f0   : > { %v4996_v35 = vrot.slane %v4995_v54, 1  ;;  %v5001_v41 = vrot.slane %v5000_v28, 2  ;;  %v5008_v22 = vrot.slane %v5007_v36, 2  ;;  %v5014_v59 = vmax.f32 %v5012_v43, %v5013_v23 }
 0x4f1   : > { %v5025_v19 = vmax.f32 %v5023_v4, %v5024_v21  ;;  %v5031_v15 = vrot.slane %v5030_v33, 1  ;;  %v5038_v13 = vrot.slane %v5037_v20, 1  ;;  %v5044_v24 = vmax.f32 %v5042_v47, %v5043_v1 }
 0x4f2   : > { %v4997_v44 = vmax.f32 %v4995_v54, %v4996_v35  ;;  %v5002_v11 = vmax.f32 %v5000_v28, %v5001_v41  ;;  %v5009_v50 = vmax.f32 %v5007_v36, %v5008_v22  ;;  %v5015_v27 = vrot.slane %v5014_v59, 2 }
 0x4f3   : > { %v5032_v25 = vmax.f32 %v5030_v33, %v5031_v15  ;;  %v5039_v12 = vmax.f32 %v5037_v20, %v5038_v13  ;;  %v5045_v45 = vrot.slane %v5044_v24, 1  ;;  %v5172_v31 = vsel %vm3849_vm13, %v5025_v19, -inf }
 0x4f4   : > { %v5003_v32 = vrot.slane %v5002_v11, 1  ;;  %v5010_v0 = vrot.slane %v5009_v50, 1  ;;  %v5016_v39 = vmax.f32 %v5014_v59, %v5015_v27  ;;  %v5171_v17 = vsel %vm3849_vm13, %v4997_v44, -inf }
 0x4f5   : > { %v5046_v58 = vmax.f32 %v5044_v24, %v5045_v45  ;;  %v5175_v26 = vsel %vm3849_vm13, %v5032_v25, -inf  ;;  %v5173_v56 = vmax.f32 %v5171_v17, %v5172_v31  ;;  %v5178_v30 = vsel %vm3849_vm13, %v5039_v12, -inf }
 0x4f6   : > { %v5004_v57 = vmax.f32 %v5002_v11, %v5003_v32  ;;  %v5011_v8 = vmax.f32 %v5009_v50, %v5010_v0  ;;  %v5017_v29 = vrot.slane %v5016_v39, 1 }
 0x4f7   : > { %v5181_v10 = vsel %vm3849_vm13, %v5046_v58, -inf }
 0x4f8   : > { %v5018_v5 = vmax.f32 %v5016_v39, %v5017_v29  ;;  %v5174_v38 = vsel %vm3849_vm13, %v5004_v57, -inf  ;;  %v5177_v42 = vsel %vm3849_vm13, %v5011_v8, -inf }
 0x4f9   : > { %v5176_v52 = vmax.f32 %v5174_v38, %v5175_v26  ;;  %v5179_v3 = vmax.f32 %v5177_v42, %v5178_v30 }
 0x4fa   : > { %v5180_v6 = vsel %vm3849_vm13, %v5018_v5, -inf }
 0x4fb   : > { %v5182_v55 = vmax.f32 %v5180_v6, %v5181_v10  ;;  %v5226_v53 = vsel %vm8542_vm12, %v5176_v52, %v5173_v56  ;;  %vm8553_vm12 = vmmov %vm8534_vm0 }
 0x4fc   : > { %v5227_v18 = vsel %vm4136_vm2, %v5179_v3, %v5226_v53 }
 0x4fd   : > { %v5228_v62 = vsel %vm4138_vm3, %v5182_v55, %v5227_v18 }
 0x4fe   : > { %5241 = vst.msk [vmem:[%s8196_s15 + $0x4] sm:$0xf] %vm5239_vm15, %v5228_v62 }
 0x508   : > { %v5512_v2 = vpop.f32.mrb[16].mxu1 }
 0x509   : > { %v4746_v48 = vadd.f32 %v5512_v2, %v8166_v34  ;;  %v4740_v49 = vpop.f32.mrb[17].mxu1 }
 0x50a   : > { %v4741_v46 = vadd.f32 %v8166_v34, %v4740_v49 }
 0x50b   : > { %v4852_v14 = vcombine.high %v4746_v48, %v4746_v48  ;;  %v4859_v9 = vrot.slane %v4746_v48, %v8410_v60 }
 0x50c   : > { %v4835_v40 = vcombine.high %v4741_v46, %v4741_v46  ;;  %v4842_v7 = vrot.slane %v4741_v46, %v8410_v60 }
 0x50d   : > { %v4866_v63 = vrot.slane %v4852_v14, %v8410_v60  ;;  %v4867_v37 = vcombine.high %v4859_v9, %v4859_v9  ;;  %v5075_v61 = vsel %vm8543_vm6, %v4859_v9, -inf  ;;  %vm8554_vm6 = vmmov %vm8534_vm0 }
 0x50e   : > { %v5076_v43 = vrot.slane %v5075_v61, 4  ;;  %v4849_v4 = vrot.slane %v4835_v40, %v8410_v60  ;;  %v4850_v51 = vcombine.high %v4842_v7, %v4842_v7  ;;  %v5047_v16 = vsel %vm8544_vm4, %v4842_v7, -inf  ;;  %vm8555_vm4 = vmmov %vm8534_vm0 }
 0x50f   : > { %v4868_v47 = vcombine.high %v4866_v63, %v4866_v63  ;;  %v5082_v54 = vsel %vm8545_vm1, %v4867_v37, -inf  ;;  %v5089_v28 = vsel %vm8534_vm0, %v4866_v63, -inf  ;;  %v5048_v36 = vrot.slane %v5047_v16, 4  ;;  %vm8556_vm1 = vmmov %vm8534_vm0 }
 0x510   : > { %v5077_v23 = vmax.f32 %v5075_v61, %v5076_v43  ;;  %v5083_v21 = vrot.slane %v5082_v54, 4  ;;  %v5090_v33 = vrot.slane %v5089_v28, 4  ;;  %v4851_v20 = vcombine.high %v4849_v4, %v4849_v4 }
 0x511   : > { %v5096_v1 = vsel %vm8546_vm11, %v4868_v47, -inf  ;;  %v5049_v35 = vmax.f32 %v5047_v16, %v5048_v36  ;;  %v5054_v41 = vsel %vm8547_vm14, %v4850_v51, -inf  ;;  %v5061_v22 = vsel %vm8548_vm10, %v4849_v4, -inf  ;;  %vm8557_vm11 = vmmov %vm8534_vm0 }
 0x512   : > { %v5078_v59 = vrot.slane %v5077_v23, 2  ;;  %v5084_v19 = vmax.f32 %v5082_v54, %v5083_v21  ;;  %v5091_v15 = vmax.f32 %v5089_v28, %v5090_v33  ;;  %v5097_v13 = vrot.slane %v5096_v1, 4  ;;  %vm8558_vm14 = vmmov %vm8550_vm7 }
 0x513   : > { %v5050_v24 = vrot.slane %v5049_v35, 2  ;;  %v5055_v44 = vrot.slane %v5054_v41, 4  ;;  %v5062_v11 = vrot.slane %v5061_v22, 4  ;;  %v5068_v50 = vsel %vm8549_vm5, %v4851_v20, -inf }
 0x514   : > { %v5079_v27 = vmax.f32 %v5077_v23, %v5078_v59  ;;  %v5085_v25 = vrot.slane %v5084_v19, 2  ;;  %v5092_v12 = vrot.slane %v5091_v15, 2  ;;  %v5098_v45 = vmax.f32 %v5096_v1, %v5097_v13 }
 0x515   : > { %v5051_v31 = vmax.f32 %v5049_v35, %v5050_v24  ;;  %v5056_v32 = vmax.f32 %v5054_v41, %v5055_v44  ;;  %v5063_v0 = vmax.f32 %v5061_v22, %v5062_v11  ;;  %v5069_v39 = vrot.slane %v5068_v50, 4  ;;  %v5515_v17 = vpop.f32.mrb[18].mxu1 }
 0x516   : > { %v5080_v58 = vrot.slane %v5079_v27, 1  ;;  %v5086_v26 = vmax.f32 %v5084_v19, %v5085_v25  ;;  %v5093_v56 = vmax.f32 %v5091_v15, %v5092_v12  ;;  %v5099_v30 = vrot.slane %v5098_v45, 2  ;;  %v4750_v57 = vpop.f32.mrb[19].mxu1 }
 0x517   : > { %v5052_v8 = vrot.slane %v5051_v31, 1  ;;  %v5057_v29 = vrot.slane %v5056_v32, 2  ;;  %v5064_v10 = vrot.slane %v5063_v0, 2  ;;  %v5070_v5 = vmax.f32 %v5068_v50, %v5069_v39 }
 0x518   : > { %v5081_v38 = vmax.f32 %v5079_v27, %v5080_v58  ;;  %v5087_v42 = vrot.slane %v5086_v26, 1  ;;  %v5094_v52 = vrot.slane %v5093_v56, 1  ;;  %v5100_v3 = vmax.f32 %v5098_v45, %v5099_v30 }
 0x519   : > { %v5053_v6 = vmax.f32 %v5051_v31, %v5052_v8  ;;  %v5058_v55 = vmax.f32 %v5056_v32, %v5057_v29  ;;  %v5065_v53 = vmax.f32 %v5063_v0, %v5064_v10  ;;  %v5071_v18 = vrot.slane %v5070_v5, 2 }
 0x51a   : > { %v5088_v62 = vmax.f32 %v5086_v26, %v5087_v42  ;;  %v5095_v2 = vmax.f32 %v5093_v56, %v5094_v52  ;;  %v5101_v48 = vrot.slane %v5100_v3, 1  ;;  %v5184_v49 = vsel %vm3849_vm13, %v5081_v38, -inf }
 0x51b   : > { %v5059_v46 = vrot.slane %v5058_v55, 1  ;;  %v5066_v14 = vrot.slane %v5065_v53, 1  ;;  %v5072_v9 = vmax.f32 %v5070_v5, %v5071_v18  ;;  %v5183_v40 = vsel %vm3849_vm13, %v5053_v6, -inf }
 0x51c   : > { %v5102_v7 = vmax.f32 %v5100_v3, %v5101_v48  ;;  %v5187_v63 = vsel %vm3849_vm13, %v5088_v62, -inf  ;;  %v5190_v37 = vsel %vm3849_vm13, %v5095_v2, -inf  ;;  %v5185_v61 = vmax.f32 %v5183_v40, %v5184_v49 }
 0x51d   : > { %v5060_v43 = vmax.f32 %v5058_v55, %v5059_v46  ;;  %v5067_v4 = vmax.f32 %v5065_v53, %v5066_v14  ;;  %v5073_v51 = vrot.slane %v5072_v9, 1  ;;  %v4756_v16 = vadd.f32 %v5515_v17, %v8166_v34 }
 0x51e   : > { %v5193_v47 = vsel %vm3849_vm13, %v5102_v7, -inf  ;;  %v4751_v54 = vadd.f32 %v8166_v34, %v4750_v57 }
 0x51f   : > { %v5074_v28 = vmax.f32 %v5072_v9, %v5073_v51  ;;  %v5186_v36 = vsel %vm3849_vm13, %v5060_v43, -inf  ;;  %v5189_v23 = vsel %vm3849_vm13, %v5067_v4, -inf  ;;  %v4886_v21 = vcombine.high %v4756_v16, %v4756_v16 }
 0x520   : > { %v5188_v33 = vmax.f32 %v5186_v36, %v5187_v63  ;;  %v5191_v20 = vmax.f32 %v5189_v23, %v5190_v37  ;;  %v4893_v1 = vrot.slane %v4756_v16, %v8410_v60  ;;  %v4869_v35 = vcombine.high %v4751_v54, %v4751_v54 }
 0x521   : > { %v5192_v41 = vsel %vm3849_vm13, %v5074_v28, -inf  ;;  %v4900_v22 = vrot.slane %v4886_v21, %v8410_v60  ;;  %v4876_v59 = vrot.slane %v4751_v54, %v8410_v60 }
 0x522   : > { %v5194_v19 = vmax.f32 %v5192_v41, %v5193_v47  ;;  %v5229_v34 = vsel %vm8550_vm7, %v5188_v33, %v5185_v61  ;;  %v4901_v15 = vcombine.high %v4893_v1, %v4893_v1  ;;  %v5131_v13 = vsel %vm8551_vm8, %v4893_v1, -inf }
 0x523   : > { %v5230_v24 = vsel %vm4136_vm2, %v5191_v20, %v5229_v34  ;;  %v4902_v44 = vcombine.high %v4900_v22, %v4900_v22  ;;  %v5132_v11 = vrot.slane %v5131_v13, 4  ;;  %v5145_v50 = vsel %vm8552_vm9, %v4900_v22, -inf }
 0x524   : > { %v5231_v27 = vsel %vm4138_vm3, %v5194_v19, %v5230_v24  ;;  %v5138_v25 = vsel %vm8553_vm12, %v4901_v15, -inf  ;;  %v5146_v12 = vrot.slane %v5145_v50, 4  ;;  %v4883_v45 = vrot.slane %v4869_v35, %v8410_v60 }
 0x525   : > { %v5133_v31 = vmax.f32 %v5131_v13, %v5132_v11  ;;  %v5139_v32 = vrot.slane %v5138_v25, 4  ;;  %v5152_v0 = vsel %vm8554_vm6, %v4902_v44, -inf  ;;  %v4884_v39 = vcombine.high %v4876_v59, %v4876_v59  ;;  %5242 = vst.msk [vmem:[%s8196_s15 + $0x8] sm:$0xf] %vm5239_vm15, %v5231_v27 }
 0x526   : > { %v5147_v17 = vmax.f32 %v5145_v50, %v5146_v12  ;;  %v5153_v58 = vrot.slane %v5152_v0, 4  ;;  %v4885_v26 = vcombine.high %v4883_v45, %v4883_v45  ;;  %v5103_v56 = vsel %vm8555_vm4, %v4876_v59, -inf }
 0x527   : > { %v5134_v30 = vrot.slane %v5133_v31, 2  ;;  %v5140_v57 = vmax.f32 %v5138_v25, %v5139_v32  ;;  %v5104_v8 = vrot.slane %v5103_v56, 4  ;;  %v5110_v29 = vsel %vm8556_vm1, %v4884_v39, -inf }
 0x528   : > { %v5148_v10 = vrot.slane %v5147_v17, 2  ;;  %v5154_v5 = vmax.f32 %v5152_v0, %v5153_v58  ;;  %v5111_v60 = vrot.slane %v5110_v29, 4  ;;  %v5117_v38 = vsel %vm8534_vm0, %v4883_v45, -inf }
 0x529   : > { %v5135_v42 = vmax.f32 %v5133_v31, %v5134_v30  ;;  %v5141_v52 = vrot.slane %v5140_v57, 2  ;;  %v5105_v3 = vmax.f32 %v5103_v56, %v5104_v8  ;;  %v5118_v6 = vrot.slane %v5117_v38, 4 }
 0x52a   : > { %v5149_v55 = vmax.f32 %v5147_v17, %v5148_v10  ;;  %v5155_v53 = vrot.slane %v5154_v5, 2  ;;  %v5112_v18 = vmax.f32 %v5110_v29, %v5111_v60  ;;  %v5124_v62 = vsel %vm8557_vm11, %v4885_v26, -inf }
 0x52b   : > { %v5136_v2 = vrot.slane %v5135_v42, 1  ;;  %v5142_v48 = vmax.f32 %v5140_v57, %v5141_v52  ;;  %v5106_v49 = vrot.slane %v5105_v3, 2  ;;  %v5119_v46 = vmax.f32 %v5117_v38, %v5118_v6 }
 0x52c   : > { %v5150_v14 = vrot.slane %v5149_v55, 1  ;;  %v5156_v9 = vmax.f32 %v5154_v5, %v5155_v53  ;;  %v5113_v40 = vrot.slane %v5112_v18, 2  ;;  %v5125_v7 = vrot.slane %v5124_v62, 4 }
 0x52d   : > { %v5137_v63 = vmax.f32 %v5135_v42, %v5136_v2  ;;  %v5143_v37 = vrot.slane %v5142_v48, 1  ;;  %v5107_v61 = vmax.f32 %v5105_v3, %v5106_v49  ;;  %v5120_v43 = vrot.slane %v5119_v46, 2 }
 0x52e   : > { %v5157_v4 = vrot.slane %v5156_v9, 1  ;;  %v5114_v51 = vmax.f32 %v5112_v18, %v5113_v40  ;;  %v5126_v16 = vmax.f32 %v5124_v62, %v5125_v7  ;;  %v5151_v54 = vmax.f32 %v5149_v55, %v5150_v14 }
 0x52f   : > { %v5144_v47 = vmax.f32 %v5142_v48, %v5143_v37  ;;  %v5108_v28 = vrot.slane %v5107_v61, 1  ;;  %v5121_v36 = vmax.f32 %v5119_v46, %v5120_v43  ;;  %v5196_v33 = vsel %vm3849_vm13, %v5137_v63, -inf }
 0x530   : > { %v5115_v23 = vrot.slane %v5114_v51, 1  ;;  %v5127_v21 = vrot.slane %v5126_v16, 2  ;;  %v5158_v35 = vmax.f32 %v5156_v9, %v5157_v4  ;;  %v5202_v19 = vsel %vm3849_vm13, %v5151_v54, -inf }
 0x531   : > { %v5109_v20 = vmax.f32 %v5107_v61, %v5108_v28  ;;  %v5122_v1 = vrot.slane %v5121_v36, 1  ;;  %v5199_v41 = vsel %vm3849_vm13, %v5144_v47, -inf }
 0x532   : > { %v5116_v22 = vmax.f32 %v5114_v51, %v5115_v23  ;;  %v5128_v59 = vmax.f32 %v5126_v16, %v5127_v21  ;;  %v5205_v27 = vsel %vm3849_vm13, %v5158_v35, -inf }
 0x533   : > { %v5123_v34 = vmax.f32 %v5121_v36, %v5122_v1  ;;  %v5195_v15 = vsel %vm3849_vm13, %v5109_v20, -inf }
 0x534   : > { %v5129_v13 = vrot.slane %v5128_v59, 1  ;;  %v5197_v24 = vmax.f32 %v5195_v15, %v5196_v33  ;;  %v5198_v44 = vsel %vm3849_vm13, %v5116_v22, -inf }
 0x535   : > { %v5200_v11 = vmax.f32 %v5198_v44, %v5199_v41  ;;  %v5201_v50 = vsel %vm3849_vm13, %v5123_v34, -inf }
 0x536   : > { %v5130_v25 = vmax.f32 %v5128_v59, %v5129_v13  ;;  %v5203_v12 = vmax.f32 %v5201_v50, %v5202_v19 }
 0x537   : > { %v5232_v45 = vsel %vm8558_vm14, %v5200_v11, %v5197_v24 }
 0x538   : > { %v5204_v31 = vsel %vm3849_vm13, %v5130_v25, -inf  ;;  %v5233_v32 = vsel %vm4136_vm2, %v5203_v12, %v5232_v45 }
 0x539   : > { %v5206_v0 = vmax.f32 %v5204_v31, %v5205_v27 }
 0x53b   : > { %v5234_v39 = vsel %vm4138_vm3, %v5206_v0, %v5233_v32 }
 0x53c   : > { %5243 = vst.msk [vmem:[%s8196_s15 + $0xc] sm:$0xf] %vm5239_vm15, %v5234_v39 }
 0x53d   : > { %5629 = shalt.err (!%p5626_p3)
}
 0x53e   : > { %s5630_s17 = scalar_lea.hbm %s8283_s30, 256  ;;  %s5634_s11 = scalar_lea.hbm %s8340_s5, 512 }
 0x53f   : > { %p5631_p4 = scmp.ne.s32.totalorder %s8283_s30, %s5630_s17  ;;  %p5635_p9 = scmp.lt.u32.totalorder %s8283_s30, %s8340_s5 }
 0x540   : > { %p5636_p10 = scmp.lt.u32.totalorder %s5634_s11, %s5630_s17  ;;  %p5638_p12 = scmp.lt.u32.totalorder %s5630_s17, %s8283_s30 }
 0x541   : > { %p5632_p7 = pnand %p5631_p4, %p5768_p5 }
 0x542   : > { %p5637_p11 = por %p5636_p10, %p5635_p9 }
 0x543   : > { %p5633_p8 = pneg %p5632_p7 }
 0x544   : > { %p5639_p13 = por %p5638_p12, %p5637_p11 }
 0x546   : > { %p5640_p0 = pnand %p5639_p13, %p5633_p8 }
 0x548   : > { %5643 = shalt.err (!%p5640_p0)
}
 0x549   : > { %s5699_s23 = smov 4  }
 0x54a   : > { %5546 = dma.vmem_to_hbm [thread:$0]  (%p5768_p5), %s8285_s25, 256, %s8283_s30, %s8292_s22, %s5697_s26, %s5697_s26, %s5699_s23  }
 0x54b PF: > { %p5552_p1 = scmp.ge.s32.totalorder %s5678_s21, 2  ;;  %s5273_s13 = sand.u32 1, %s5666_s18  }
 0x54c   : > { %s5274_s14 = scalar_lea.sflag [#allocation5], %s5273_s13 }
 0x54d   : > { %p5549_p2 = pnand %p5552_p1, %p5772_p6 }
 0x54f   : > { %5661 = dma.done.wait (!%p5549_p2), %s5274_s14, 256  }
 0x550   : > { %5663 = vsyncadd (!%p5549_p2), %s5274_s14, 4294967040  ;;  %p15_p3 = scmp.ge.s32.totalorder %s5755_s24, 4   ;;  %s8559_s18 = smov %s5670_s19 }
 0x551   : > { %s8560_s19 = smov %s5674_s20  ;;  %s8561_s20 = smov %s5766_s27 }
 0x552   : > { %s8562_s21 = smov %s5755_s24  ;;  %17 = sbr.rel (!%p15_p3) target bundleno = 3 (0x3), region = 81 }
 0x559   :  { %5279 = vsyncpa [#allocation5], 1 }
 0x55a   :  { %5281 = vsyncpa [#allocation5 + $0x1], 1 }

</bundles_post_ra>
